<compile_context>
chip_gen: v7x
topology: tpu7x:2x2x1
jax: 0.10.0
libtpu: 0.0.40
codegen_flags: <defaults>
</compile_context>

<pallas_src>
import functools

import jax
import jax.numpy as jnp
from jax import lax
from jax.experimental import pallas as pl
from jax.experimental.pallas import tpu as pltpu


# ----------------------------------------------------------------------------
# Helpers
# ----------------------------------------------------------------------------
def _round_up(x, m):
    return (x + m - 1) // m * m


def _cdiv(a, b):
    return (a + b - 1) // b


@functools.lru_cache(maxsize=1)
def _tpu_vmem_bytes():
    try:
        return int(pltpu.get_tpu_info().vmem_capacity_bytes)
    except Exception:
        return 64 * 1024 * 1024  # conservative default (v7x per-TC VMEM)


def _tiling_config():
    """(tm_pref, tn_pref, vmem_limit_bytes) chosen per chip generation."""
    vmem = _tpu_vmem_bytes()
    if vmem >= 96 * 1024 * 1024:
        # v5e / v6e: 128 MiB physical VMEM, single TensorCore.
        return 512, 512, min(96 * 1024 * 1024, (vmem * 3) // 4)
    # v7x: 64 MiB per TensorCore -> smaller tiles, lower cap.
    return 256, 512, min(48 * 1024 * 1024, (vmem * 3) // 4)


_MIN_PALLAS_M = 256
_MIN_PALLAS_FLOPS = 1 << 20


def _use_pallas(m, k, n):
    """Tiny GEMMs are latency/padding bound -> leave them to XLA."""
    return m >= _MIN_PALLAS_M and (m * k * n) >= _MIN_PALLAS_FLOPS


# ----------------------------------------------------------------------------
# Fused matmul + bias + ReLU Pallas kernel (single K block, bf16 operands)
# ----------------------------------------------------------------------------
def _matmul_bias_act_kernel(x_ref, w_ref, b_ref, o_ref, *, relu):
    acc = jnp.dot(x_ref[...], w_ref[...], preferred_element_type=jnp.float32)
    out = acc + b_ref[...]            # f32 epilogue (v5e VPU has no bf16 ALU)
    if relu:
        out = jnp.maximum(out, 0.0)
    o_ref[...] = out.astype(o_ref.dtype)


def fused_dense(x, w, b, *, relu=True):
    """act(x @ w + b). x:(M,K), w:(K,N), b:(N,). bf16 operands, f32 accumulate."""
    m, k = x.shape
    k2, n = w.shape
    assert k == k2 and b.shape == (n,)

    tm_pref, tn_pref, vmem_limit = _tiling_config()

    kp = _round_up(k, 128)                        # single K block (max 2304)
    tn = min(tn_pref, _round_up(n, 128))
    np_ = _round_up(n, tn)
    gn = np_ // tn

    # >=2 M blocks whenever possible so both v7x TensorCores get work.
    gm = max(2, _cdiv(m, tm_pref)) if m >= 16 else 1
    tm = _round_up(_cdiv(m, gm), 8)

    def _fits(tm_):
        per = tm_ * kp * 2 + kp * tn * 2 + tn * 4 + tm_ * tn * 4
        return 2 * per <= (vmem_limit * 4) // 5   # double-buffered, 20% slack

    while not _fits(tm) and tm > 8:
        gm *= 2
        tm = _round_up(_cdiv(m, gm), 8)
    mp = gm * tm

    xp = jnp.pad(x.astype(jnp.bfloat16), ((0, mp - m), (0, kp - k)))
    wp = jnp.pad(w.astype(jnp.bfloat16), ((0, kp - k), (0, np_ - n)))
    bp = jnp.pad(b.astype(jnp.float32), (0, np_ - n)).reshape(1, np_)

    out = pl.pallas_call(
        functools.partial(_matmul_bias_act_kernel, relu=relu),
        out_shape=jax.ShapeDtypeStruct((mp, np_), jnp.float32),
        grid_spec=pltpu.PrefetchScalarGridSpec(
            num_scalar_prefetch=0,
            grid=(gm, gn),
            in_specs=[
                pl.BlockSpec((tm, kp), lambda i, j: (i, 0)),
                pl.BlockSpec((kp, tn), lambda i, j: (0, j)),
                pl.BlockSpec((1, tn), lambda i, j: (0, j)),
            ],
            out_specs=pl.BlockSpec((tm, tn), lambda i, j: (i, j)),
        ),
        compiler_params=pltpu.CompilerParams(
            dimension_semantics=("parallel", "parallel"),
            vmem_limit_bytes=vmem_limit,
        ),
    )(xp, wp, bp)
    return out[:m, :n]


# ----------------------------------------------------------------------------
# Pure-JAX (f32 HIGHEST) primitives: reference + small-layer fallback path
# ----------------------------------------------------------------------------
def ref_dense(x, w, b, *, relu=True):
    y = jnp.matmul(x, w, precision=lax.Precision.HIGHEST) + b
    return jnp.maximum(y, 0.0) if relu else y


def ref_conv2d(x, w_hwio, b, *, stride=1, relu=True):
    ksz = w_hwio.shape[0]
    p = (ksz - 1) // 2
    y = lax.conv_general_dilated(
        x, w_hwio, window_strides=(stride, stride), padding=[(p, p), (p, p)],
        dimension_numbers=("NHWC", "HWIO", "NHWC"),
        precision=lax.Precision.HIGHEST) + b
    return jnp.maximum(y, 0.0) if relu else y


# ----------------------------------------------------------------------------
# Dispatchers: Pallas for big GEMMs, XLA for tiny ones
# ----------------------------------------------------------------------------
def dense(x, w, b, *, relu=True):
    m, k = x.shape
    n = w.shape[1]
    if not _use_pallas(m, k, n):
        return ref_dense(x, w, b, relu=relu)
    return fused_dense(x, w, b, relu=relu)


def conv2d(x, w_hwio, b, *, stride=1, relu=True):
    """PyTorch-style conv (padding=(k-1)//2), NHWC activations, HWIO weights."""
    nb, h, wdt, cin = x.shape
    kh, kw, cin2, cout = w_hwio.shape
    assert cin == cin2
    p = (kh - 1) // 2
    ho = (h + 2 * p - kh) // stride + 1
    wo = (wdt + 2 * p - kw) // stride + 1
    m, k = nb * ho * wo, kh * kw * cin
    if not _use_pallas(m, k, cout):
        return ref_conv2d(x, w_hwio, b, stride=stride, relu=relu)
    # im2col in bf16 (halves the materialized slab); matmul on the MXU.
    xb = jnp.pad(x.astype(jnp.bfloat16), ((0, 0), (p, p), (p, p), (0, 0)))
    cols = []
    for dy in range(kh):
        for dx in range(kw):
            cols.append(xb[:, dy:dy + (ho - 1) * stride + 1:stride,
                           dx:dx + (wo - 1) * stride + 1:stride, :])
    patches = jnp.concatenate(cols, axis=-1).reshape(m, k)
    out = fused_dense(patches, w_hwio.reshape(k, cout), b, relu=relu)
    return out.reshape(nb, ho, wo, cout)


def upsample_nearest(x, s):
    return jnp.repeat(jnp.repeat(x, s, axis=1), s, axis=2)


# ----------------------------------------------------------------------------
# Full PicStegaStampEncoder forward (structure mirrors the PyTorch module)
# ----------------------------------------------------------------------------
def _forward(params, secret, image_nchw, *, secret_hw, dense_fn, conv_fn):
    secret = secret - 0.5
    image = jnp.transpose(image_nchw, (0, 2, 3, 1)) - 0.5  # NHWC

    sd = dense_fn(secret, params["secret_dense"]["w"],
                  params["secret_dense"]["b"], relu=True)
    sd = sd.reshape(-1, secret_hw, secret_hw, 1)
    secret_enlarged = upsample_nearest(sd, 4)

    inputs = jnp.concatenate([secret_enlarged, image], axis=-1)  # 1 + 3 = 4 ch

    def conv(name, x, stride=1, relu=True):
        p = params[name]
        return conv_fn(x, p["w"], p["b"], stride=stride, relu=relu)

    pre = conv("pre_conv", inputs)
    c1 = conv("conv1", pre)
    c2 = conv("conv2", c1, stride=2)
    c3 = conv("conv3", c2, stride=2)
    c4 = conv("conv4", c3, stride=2)
    c5 = conv("conv5", c4, stride=2)
    u6 = conv("up6", upsample_nearest(c5, 2))
    c6 = conv("conv6", jnp.concatenate([c4, u6], axis=-1))
    u7 = conv("up7", upsample_nearest(c6, 2))
    c7 = conv("conv7", jnp.concatenate([c3, u7], axis=-1))
    u8 = conv("up8", upsample_nearest(c7, 2))
    c8 = conv("conv8", jnp.concatenate([c2, u8], axis=-1))
    u9 = conv("up9", upsample_nearest(c8, 2))
    c9 = conv("conv9", jnp.concatenate([c1, u9, inputs], axis=-1))
    residual = conv("residual", c9, relu=False)
    return jnp.transpose(residual, (0, 3, 1, 2))  # back to NCHW


# ----------------------------------------------------------------------------
# Parameter init (kaiming-normal weights like the PyTorch module)
# ----------------------------------------------------------------------------
def init_params(key, secret_len, secret_hw):
    conv_defs = {
        "pre_conv": (4, 8, 3), "conv1": (8, 32, 3), "conv2": (32, 32, 3),
        "conv3": (32, 64, 3), "conv4": (64, 128, 3), "conv5": (128, 256, 3),
        "up6": (256, 128, 3), "conv6": (256, 128, 3), "up7": (128, 64, 3),
        "conv7": (128, 64, 3), "up8": (64, 32, 3), "conv8": (64, 32, 3),
        "up9": (32, 32, 3), "conv9": (68, 32, 3), "residual": (32, 3, 1),
    }
    keys = jax.random.split(key, 2 * (len(conv_defs) + 1))
    d_out = secret_hw * secret_hw  # 1 channel * h * w
    params = {
        "secret_dense": {
            "w": (jnp.sqrt(2.0 / secret_len)
                  * jax.random.normal(keys[0], (secret_len, d_out), jnp.float32)),
            "b": 0.1 * jax.random.normal(keys[1], (d_out,), jnp.float32),
        }
    }
    for i, (name, (cin, cout, ksz)) in enumerate(conv_defs.items()):
        fan_in = ksz * ksz * cin
        params[name] = {
            "w": (jnp.sqrt(2.0 / fan_in)
                  * jax.random.normal(keys[2 * i + 2], (ksz, ksz, cin, cout),
                                      jnp.float32)),
            "b": 0.1 * jax.random.normal(keys[2 * i + 3], (cout,), jnp.float32),
        }
    return params


if __name__ == "__main__":
    SECRET_LEN = 100
    SECRET_HW = 8            # secret dense output reshaped to (B, 1, 8, 8)
    IMG_HW = 4 * SECRET_HW   # 32: must match 4x-upsampled secret map
    B = 2

    key = jax.random.PRNGKey(0)
    k_param, k_secret, k_image = jax.random.split(key, 3)
    params = init_params(k_param, SECRET_LEN, SECRET_HW)
    secret = jax.random.uniform(k_secret, (B, SECRET_LEN), dtype=jnp.float32)
    image = jax.random.uniform(k_image, (B, 3, IMG_HW, IMG_HW), dtype=jnp.float32)

    pallas_forward = jax.jit(functools.partial(
        _forward, secret_hw=SECRET_HW, dense_fn=dense, conv_fn=conv2d))
    ref_forward = jax.jit(functools.partial(
        _forward, secret_hw=SECRET_HW, dense_fn=ref_dense, conv_fn=ref_conv2d))

    out = jax.block_until_ready(pallas_forward(params, secret, image))
    assert out.shape == (B, 3, IMG_HW, IMG_HW), out.shape
    assert out.dtype == jnp.float32
    assert bool(jnp.isfinite(out).all())

    # f32-HIGHEST reference; Pallas path uses bf16 MXU operands (f32 accumulate),
    # so allow a slightly looser absolute tolerance than a pure-f32 comparison.
    ref = jax.block_until_ready(ref_forward(params, secret, image))
    err = float(jnp.max(jnp.abs(out - ref)))
    assert err < 1e-1, f"max abs error vs reference: {err}"

    print("KERNEL_OK")
</pallas_src>

<mosaic_0001>
module attributes {stable_mosaic.version = 11 : i64} {
  func.func @_matmul_bias_act_kernel(%arg0: i32, %arg1: i32, %arg2: memref<256x128xbf16, #tpu.memory_space<vmem>>, %arg3: memref<128x128xbf16, #tpu.memory_space<vmem>>, %arg4: memref<1x128xf32, #tpu.memory_space<vmem>>, %arg5: memref<256x128xf32, #tpu.memory_space<vmem>>) attributes {dimension_semantics = [#tpu.dimension_semantics<parallel>, #tpu.dimension_semantics<parallel>], iteration_bounds = array<i64: 8, 1>, scalar_prefetch = 0 : i64, scratch_operands = 0 : i64, tpu.core_type = #tpu.core_type<tc>, window_params = [{transform_indices = @transform_0, window_bounds = array<i64: 256, 128>}, {transform_indices = @transform_1, window_bounds = array<i64: 128, 128>}, {transform_indices = @transform_2, window_bounds = array<i64: 1, 128>}, {transform_indices = @transform_3, window_bounds = array<i64: 256, 128>}]} {
    %c0 = arith.constant 0 : index
    %c0_0 = arith.constant 0 : index
    %0 = vector.load %arg2[%c0, %c0_0] : memref<256x128xbf16, #tpu.memory_space<vmem>>, vector<256x128xbf16>
    %c0_1 = arith.constant 0 : index
    %c0_2 = arith.constant 0 : index
    %1 = vector.load %arg3[%c0_1, %c0_2] : memref<128x128xbf16, #tpu.memory_space<vmem>>, vector<128x128xbf16>
    %cst = arith.constant dense<0.000000e+00> : vector<256x128xf32>
    %2 = tpu.matmul %0, %1, %cst {dimension_numbers = #tpu.dot_dimension_numbers<[1], [0], [0], [1], [0, 0, 1, 1], [], []>} : vector<256x128xbf16>, vector<128x128xbf16>, vector<256x128xf32> -> vector<256x128xf32>
    %c0_3 = arith.constant 0 : index
    %c0_4 = arith.constant 0 : index
    %3 = vector.load %arg4[%c0_3, %c0_4] : memref<1x128xf32, #tpu.memory_space<vmem>>, vector<1x128xf32>
    %4 = vector.broadcast %3 : vector<1x128xf32> to vector<256x128xf32>
    %5 = arith.addf %2, %4 : vector<256x128xf32>
    %cst_5 = arith.constant 0.000000e+00 : f32
    %6 = vector.broadcast %cst_5 : f32 to vector<256x128xf32>
    %7 = arith.maximumf %5, %6 : vector<256x128xf32>
    %c0_6 = arith.constant 0 : index
    %c0_7 = arith.constant 0 : index
    %8 = vector.load %arg5[%c0_6, %c0_7] : memref<256x128xf32, #tpu.memory_space<vmem>>, vector<256x128xf32>
    tpu.vector_store %arg5[%c0_6, %c0_7], %7 {strides = array<i32>} : memref<256x128xf32, #tpu.memory_space<vmem>>, vector<256x128xf32>,
    return
  }
  func.func @transform_0(%arg0: i32, %arg1: i32) -> (i32, i32) {
    %c0_i32 = arith.constant 0 : i32
    %c0_i32_0 = arith.constant 0 : i32
    return %arg0, %c0_i32 : i32, i32
  }
  func.func @transform_1(%arg0: i32, %arg1: i32) -> (i32, i32) {
    %c0_i32 = arith.constant 0 : i32
    %c0_i32_0 = arith.constant 0 : i32
    return %c0_i32, %arg1 : i32, i32
  }
  func.func @transform_2(%arg0: i32, %arg1: i32) -> (i32, i32) {
    %c0_i32 = arith.constant 0 : i32
    %c0_i32_0 = arith.constant 0 : i32
    return %c0_i32, %arg1 : i32, i32
  }
  func.func @transform_3(%arg0: i32, %arg1: i32) -> (i32, i32) {
    %c0_i32 = arith.constant 0 : i32
    return %arg0, %arg1 : i32, i32
  }
}

module attributes {stable_mosaic.version = 11 : i64} {
  func.func @_matmul_bias_act_kernel(%arg0: i32, %arg1: i32, %arg2: memref<256x384xbf16, #tpu.memory_space<vmem>>, %arg3: memref<384x128xbf16, #tpu.memory_space<vmem>>, %arg4: memref<1x128xf32, #tpu.memory_space<vmem>>, %arg5: memref<256x128xf32, #tpu.memory_space<vmem>>) attributes {dimension_semantics = [#tpu.dimension_semantics<parallel>, #tpu.dimension_semantics<parallel>], iteration_bounds = array<i64: 2, 1>, scalar_prefetch = 0 : i64, scratch_operands = 0 : i64, tpu.core_type = #tpu.core_type<tc>, window_params = [{transform_indices = @transform_0, window_bounds = array<i64: 256, 384>}, {transform_indices = @transform_1, window_bounds = array<i64: 384, 128>}, {transform_indices = @transform_2, window_bounds = array<i64: 1, 128>}, {transform_indices = @transform_3, window_bounds = array<i64: 256, 128>}]} {
    %c0 = arith.constant 0 : index
    %c0_0 = arith.constant 0 : index
    %0 = vector.load %arg2[%c0, %c0_0] : memref<256x384xbf16, #tpu.memory_space<vmem>>, vector<256x384xbf16>
    %c0_1 = arith.constant 0 : index
    %c0_2 = arith.constant 0 : index
    %1 = vector.load %arg3[%c0_1, %c0_2] : memref<384x128xbf16, #tpu.memory_space<vmem>>, vector<384x128xbf16>
    %cst = arith.constant dense<0.000000e+00> : vector<256x128xf32>
    %2 = tpu.matmul %0, %1, %cst {dimension_numbers = #tpu.dot_dimension_numbers<[1], [0], [0], [1], [0, 0, 1, 1], [], []>} : vector<256x384xbf16>, vector<384x128xbf16>, vector<256x128xf32> -> vector<256x128xf32>
    %c0_3 = arith.constant 0 : index
    %c0_4 = arith.constant 0 : index
    %3 = vector.load %arg4[%c0_3, %c0_4] : memref<1x128xf32, #tpu.memory_space<vmem>>, vector<1x128xf32>
    %4 = vector.broadcast %3 : vector<1x128xf32> to vector<256x128xf32>
    %5 = arith.addf %2, %4 : vector<256x128xf32>
    %cst_5 = arith.constant 0.000000e+00 : f32
    %6 = vector.broadcast %cst_5 : f32 to vector<256x128xf32>
    %7 = arith.maximumf %5, %6 : vector<256x128xf32>
    %c0_6 = arith.constant 0 : index
    %c0_7 = arith.constant 0 : index
    %8 = vector.load %arg5[%c0_6, %c0_7] : memref<256x128xf32, #tpu.memory_space<vmem>>, vector<256x128xf32>
    tpu.vector_store %arg5[%c0_6, %c0_7], %7 {strides = array<i32>} : memref<256x128xf32, #tpu.memory_space<vmem>>, vector<256x128xf32>,
    return
  }
  func.func @transform_0(%arg0: i32, %arg1: i32) -> (i32, i32) {
    %c0_i32 = arith.constant 0 : i32
    %c0_i32_0 = arith.constant 0 : i32
    return %arg0, %c0_i32 : i32, i32
  }
  func.func @transform_1(%arg0: i32, %arg1: i32) -> (i32, i32) {
    %c0_i32 = arith.constant 0 : i32
    %c0_i32_0 = arith.constant 0 : i32
    return %c0_i32, %arg1 : i32, i32
  }
  func.func @transform_2(%arg0: i32, %arg1: i32) -> (i32, i32) {
    %c0_i32 = arith.constant 0 : i32
    %c0_i32_0 = arith.constant 0 : i32
    return %c0_i32, %arg1 : i32, i32
  }
  func.func @transform_3(%arg0: i32, %arg1: i32) -> (i32, i32) {
    %c0_i32 = arith.constant 0 : i32
    return %arg0, %arg1 : i32, i32
  }
}

module attributes {stable_mosaic.version = 11 : i64} {
  func.func @_matmul_bias_act_kernel(%arg0: i32, %arg1: i32, %arg2: memref<256x640xbf16, #tpu.memory_space<vmem>>, %arg3: memref<640x128xbf16, #tpu.memory_space<vmem>>, %arg4: memref<1x128xf32, #tpu.memory_space<vmem>>, %arg5: memref<256x128xf32, #tpu.memory_space<vmem>>) attributes {dimension_semantics = [#tpu.dimension_semantics<parallel>, #tpu.dimension_semantics<parallel>], iteration_bounds = array<i64: 2, 1>, scalar_prefetch = 0 : i64, scratch_operands = 0 : i64, tpu.core_type = #tpu.core_type<tc>, window_params = [{transform_indices = @transform_0, window_bounds = array<i64: 256, 640>}, {transform_indices = @transform_1, window_bounds = array<i64: 640, 128>}, {transform_indices = @transform_2, window_bounds = array<i64: 1, 128>}, {transform_indices = @transform_3, window_bounds = array<i64: 256, 128>}]} {
    %c0 = arith.constant 0 : index
    %c0_0 = arith.constant 0 : index
    %0 = vector.load %arg2[%c0, %c0_0] : memref<256x640xbf16, #tpu.memory_space<vmem>>, vector<256x640xbf16>
    %c0_1 = arith.constant 0 : index
    %c0_2 = arith.constant 0 : index
    %1 = vector.load %arg3[%c0_1, %c0_2] : memref<640x128xbf16, #tpu.memory_space<vmem>>, vector<640x128xbf16>
    %cst = arith.constant dense<0.000000e+00> : vector<256x128xf32>
    %2 = tpu.matmul %0, %1, %cst {dimension_numbers = #tpu.dot_dimension_numbers<[1], [0], [0], [1], [0, 0, 1, 1], [], []>} : vector<256x640xbf16>, vector<640x128xbf16>, vector<256x128xf32> -> vector<256x128xf32>
    %c0_3 = arith.constant 0 : index
    %c0_4 = arith.constant 0 : index
    %3 = vector.load %arg4[%c0_3, %c0_4] : memref<1x128xf32, #tpu.memory_space<vmem>>, vector<1x128xf32>
    %4 = vector.broadcast %3 : vector<1x128xf32> to vector<256x128xf32>
    %5 = arith.addf %2, %4 : vector<256x128xf32>
    %cst_5 = arith.constant 0.000000e+00 : f32
    %6 = vector.broadcast %cst_5 : f32 to vector<256x128xf32>
    %7 = arith.maximumf %5, %6 : vector<256x128xf32>
    %c0_6 = arith.constant 0 : index
    %c0_7 = arith.constant 0 : index
    %8 = vector.load %arg5[%c0_6, %c0_7] : memref<256x128xf32, #tpu.memory_space<vmem>>, vector<256x128xf32>
    tpu.vector_store %arg5[%c0_6, %c0_7], %7 {strides = array<i32>} : memref<256x128xf32, #tpu.memory_space<vmem>>, vector<256x128xf32>,
    return
  }
  func.func @transform_0(%arg0: i32, %arg1: i32) -> (i32, i32) {
    %c0_i32 = arith.constant 0 : i32
    %c0_i32_0 = arith.constant 0 : i32
    return %arg0, %c0_i32 : i32, i32
  }
  func.func @transform_1(%arg0: i32, %arg1: i32) -> (i32, i32) {
    %c0_i32 = arith.constant 0 : i32
    %c0_i32_0 = arith.constant 0 : i32
    return %c0_i32, %arg1 : i32, i32
  }
  func.func @transform_2(%arg0: i32, %arg1: i32) -> (i32, i32) {
    %c0_i32 = arith.constant 0 : i32
    %c0_i32_0 = arith.constant 0 : i32
    return %c0_i32, %arg1 : i32, i32
  }
  func.func @transform_3(%arg0: i32, %arg1: i32) -> (i32, i32) {
    %c0_i32 = arith.constant 0 : i32
    return %arg0, %arg1 : i32, i32
  }
}

module attributes {stable_mosaic.version = 11 : i64} {
  func.func @_matmul_bias_act_kernel(%arg0: i32, %arg1: i32, %arg2: memref<256x384xbf16, #tpu.memory_space<vmem>>, %arg3: memref<384x128xbf16, #tpu.memory_space<vmem>>, %arg4: memref<1x128xf32, #tpu.memory_space<vmem>>, %arg5: memref<256x128xf32, #tpu.memory_space<vmem>>) attributes {dimension_semantics = [#tpu.dimension_semantics<parallel>, #tpu.dimension_semantics<parallel>], iteration_bounds = array<i64: 8, 1>, scalar_prefetch = 0 : i64, scratch_operands = 0 : i64, tpu.core_type = #tpu.core_type<tc>, window_params = [{transform_indices = @transform_0, window_bounds = array<i64: 256, 384>}, {transform_indices = @transform_1, window_bounds = array<i64: 384, 128>}, {transform_indices = @transform_2, window_bounds = array<i64: 1, 128>}, {transform_indices = @transform_3, window_bounds = array<i64: 256, 128>}]} {
    %c0 = arith.constant 0 : index
    %c0_0 = arith.constant 0 : index
    %0 = vector.load %arg2[%c0, %c0_0] : memref<256x384xbf16, #tpu.memory_space<vmem>>, vector<256x384xbf16>
    %c0_1 = arith.constant 0 : index
    %c0_2 = arith.constant 0 : index
    %1 = vector.load %arg3[%c0_1, %c0_2] : memref<384x128xbf16, #tpu.memory_space<vmem>>, vector<384x128xbf16>
    %cst = arith.constant dense<0.000000e+00> : vector<256x128xf32>
    %2 = tpu.matmul %0, %1, %cst {dimension_numbers = #tpu.dot_dimension_numbers<[1], [0], [0], [1], [0, 0, 1, 1], [], []>} : vector<256x384xbf16>, vector<384x128xbf16>, vector<256x128xf32> -> vector<256x128xf32>
    %c0_3 = arith.constant 0 : index
    %c0_4 = arith.constant 0 : index
    %3 = vector.load %arg4[%c0_3, %c0_4] : memref<1x128xf32, #tpu.memory_space<vmem>>, vector<1x128xf32>
    %4 = vector.broadcast %3 : vector<1x128xf32> to vector<256x128xf32>
    %5 = arith.addf %2, %4 : vector<256x128xf32>
    %cst_5 = arith.constant 0.000000e+00 : f32
    %6 = vector.broadcast %cst_5 : f32 to vector<256x128xf32>
    %7 = arith.maximumf %5, %6 : vector<256x128xf32>
    %c0_6 = arith.constant 0 : index
    %c0_7 = arith.constant 0 : index
    %8 = vector.load %arg5[%c0_6, %c0_7] : memref<256x128xf32, #tpu.memory_space<vmem>>, vector<256x128xf32>
    tpu.vector_store %arg5[%c0_6, %c0_7], %7 {strides = array<i32>} : memref<256x128xf32, #tpu.memory_space<vmem>>, vector<256x128xf32>,
    return
  }
  func.func @transform_0(%arg0: i32, %arg1: i32) -> (i32, i32) {
    %c0_i32 = arith.constant 0 : i32
    %c0_i32_0 = arith.constant 0 : i32
    return %arg0, %c0_i32 : i32, i32
  }
  func.func @transform_1(%arg0: i32, %arg1: i32) -> (i32, i32) {
    %c0_i32 = arith.constant 0 : i32
    %c0_i32_0 = arith.constant 0 : i32
    return %c0_i32, %arg1 : i32, i32
  }
  func.func @transform_2(%arg0: i32, %arg1: i32) -> (i32, i32) {
    %c0_i32 = arith.constant 0 : i32
    %c0_i32_0 = arith.constant 0 : i32
    return %c0_i32, %arg1 : i32, i32
  }
  func.func @transform_3(%arg0: i32, %arg1: i32) -> (i32, i32) {
    %c0_i32 = arith.constant 0 : i32
    return %arg0, %arg1 : i32, i32
  }
}

module attributes {stable_mosaic.version = 11 : i64} {
  func.func @_matmul_bias_act_kernel(%arg0: i32, %arg1: i32, %arg2: memref<256x640xbf16, #tpu.memory_space<vmem>>, %arg3: memref<640x128xbf16, #tpu.memory_space<vmem>>, %arg4: memref<1x128xf32, #tpu.memory_space<vmem>>, %arg5: memref<256x128xf32, #tpu.memory_space<vmem>>) attributes {dimension_semantics = [#tpu.dimension_semantics<parallel>, #tpu.dimension_semantics<parallel>], iteration_bounds = array<i64: 8, 1>, scalar_prefetch = 0 : i64, scratch_operands = 0 : i64, tpu.core_type = #tpu.core_type<tc>, window_params = [{transform_indices = @transform_0, window_bounds = array<i64: 256, 640>}, {transform_indices = @transform_1, window_bounds = array<i64: 640, 128>}, {transform_indices = @transform_2, window_bounds = array<i64: 1, 128>}, {transform_indices = @transform_3, window_bounds = array<i64: 256, 128>}]} {
    %c0 = arith.constant 0 : index
    %c0_0 = arith.constant 0 : index
    %0 = vector.load %arg2[%c0, %c0_0] : memref<256x640xbf16, #tpu.memory_space<vmem>>, vector<256x640xbf16>
    %c0_1 = arith.constant 0 : index
    %c0_2 = arith.constant 0 : index
    %1 = vector.load %arg3[%c0_1, %c0_2] : memref<640x128xbf16, #tpu.memory_space<vmem>>, vector<640x128xbf16>
    %cst = arith.constant dense<0.000000e+00> : vector<256x128xf32>
    %2 = tpu.matmul %0, %1, %cst {dimension_numbers = #tpu.dot_dimension_numbers<[1], [0], [0], [1], [0, 0, 1, 1], [], []>} : vector<256x640xbf16>, vector<640x128xbf16>, vector<256x128xf32> -> vector<256x128xf32>
    %c0_3 = arith.constant 0 : index
    %c0_4 = arith.constant 0 : index
    %3 = vector.load %arg4[%c0_3, %c0_4] : memref<1x128xf32, #tpu.memory_space<vmem>>, vector<1x128xf32>
    %4 = vector.broadcast %3 : vector<1x128xf32> to vector<256x128xf32>
    %5 = arith.addf %2, %4 : vector<256x128xf32>
    %cst_5 = arith.constant 0.000000e+00 : f32
    %6 = vector.broadcast %cst_5 : f32 to vector<256x128xf32>
    %7 = arith.maximumf %5, %6 : vector<256x128xf32>
    %c0_6 = arith.constant 0 : index
    %c0_7 = arith.constant 0 : index
    %8 = vector.load %arg5[%c0_6, %c0_7] : memref<256x128xf32, #tpu.memory_space<vmem>>, vector<256x128xf32>
    tpu.vector_store %arg5[%c0_6, %c0_7], %7 {strides = array<i32>} : memref<256x128xf32, #tpu.memory_space<vmem>>, vector<256x128xf32>,
    return
  }
  func.func @transform_0(%arg0: i32, %arg1: i32) -> (i32, i32) {
    %c0_i32 = arith.constant 0 : i32
    %c0_i32_0 = arith.constant 0 : i32
    return %arg0, %c0_i32 : i32, i32
  }
  func.func @transform_1(%arg0: i32, %arg1: i32) -> (i32, i32) {
    %c0_i32 = arith.constant 0 : i32
    %c0_i32_0 = arith.constant 0 : i32
    return %c0_i32, %arg1 : i32, i32
  }
  func.func @transform_2(%arg0: i32, %arg1: i32) -> (i32, i32) {
    %c0_i32 = arith.constant 0 : i32
    %c0_i32_0 = arith.constant 0 : i32
    return %c0_i32, %arg1 : i32, i32
  }
  func.func @transform_3(%arg0: i32, %arg1: i32) -> (i32, i32) {
    %c0_i32 = arith.constant 0 : i32
    return %arg0, %arg1 : i32, i32
  }
}

</mosaic_0001>

<bundles_post_ra>
// kernel: _forward.6
= control target key start
LH: loop header
LB: loop body
LE: loop exit
PB: predicated region body
PF: predicated region fallthrough
CT: control target
= control target key end

     0   :  { %s970_s12 = smov 0   ;;  %s972_s13 = smov 0   ;;  %s1120_s0 = inlined_call_operand.vmem [shape: bf16[2048,128], index: 0, kind: input, shape index: {}]   ;;  %s1121_s1 = inlined_call_operand.vmem [shape: bf16[128,128], index: 1, kind: input, shape index: {}]   ;;  %s1122_s2 = inlined_call_operand.vmem [shape: f32[1,128], index: 2, kind: input, shape index: {}]   ;;  %s1123_s3 = inlined_call_operand.vmem [shape: f32[2048,128], index: 3, kind: output, shape index: {}]  }
   0x1   :  { %s974_s14 = smov 0  }
   0x2 LB: > { %s25_s15 = sadd.s32 1, %s944_s13  ;;  %p758_p0 = scmp.ge.s32.totalorder %s948_s14, 1  ;;  %s948_s14 = sphi %s974_s14, %s13_s14   ;;  %s944_s13 = sphi %s972_s13, %s1125_s13   ;;  %s940_s12 = sphi %s970_s12, %s1124_s12  }
   0x3   : > { %p27_p1 = scmp.ge.s32.totalorder %s25_s15, 8  ;;  %p169_p2 = scmp.lt.s32.totalorder %s948_s14, 9 }
   0x5   : > { %s1127_s15 = smov (%p27_p1, %s25_s15), 0  ;;  %p170_p3 = pnand %p758_p0, %p169_p2 }
   0x6   : > { %v902_v0 = vld [vmem:[%s1121_s1] sm:$0xff] (!%p170_p3)   ;;  %s759_s18 = sshll.u32 (!%p170_p3), %s940_s12, 5  ;;  %v903_v1 = vld [vmem:[%s1121_s1 + $0x8] sm:$0xff] (!%p170_p3)   ;;  %v904_v2 = vld [vmem:[%s1121_s1 + $0x10] sm:$0xff] (!%p170_p3)  }
   0x7   : > { %173 = sbr.rel (%p170_p3) target bundleno = 283 (0x11b), region = 32  ;;  %p204_p4 = scmp.lt.s32.totalorder (!%p170_p3), %s759_s18, 255  ;;  %814 = vmatprep.subr.bf16.mxu0 (!%p170_p3), %v902_v0  ;;  %862 = vmatprep.subr.bf16.mxu1 (!%p170_p3), %v902_v0  ;;  %v905_v3 = vld [vmem:[%s1121_s1 + $0x18] sm:$0xff] (!%p170_p3)   ;;  %v906_v6 = vld [vmem:[%s1121_s1 + $0x20] sm:$0xff] (!%p170_p3)   ;;  %v907_v7 = vld [vmem:[%s1121_s1 + $0x28] sm:$0xff] (!%p170_p3)  }
   0x8   : > { %815 = vmatpush3.bf16.msra.mxu0 (!%p170_p3), %v902_v0  ;;  %870 = vmatpush3.bf16.msra.mxu1 (!%p170_p3), %v902_v0  ;;  %v908_v8 = vld [vmem:[%s1121_s1 + $0x30] sm:$0xff] (!%p170_p3)   ;;  %v909_v9 = vld [vmem:[%s1121_s1 + $0x38] sm:$0xff] (!%p170_p3)   ;;  %v1039_v24 = vld [vmem:[%s1122_s2] ss:$0 sm:$0xff] (!%p170_p3) }
   0x9   : > { %816 = vmatprep.subr.bf16.mxu0 (!%p170_p3), %v903_v1  ;;  %863 = vmatprep.subr.bf16.mxu1 (!%p170_p3), %v903_v1 }
   0xc   : > { %817 = vmatpush3.bf16.msra.mxu0 (!%p170_p3), %v903_v1  ;;  %871 = vmatpush3.bf16.msra.mxu1 (!%p170_p3), %v903_v1 }
   0xd   : > { %818 = vmatprep.subr.bf16.mxu0 (!%p170_p3), %v904_v2  ;;  %864 = vmatprep.subr.bf16.mxu1 (!%p170_p3), %v904_v2 }
   0xe   : > { %s1129_s18 = smov (!%p204_p4, %s759_s18), 255 }
   0xf   : > { %s760_s23 = sshll.u32 %s1129_s18, 2  ;;  %s762_s12 = sshll.u32 %s1129_s18, 3 }
  0x10   : > { %s1003_s26 = scalar_lea.vmem %s1120_s0, %s760_s23  ;;  %819 = vmatpush3.bf16.msra.mxu0 %v904_v2  ;;  %872 = vmatpush3.bf16.msra.mxu1 %v904_v2  ;;  %s1047_s19 = scalar_lea.vmem %s1123_s3, %s762_s12 }
  0x11   : > { %v910_v4 = vld [vmem:[%s1003_s26] sm:$0xff]   ;;  %820 = vmatprep.subr.bf16.mxu0 %v905_v3  ;;  %865 = vmatprep.subr.bf16.mxu1 %v905_v3  ;;  %v912_v10 = vld [vmem:[%s1003_s26 + $0x8] sm:$0xff]   ;;  %v914_v12 = vld [vmem:[%s1003_s26 + $0x10] sm:$0xff]  }
  0x12   : > { %v911_v5 = vld [vmem:[%s1003_s26 + $0x40] sm:$0xff]   ;;  %830 = vmatprep.mubr.bf16.mxu0 %v910_v4  ;;  %v913_v11 = vld [vmem:[%s1003_s26 + $0x48] sm:$0xff]   ;;  %v915_v13 = vld [vmem:[%s1003_s26 + $0x50] sm:$0xff]  }
  0x13   : > { %846 = vmatprep.mubr.bf16.mxu1 %v911_v5  ;;  %v916_v14 = vld [vmem:[%s1003_s26 + $0x18] sm:$0xff]   ;;  %v918_v16 = vld [vmem:[%s1003_s26 + $0x20] sm:$0xff]   ;;  %v920_v18 = vld [vmem:[%s1003_s26 + $0x28] sm:$0xff]  }
  0x14   : > { %821 = vmatpush3.bf16.msra.mxu0 %v905_v3  ;;  %873 = vmatpush3.bf16.msra.mxu1 %v905_v3  ;;  %v917_v15 = vld [vmem:[%s1003_s26 + $0x58] sm:$0xff]   ;;  %v919_v17 = vld [vmem:[%s1003_s26 + $0x60] sm:$0xff]   ;;  %v921_v19 = vld [vmem:[%s1003_s26 + $0x68] sm:$0xff]  }
  0x15   : > { %822 = vmatprep.subr.bf16.mxu0 %v906_v6  ;;  %866 = vmatprep.subr.bf16.mxu1 %v906_v6  ;;  %v922_v20 = vld [vmem:[%s1003_s26 + $0x30] sm:$0xff]   ;;  %v924_v22 = vld [vmem:[%s1003_s26 + $0x38] sm:$0xff]  }
  0x16   : > { %v923_v21 = vld [vmem:[%s1003_s26 + $0x70] sm:$0xff]   ;;  %v925_v23 = vld [vmem:[%s1003_s26 + $0x78] sm:$0xff]  }
  0x18   : > { %823 = vmatpush3.bf16.msra.mxu0 %v906_v6  ;;  %874 = vmatpush3.bf16.msra.mxu1 %v906_v6 }
  0x19   : > { %824 = vmatprep.subr.bf16.mxu0 %v907_v7  ;;  %867 = vmatprep.subr.bf16.mxu1 %v907_v7 }
  0x1c   : > { %825 = vmatpush3.bf16.msra.mxu0 %v907_v7  ;;  %875 = vmatpush3.bf16.msra.mxu1 %v907_v7 }
  0x1d   : > { %826 = vmatprep.subr.bf16.mxu0 %v908_v8  ;;  %868 = vmatprep.subr.bf16.mxu1 %v908_v8 }
  0x20   : > { %827 = vmatpush3.bf16.msra.mxu0 %v908_v8  ;;  %876 = vmatpush3.bf16.msra.mxu1 %v908_v8 }
  0x21   : > { %828 = vmatprep.subr.bf16.mxu0 %v909_v9  ;;  %869 = vmatprep.subr.bf16.mxu1 %v909_v9 }
  0x24   : > { %829 = vmatpush3.bf16.msra.mxu0 %v909_v9  ;;  %877 = vmatpush3.bf16.msra.mxu1 %v909_v9 }
  0x27   : > { %831 = vmatmul.mubr.bf16.vlgmr.msra.gmra.mrb[0].mxu0 %v912_v10  ;;  %847 = vmatmul.mubr.bf16.vlgmr.msra.gmra.mrb[0].mxu1 %v913_v11 }
  0x28   : > { %834 = vmatprep.mubr.bf16.mxu0 %v914_v12  ;;  %850 = vmatprep.mubr.bf16.mxu1 %v915_v13 }
  0x2f   : > { %835 = vmatmul.mubr.bf16.gmra.mrb[4].mxu0 %v916_v14  ;;  %851 = vmatmul.mubr.bf16.gmra.mrb[4].mxu1 %v917_v15 }
  0x30   : > { %838 = vmatprep.mubr.bf16.mxu0 %v918_v16  ;;  %854 = vmatprep.mubr.bf16.mxu1 %v919_v17 }
  0x37   : > { %839 = vmatmul.mubr.bf16.gmra.mrb[8].mxu0 %v920_v18  ;;  %855 = vmatmul.mubr.bf16.gmra.mrb[8].mxu1 %v921_v19 }
  0x38   : > { %842 = vmatprep.mubr.bf16.mxu0 %v922_v20  ;;  %858 = vmatprep.mubr.bf16.mxu1 %v923_v21 }
  0x3f   : > { %843 = vmatmul.mubr.bf16.gmra.mrb[12].mxu0 %v924_v22  ;;  %859 = vmatmul.mubr.bf16.gmra.mrb[12].mxu1 %v925_v23 }
  0xfa   : > { %v832_v25 = vpop.f32.mrb[0].mxu0  ;;  %v848_v26 = vpop.f32.mrb[0].mxu1 }
  0xfb   : > { %v468_v27 = vadd.f32 %v832_v25, %v1039_v24  ;;  %v532_v28 = vadd.f32 %v848_v26, %v1039_v24  ;;  %v459_v29 = vpop.f32.mrb[1].mxu0  ;;  %v523_v30 = vpop.f32.mrb[1].mxu1 }
  0xfc   : > { %v460_v31 = vadd.f32 %v1039_v24, %v459_v29  ;;  %v524_v32 = vadd.f32 %v1039_v24, %v523_v30  ;;  %v833_v33 = vpop.f32.mrb[2].mxu0  ;;  %v849_v34 = vpop.f32.mrb[2].mxu1 }
  0xfd   : > { %v588_v35 = vmax.f32 %v468_v27, 0.0  ;;  %v604_v36 = vmax.f32 %v532_v28, 0.0  ;;  %v471_v37 = vadd.f32 %v833_v33, %v1039_v24  ;;  %v535_v38 = vadd.f32 %v849_v34, %v1039_v24  ;;  %v462_v39 = vpop.f32.mrb[3].mxu0  ;;  %v526_v40 = vpop.f32.mrb[3].mxu1 }
  0xfe   : > { %v586_v41 = vmax.f32 %v460_v31, 0.0  ;;  %v602_v42 = vmax.f32 %v524_v32, 0.0  ;;  %v463_v43 = vadd.f32 %v1039_v24, %v462_v39  ;;  %v527_v44 = vadd.f32 %v1039_v24, %v526_v40 }
  0xff   : > { %620 = vst [vmem:[%s1047_s19 + $0x10] sm:$0xff] %v588_v35  ;;  %636 = vst [vmem:[%s1047_s19 + $0x90] sm:$0xff] %v604_v36  ;;  %v589_v45 = vmax.f32 %v471_v37, 0.0  ;;  %v605_v46 = vmax.f32 %v535_v38, 0.0 }
 0x100   : > { %618 = vst [vmem:[%s1047_s19] sm:$0xff] %v586_v41  ;;  %634 = vst [vmem:[%s1047_s19 + $0x80] sm:$0xff] %v602_v42  ;;  %v587_v47 = vmax.f32 %v463_v43, 0.0  ;;  %v603_v48 = vmax.f32 %v527_v44, 0.0 }
 0x101   : > { %621 = vst [vmem:[%s1047_s19 + $0x18] sm:$0xff] %v589_v45  ;;  %637 = vst [vmem:[%s1047_s19 + $0x98] sm:$0xff] %v605_v46 }
 0x102   : > { %619 = vst [vmem:[%s1047_s19 + $0x8] sm:$0xff] %v587_v47  ;;  %635 = vst [vmem:[%s1047_s19 + $0x88] sm:$0xff] %v603_v48  ;;  %v836_v49 = vpop.f32.mrb[4].mxu0  ;;  %v852_v50 = vpop.f32.mrb[4].mxu1 }
 0x103   : > { %v484_v51 = vadd.f32 %v836_v49, %v1039_v24  ;;  %v548_v52 = vadd.f32 %v852_v50, %v1039_v24  ;;  %v475_v53 = vpop.f32.mrb[5].mxu0  ;;  %v539_v54 = vpop.f32.mrb[5].mxu1 }
 0x104   : > { %v476_v55 = vadd.f32 %v1039_v24, %v475_v53  ;;  %v540_v56 = vadd.f32 %v1039_v24, %v539_v54  ;;  %v837_v57 = vpop.f32.mrb[6].mxu0  ;;  %v853_v58 = vpop.f32.mrb[6].mxu1 }
 0x105   : > { %v592_v59 = vmax.f32 %v484_v51, 0.0  ;;  %v608_v60 = vmax.f32 %v548_v52, 0.0  ;;  %v487_v61 = vadd.f32 %v837_v57, %v1039_v24  ;;  %v551_v62 = vadd.f32 %v853_v58, %v1039_v24  ;;  %v478_v63 = vpop.f32.mrb[7].mxu0  ;;  %v542_v0 = vpop.f32.mrb[7].mxu1 }
 0x106   : > { %v590_v1 = vmax.f32 %v476_v55, 0.0  ;;  %v606_v2 = vmax.f32 %v540_v56, 0.0  ;;  %v479_v3 = vadd.f32 %v1039_v24, %v478_v63  ;;  %v543_v4 = vadd.f32 %v1039_v24, %v542_v0 }
 0x107   : > { %624 = vst [vmem:[%s1047_s19 + $0x30] sm:$0xff] %v592_v59  ;;  %640 = vst [vmem:[%s1047_s19 + $0xb0] sm:$0xff] %v608_v60  ;;  %v593_v5 = vmax.f32 %v487_v61, 0.0  ;;  %v609_v6 = vmax.f32 %v551_v62, 0.0 }
 0x108   : > { %622 = vst [vmem:[%s1047_s19 + $0x20] sm:$0xff] %v590_v1  ;;  %638 = vst [vmem:[%s1047_s19 + $0xa0] sm:$0xff] %v606_v2  ;;  %v591_v7 = vmax.f32 %v479_v3, 0.0  ;;  %v607_v8 = vmax.f32 %v543_v4, 0.0 }
 0x109   : > { %625 = vst [vmem:[%s1047_s19 + $0x38] sm:$0xff] %v593_v5  ;;  %641 = vst [vmem:[%s1047_s19 + $0xb8] sm:$0xff] %v609_v6 }
 0x10a   : > { %623 = vst [vmem:[%s1047_s19 + $0x28] sm:$0xff] %v591_v7  ;;  %639 = vst [vmem:[%s1047_s19 + $0xa8] sm:$0xff] %v607_v8  ;;  %v840_v9 = vpop.f32.mrb[8].mxu0  ;;  %v856_v10 = vpop.f32.mrb[8].mxu1 }
 0x10b   : > { %v500_v11 = vadd.f32 %v840_v9, %v1039_v24  ;;  %v564_v12 = vadd.f32 %v856_v10, %v1039_v24  ;;  %v491_v13 = vpop.f32.mrb[9].mxu0  ;;  %v555_v14 = vpop.f32.mrb[9].mxu1 }
 0x10c   : > { %v492_v15 = vadd.f32 %v1039_v24, %v491_v13  ;;  %v556_v16 = vadd.f32 %v1039_v24, %v555_v14  ;;  %v841_v17 = vpop.f32.mrb[10].mxu0  ;;  %v857_v18 = vpop.f32.mrb[10].mxu1 }
 0x10d   : > { %v596_v19 = vmax.f32 %v500_v11, 0.0  ;;  %v612_v20 = vmax.f32 %v564_v12, 0.0  ;;  %v503_v21 = vadd.f32 %v841_v17, %v1039_v24  ;;  %v567_v22 = vadd.f32 %v857_v18, %v1039_v24  ;;  %v494_v23 = vpop.f32.mrb[11].mxu0  ;;  %v558_v25 = vpop.f32.mrb[11].mxu1 }
 0x10e   : > { %v594_v26 = vmax.f32 %v492_v15, 0.0  ;;  %v610_v27 = vmax.f32 %v556_v16, 0.0  ;;  %v495_v28 = vadd.f32 %v1039_v24, %v494_v23  ;;  %v559_v29 = vadd.f32 %v1039_v24, %v558_v25 }
 0x10f   : > { %628 = vst [vmem:[%s1047_s19 + $0x50] sm:$0xff] %v596_v19  ;;  %644 = vst [vmem:[%s1047_s19 + $0xd0] sm:$0xff] %v612_v20  ;;  %v597_v30 = vmax.f32 %v503_v21, 0.0  ;;  %v613_v31 = vmax.f32 %v567_v22, 0.0 }
 0x110   : > { %626 = vst [vmem:[%s1047_s19 + $0x40] sm:$0xff] %v594_v26  ;;  %642 = vst [vmem:[%s1047_s19 + $0xc0] sm:$0xff] %v610_v27  ;;  %v595_v32 = vmax.f32 %v495_v28, 0.0  ;;  %v611_v33 = vmax.f32 %v559_v29, 0.0 }
 0x111   : > { %629 = vst [vmem:[%s1047_s19 + $0x58] sm:$0xff] %v597_v30  ;;  %645 = vst [vmem:[%s1047_s19 + $0xd8] sm:$0xff] %v613_v31 }
 0x112   : > { %627 = vst [vmem:[%s1047_s19 + $0x48] sm:$0xff] %v595_v32  ;;  %643 = vst [vmem:[%s1047_s19 + $0xc8] sm:$0xff] %v611_v33  ;;  %v844_v34 = vpop.f32.mrb[12].mxu0  ;;  %v860_v35 = vpop.f32.mrb[12].mxu1 }
 0x113   : > { %v516_v36 = vadd.f32 %v844_v34, %v1039_v24  ;;  %v580_v37 = vadd.f32 %v860_v35, %v1039_v24  ;;  %v507_v38 = vpop.f32.mrb[13].mxu0  ;;  %v571_v39 = vpop.f32.mrb[13].mxu1 }
 0x114   : > { %v508_v40 = vadd.f32 %v1039_v24, %v507_v38  ;;  %v572_v41 = vadd.f32 %v1039_v24, %v571_v39  ;;  %v845_v42 = vpop.f32.mrb[14].mxu0  ;;  %v861_v43 = vpop.f32.mrb[14].mxu1 }
 0x115   : > { %v600_v44 = vmax.f32 %v516_v36, 0.0  ;;  %v616_v45 = vmax.f32 %v580_v37, 0.0  ;;  %v519_v46 = vadd.f32 %v845_v42, %v1039_v24  ;;  %v583_v47 = vadd.f32 %v861_v43, %v1039_v24  ;;  %v510_v48 = vpop.f32.mrb[15].mxu0  ;;  %v574_v49 = vpop.f32.mrb[15].mxu1 }
 0x116   : > { %v598_v50 = vmax.f32 %v508_v40, 0.0  ;;  %v614_v51 = vmax.f32 %v572_v41, 0.0  ;;  %v511_v52 = vadd.f32 %v1039_v24, %v510_v48  ;;  %v575_v53 = vadd.f32 %v1039_v24, %v574_v49 }
 0x117   : > { %632 = vst [vmem:[%s1047_s19 + $0x70] sm:$0xff] %v600_v44  ;;  %648 = vst [vmem:[%s1047_s19 + $0xf0] sm:$0xff] %v616_v45  ;;  %v601_v54 = vmax.f32 %v519_v46, 0.0  ;;  %v617_v55 = vmax.f32 %v583_v47, 0.0 }
 0x118   : > { %630 = vst [vmem:[%s1047_s19 + $0x60] sm:$0xff] %v598_v50  ;;  %646 = vst [vmem:[%s1047_s19 + $0xe0] sm:$0xff] %v614_v51  ;;  %v599_v56 = vmax.f32 %v511_v52, 0.0  ;;  %v615_v57 = vmax.f32 %v575_v53, 0.0 }
 0x119   : > { %633 = vst [vmem:[%s1047_s19 + $0x78] sm:$0xff] %v601_v54  ;;  %649 = vst [vmem:[%s1047_s19 + $0xf8] sm:$0xff] %v617_v55 }
 0x11a   : > { %631 = vst [vmem:[%s1047_s19 + $0x68] sm:$0xff] %v599_v56  ;;  %647 = vst [vmem:[%s1047_s19 + $0xe8] sm:$0xff] %v615_v57 }
 0x11b PF: > { %s13_s14 = sadd.s32 1, %s948_s14   ;;  %s1124_s12 = smov %s944_s13 }
 0x11c   : > { %p10_p5 = scmp.ge.s32.totalorder %s13_s14, 10   ;;  %s1125_s13 = smov %s1127_s15 }
 0x11e   :  { %12 = sbr.rel (!%p10_p5) target bundleno = 2 (0x2), region = 68 }

// kernel: _forward.7
= control target key start
LH: loop header
LB: loop body
LE: loop exit
PB: predicated region body
PF: predicated region fallthrough
CT: control target
= control target key end

     0   :  { %s1679_s12 = smov 0   ;;  %s1681_s13 = smov 0   ;;  %s1939_s0 = inlined_call_operand.vmem [shape: bf16[512,384], index: 0, kind: input, shape index: {}]   ;;  %s1940_s1 = inlined_call_operand.vmem [shape: bf16[384,128], index: 1, kind: input, shape index: {}]   ;;  %s1941_s2 = inlined_call_operand.vmem [shape: f32[1,128], index: 2, kind: input, shape index: {}]   ;;  %s1942_s3 = inlined_call_operand.vmem [shape: f32[512,128], index: 3, kind: output, shape index: {}]  }
   0x1   :  { %s1683_s14 = smov 0  }
   0x2 LB: > { %s25_s15 = sadd.s32 1, %s1653_s13  ;;  %p1242_p0 = scmp.ge.s32.totalorder %s1657_s14, 1  ;;  %s1657_s14 = sphi %s1683_s14, %s13_s14   ;;  %s1653_s13 = sphi %s1681_s13, %s1944_s13   ;;  %s1649_s12 = sphi %s1679_s12, %s1943_s12  }
   0x3   : > { %p27_p1 = scmp.ge.s32.totalorder %s25_s15, 2  ;;  %p170_p2 = scmp.lt.s32.totalorder %s1657_s14, 3 }
   0x5   : > { %s1946_s15 = smov (%p27_p1, %s25_s15), 0  ;;  %p171_p3 = pnand %p1242_p0, %p170_p2 }
   0x6   : > { %v1547_v0 = vld [vmem:[%s1940_s1 + $0x40] sm:$0xff] (!%p171_p3)   ;;  %s1243_s18 = sshll.u32 (!%p171_p3), %s1649_s12, 5  ;;  %v1549_v2 = vld [vmem:[%s1940_s1 + $0x48] sm:$0xff] (!%p171_p3)   ;;  %v1551_v4 = vld [vmem:[%s1940_s1 + $0x50] sm:$0xff] (!%p171_p3)  }
   0x7   : > { %174 = sbr.rel (%p171_p3) target bundleno = 351 (0x15f), region = 32  ;;  %v1548_v1 = vld [vmem:[%s1940_s1] sm:$0xff] (!%p171_p3)   ;;  %1322 = vmatprep.subr.bf16.mxu0 (!%p171_p3), %v1547_v0  ;;  %1506 = vmatprep.subr.bf16.mxu1 (!%p171_p3), %v1547_v0  ;;  %p206_p4 = scmp.lt.s32.totalorder (!%p171_p3), %s1243_s18, 63  ;;  %v1550_v3 = vld [vmem:[%s1940_s1 + $0x8] sm:$0xff] (!%p171_p3)   ;;  %v1552_v5 = vld [vmem:[%s1940_s1 + $0x10] sm:$0xff] (!%p171_p3)  }
   0x8   : > { %1323 = vmatpush3.bf16.msra.mxu0 (!%p171_p3), %v1548_v1  ;;  %1514 = vmatpush3.bf16.msra.mxu1 (!%p171_p3), %v1548_v1  ;;  %v1553_v6 = vld [vmem:[%s1940_s1 + $0x58] sm:$0xff] (!%p171_p3)   ;;  %v1555_v8 = vld [vmem:[%s1940_s1 + $0x60] sm:$0xff] (!%p171_p3)   ;;  %v1557_v10 = vld [vmem:[%s1940_s1 + $0x68] sm:$0xff] (!%p171_p3)  }
   0x9   : > { %1324 = vmatprep.subr.bf16.mxu0 (!%p171_p3), %v1549_v2  ;;  %1507 = vmatprep.subr.bf16.mxu1 (!%p171_p3), %v1549_v2  ;;  %v1554_v7 = vld [vmem:[%s1940_s1 + $0x18] sm:$0xff] (!%p171_p3)   ;;  %v1556_v9 = vld [vmem:[%s1940_s1 + $0x20] sm:$0xff] (!%p171_p3)   ;;  %v1558_v13 = vld [vmem:[%s1940_s1 + $0x28] sm:$0xff] (!%p171_p3)  }
   0xa   : > { %v1559_v14 = vld [vmem:[%s1940_s1 + $0x70] sm:$0xff] (!%p171_p3)   ;;  %v1561_v16 = vld [vmem:[%s1940_s1 + $0x78] sm:$0xff] (!%p171_p3)   ;;  %v1569_v18 = vld [vmem:[%s1940_s1 + $0x80] sm:$0xff] (!%p171_p3)  }
   0xb   : > { %v1560_v15 = vld [vmem:[%s1940_s1 + $0x30] sm:$0xff] (!%p171_p3)   ;;  %v1562_v17 = vld [vmem:[%s1940_s1 + $0x38] sm:$0xff] (!%p171_p3)   ;;  %v1570_v22 = vld [vmem:[%s1940_s1 + $0x88] sm:$0xff] (!%p171_p3)  }
   0xc   : > { %1325 = vmatpush3.bf16.msra.mxu0 (!%p171_p3), %v1550_v3  ;;  %1515 = vmatpush3.bf16.msra.mxu1 (!%p171_p3), %v1550_v3  ;;  %v1577_v25 = vld [vmem:[%s1940_s1 + $0x90] sm:$0xff] (!%p171_p3)   ;;  %v1578_v27 = vld [vmem:[%s1940_s1 + $0x98] sm:$0xff] (!%p171_p3)   ;;  %v1585_v30 = vld [vmem:[%s1940_s1 + $0xa0] sm:$0xff] (!%p171_p3)  }
   0xd   : > { %1326 = vmatprep.subr.bf16.mxu0 (!%p171_p3), %v1551_v4  ;;  %1508 = vmatprep.subr.bf16.mxu1 (!%p171_p3), %v1551_v4  ;;  %v1586_v33 = vld [vmem:[%s1940_s1 + $0xa8] sm:$0xff] (!%p171_p3)   ;;  %v1593_v36 = vld [vmem:[%s1940_s1 + $0xb0] sm:$0xff] (!%p171_p3)   ;;  %v1594_v40 = vld [vmem:[%s1940_s1 + $0xb8] sm:$0xff] (!%p171_p3)  }
   0xe   : > { %s1948_s18 = smov (!%p206_p4, %s1243_s18), 63 }
   0xf   : > { %s1522_s4 = smul.u32 12, %s1948_s18  ;;  %s1246_s25 = sshll.u32 %s1948_s18, 3 }
  0x10   : > { %1327 = vmatpush3.bf16.msra.mxu0 %v1552_v5  ;;  %1516 = vmatpush3.bf16.msra.mxu1 %v1552_v5  ;;  %s1853_s28 = scalar_lea.vmem %s1942_s3, %s1246_s25 }
  0x11   : > { %1328 = vmatprep.subr.bf16.mxu0 %v1553_v6  ;;  %1509 = vmatprep.subr.bf16.mxu1 %v1553_v6  ;;  %s1730_s11 = scalar_lea.vmem %s1939_s0, %s1522_s4 }
  0x12   : > { %v1565_v11 = vld [vmem:[%s1730_s11 + $0x4] ss:$12 sps:$4 sm:$0xff]   ;;  %v1563_v19 = vld [vmem:[%s1730_s11] ss:$12 sps:$4 sm:$0xff]   ;;  %v1571_v21 = vld [vmem:[%s1730_s11 + $0x1c] ss:$12 sps:$4 sm:$0xff]  }
  0x13   : > { %v1568_v12 = vld [vmem:[%s1730_s11 + $0x124] ss:$12 sps:$4 sm:$0xff]   ;;  %780 = vmatprep.mubr.bf16.mxu0 %v1565_v11  ;;  %v1566_v20 = vld [vmem:[%s1730_s11 + $0x120] ss:$12 sps:$4 sm:$0xff]   ;;  %v1573_v23 = vld [vmem:[%s1730_s11 + $0x13c] ss:$12 sps:$4 sm:$0xff]  }
  0x14   : > { %1329 = vmatpush3.bf16.msra.mxu0 %v1554_v7  ;;  %1517 = vmatpush3.bf16.msra.mxu1 %v1554_v7  ;;  %v1575_v24 = vld [vmem:[%s1730_s11 + $0x18] ss:$12 sps:$4 sm:$0xff]   ;;  %v1579_v28 = vld [vmem:[%s1730_s11 + $0x34] ss:$12 sps:$4 sm:$0xff]   ;;  %v1583_v31 = vld [vmem:[%s1730_s11 + $0x30] ss:$12 sps:$4 sm:$0xff]  }
  0x15   : > { %1330 = vmatprep.subr.bf16.mxu0 %v1555_v8  ;;  %1510 = vmatprep.subr.bf16.mxu1 %v1555_v8  ;;  %v1576_v26 = vld [vmem:[%s1730_s11 + $0x138] ss:$12 sps:$4 sm:$0xff]   ;;  %v1581_v29 = vld [vmem:[%s1730_s11 + $0x154] ss:$12 sps:$4 sm:$0xff]   ;;  %v1584_v32 = vld [vmem:[%s1730_s11 + $0x150] ss:$12 sps:$4 sm:$0xff]  }
  0x16   : > { %876 = vmatprep.mubr.bf16.mxu1 %v1568_v12  ;;  %v1587_v34 = vld [vmem:[%s1730_s11 + $0x4c] ss:$12 sps:$4 sm:$0xff]   ;;  %v1591_v37 = vld [vmem:[%s1730_s11 + $0x48] ss:$12 sps:$4 sm:$0xff]   ;;  %v1595_v39 = vld [vmem:[%s1730_s11 + $0x64] ss:$12 sps:$4 sm:$0xff]  }
  0x17   : > { %v1589_v35 = vld [vmem:[%s1730_s11 + $0x16c] ss:$12 sps:$4 sm:$0xff]   ;;  %v1592_v38 = vld [vmem:[%s1730_s11 + $0x168] ss:$12 sps:$4 sm:$0xff]   ;;  %v1604_v47 = vld [vmem:[%s1730_s11 + $0x50] ss:$12 sps:$4 sm:$0xff]  }
  0x18   : > { %1331 = vmatpush3.bf16.msra.mxu0 %v1556_v9  ;;  %1518 = vmatpush3.bf16.msra.mxu1 %v1556_v9  ;;  %v1597_v41 = vld [vmem:[%s1730_s11 + $0x8] ss:$12 sps:$4 sm:$0xff]   ;;  %v1598_v42 = vld [vmem:[%s1730_s11 + $0x60] ss:$12 sps:$4 sm:$0xff]   ;;  %v1602_v45 = vld [vmem:[%s1730_s11 + $0x38] ss:$12 sps:$4 sm:$0xff]  }
  0x19   : > { %1332 = vmatprep.subr.bf16.mxu0 %v1557_v10  ;;  %1511 = vmatprep.subr.bf16.mxu1 %v1557_v10  ;;  %v1599_v43 = vld [vmem:[%s1730_s11 + $0x20] ss:$12 sps:$4 sm:$0xff]   ;;  %v1600_v44 = vld [vmem:[%s1730_s11 + $0x7c] ss:$12 sps:$4 sm:$0xff]   ;;  %v1603_v46 = vld [vmem:[%s1730_s11 + $0x78] ss:$12 sps:$4 sm:$0xff]  }
  0x1a   : > { %v1605_v48 = vld [vmem:[%s1730_s11 + $0x94] ss:$12 sps:$4 sm:$0xff]   ;;  %v1608_v50 = vld [vmem:[%s1730_s11 + $0x90] ss:$12 sps:$4 sm:$0xff]   ;;  %v1610_v52 = vld [vmem:[%s1730_s11 + $0xac] ss:$12 sps:$4 sm:$0xff]  }
  0x1b   : > { %v1607_v49 = vld [vmem:[%s1730_s11 + $0x68] ss:$12 sps:$4 sm:$0xff]   ;;  %v1609_v51 = vld [vmem:[%s1730_s11 + $0x80] ss:$12 sps:$4 sm:$0xff]   ;;  %v1612_v53 = vld [vmem:[%s1730_s11 + $0x98] ss:$12 sps:$4 sm:$0xff]  }
  0x1c   : > { %1333 = vmatpush3.bf16.msra.mxu0 %v1558_v13  ;;  %1519 = vmatpush3.bf16.msra.mxu1 %v1558_v13  ;;  %v1613_v54 = vld [vmem:[%s1730_s11 + $0xa8] ss:$12 sps:$4 sm:$0xff]   ;;  %v1614_v55 = vld [vmem:[%s1730_s11 + $0xb0] ss:$12 sps:$4 sm:$0xff]   ;;  %v1618_v58 = vld [vmem:[%s1730_s11 + $0xc0] ss:$12 sps:$4 sm:$0xff]  }
  0x1d   : > { %1334 = vmatprep.subr.bf16.mxu0 %v1559_v14  ;;  %1512 = vmatprep.subr.bf16.mxu1 %v1559_v14  ;;  %v1615_v56 = vld [vmem:[%s1730_s11 + $0xc4] ss:$12 sps:$4 sm:$0xff]   ;;  %v1617_v57 = vld [vmem:[%s1730_s11 + $0xc8] ss:$12 sps:$4 sm:$0xff]   ;;  %v1619_v59 = vld [vmem:[%s1730_s11 + $0xe0] ss:$12 sps:$4 sm:$0xff]  }
  0x1e   : > { %v1620_v60 = vld [vmem:[%s1730_s11 + $0xdc] ss:$12 sps:$4 sm:$0xff]   ;;  %v1622_v61 = vld [vmem:[%s1730_s11 + $0xf8] ss:$12 sps:$4 sm:$0xff]   ;;  %v1625_v0 = vld [vmem:[%s1730_s11 + $0xf4] ss:$12 sps:$4 sm:$0xff]  }
  0x1f   : > { %v1623_v62 = vld [vmem:[%s1730_s11 + $0xd8] ss:$12 sps:$4 sm:$0xff]   ;;  %v1624_v63 = vld [vmem:[%s1730_s11 + $0x110] ss:$12 sps:$4 sm:$0xff]   ;;  %v1627_v1 = vld [vmem:[%s1730_s11 + $0x128] ss:$12 sps:$4 sm:$0xff]  }
  0x20   : > { %1335 = vmatpush3.bf16.msra.mxu0 %v1560_v15  ;;  %1520 = vmatpush3.bf16.msra.mxu1 %v1560_v15  ;;  %v1628_v2 = vld [vmem:[%s1730_s11 + $0xf0] ss:$12 sps:$4 sm:$0xff]   ;;  %v1629_v3 = vld [vmem:[%s1730_s11 + $0x140] ss:$12 sps:$4 sm:$0xff]   ;;  %v1632_v5 = vld [vmem:[%s1730_s11 + $0x158] ss:$12 sps:$4 sm:$0xff]  }
  0x21   : > { %1336 = vmatprep.subr.bf16.mxu0 %v1561_v16  ;;  %1513 = vmatprep.subr.bf16.mxu1 %v1561_v16  ;;  %v1630_v4 = vld [vmem:[%s1730_s11 + $0x10c] ss:$12 sps:$4 sm:$0xff]   ;;  %v1633_v6 = vld [vmem:[%s1730_s11 + $0x108] ss:$12 sps:$4 sm:$0xff]   ;;  %v1634_v7 = vld [vmem:[%s1730_s11 + $0x170] ss:$12 sps:$4 sm:$0xff]  }
  0x24   : > { %1337 = vmatpush3.bf16.msra.mxu0 %v1562_v17  ;;  %1521 = vmatpush3.bf16.msra.mxu1 %v1562_v17 }
  0x25   : > { %1458 = vmatprep.subr.bf16.mxu1 %v1569_v18 }
  0x27   : > { %781 = vmatmul.mubr.bf16.vlgmr.msra.gmra.mrb[0].mxu0 %v1563_v19  ;;  %877 = vmatmul.mubr.bf16.vlgmr.msra.gmra.mrb[0].mxu1 %v1566_v20 }
  0x28   : > { %1459 = vmatpush3.bf16.msra.mxu1 %v1569_v18  ;;  %788 = vmatprep.mubr.bf16.mxu0 %v1571_v21 }
  0x29   : > { %1460 = vmatprep.subr.bf16.mxu1 %v1570_v22  ;;  %884 = vmatprep.mubr.bf16.mxu1 %v1573_v23 }
  0x2c   : > { %1461 = vmatpush3.bf16.msra.mxu1 %v1570_v22 }
  0x2d   : > { %1462 = vmatprep.subr.bf16.mxu1 %v1577_v25 }
  0x2f   : > { %789 = vmatmul.mubr.bf16.gmra.mrb[4].mxu0 %v1575_v24  ;;  %885 = vmatmul.mubr.bf16.gmra.mrb[4].mxu1 %v1576_v26 }
  0x30   : > { %1463 = vmatpush3.bf16.msra.mxu1 %v1577_v25  ;;  %796 = vmatprep.mubr.bf16.mxu0 %v1579_v28 }
  0x31   : > { %1464 = vmatprep.subr.bf16.mxu1 %v1578_v27  ;;  %892 = vmatprep.mubr.bf16.mxu1 %v1581_v29 }
  0x34   : > { %1465 = vmatpush3.bf16.msra.mxu1 %v1578_v27 }
  0x35   : > { %1466 = vmatprep.subr.bf16.mxu1 %v1585_v30 }
  0x37   : > { %797 = vmatmul.mubr.bf16.gmra.mrb[8].mxu0 %v1583_v31  ;;  %893 = vmatmul.mubr.bf16.gmra.mrb[8].mxu1 %v1584_v32 }
  0x38   : > { %1467 = vmatpush3.bf16.msra.mxu1 %v1585_v30  ;;  %804 = vmatprep.mubr.bf16.mxu0 %v1587_v34 }
  0x39   : > { %1468 = vmatprep.subr.bf16.mxu1 %v1586_v33  ;;  %900 = vmatprep.mubr.bf16.mxu1 %v1589_v35 }
  0x3c   : > { %1469 = vmatpush3.bf16.msra.mxu1 %v1586_v33 }
  0x3d   : > { %1470 = vmatprep.subr.bf16.mxu1 %v1593_v36 }
  0x3f   : > { %805 = vmatmul.mubr.bf16.gmra.mrb[12].mxu0 %v1591_v37  ;;  %901 = vmatmul.mubr.bf16.gmra.mrb[12].mxu1 %v1592_v38 }
  0x40   : > { %1471 = vmatpush3.bf16.msra.mxu1 %v1593_v36  ;;  %812 = vmatprep.mubr.bf16.mxu0 %v1595_v39 }
  0x41   : > { %1472 = vmatprep.subr.bf16.mxu1 %v1594_v40  ;;  %1474 = vmatprep.mubr.bf16.mxu1 %v1597_v41 }
  0x44   : > { %1473 = vmatpush3.bf16.msra.mxu1 %v1594_v40 }
  0x47   : > { %813 = vmatmul.mubr.bf16.gmra.mrb[16].mxu0 %v1598_v42  ;;  %1475 = vmatmul.mubr.bf16.vlgmr.msra.gmra.mrb[16].mxu1 %v1599_v43 }
  0x48   : > { %820 = vmatprep.mubr.bf16.mxu0 %v1600_v44  ;;  %1478 = vmatprep.mubr.bf16.mxu1 %v1602_v45 }
  0x4f   : > { %821 = vmatmul.mubr.bf16.gmra.mrb[20].mxu0 %v1603_v46  ;;  %1479 = vmatmul.mubr.bf16.gmra.mrb[20].mxu1 %v1604_v47 }
  0x50   : > { %828 = vmatprep.mubr.bf16.mxu0 %v1605_v48  ;;  %1482 = vmatprep.mubr.bf16.mxu1 %v1607_v49 }
  0x57   : > { %829 = vmatmul.mubr.bf16.gmra.mrb[24].mxu0 %v1608_v50  ;;  %1483 = vmatmul.mubr.bf16.gmra.mrb[24].mxu1 %v1609_v51 }
  0x58   : > { %836 = vmatprep.mubr.bf16.mxu0 %v1610_v52  ;;  %1486 = vmatprep.mubr.bf16.mxu1 %v1612_v53 }
  0x5f   : > { %837 = vmatmul.mubr.bf16.gmra.mrb[28].mxu0 %v1613_v54  ;;  %1487 = vmatmul.mubr.bf16.gmra.mrb[28].mxu1 %v1614_v55 }
  0x60   : > { %844 = vmatprep.mubr.bf16.mxu0 %v1615_v56  ;;  %1490 = vmatprep.mubr.bf16.mxu1 %v1617_v57  ;;  %v1844_v56 = vld [vmem:[%s1941_s2] ss:$0 sm:$0xff] }
  0x67   : > { %845 = vmatmul.mubr.bf16.gmra.mrb[32].mxu0 %v1618_v58  ;;  %1491 = vmatmul.mubr.bf16.gmra.mrb[32].mxu1 %v1619_v59 }
  0x68   : > { %852 = vmatprep.mubr.bf16.mxu0 %v1620_v60  ;;  %1494 = vmatprep.mubr.bf16.mxu1 %v1622_v61 }
  0x6f   : > { %853 = vmatmul.mubr.bf16.gmra.mrb[36].mxu0 %v1623_v62  ;;  %1495 = vmatmul.mubr.bf16.gmra.mrb[36].mxu1 %v1624_v63 }
  0x70   : > { %860 = vmatprep.mubr.bf16.mxu0 %v1625_v0  ;;  %1498 = vmatprep.mubr.bf16.mxu1 %v1627_v1 }
  0x77   : > { %861 = vmatmul.mubr.bf16.gmra.mrb[40].mxu0 %v1628_v2  ;;  %1499 = vmatmul.mubr.bf16.gmra.mrb[40].mxu1 %v1629_v3 }
  0x78   : > { %868 = vmatprep.mubr.bf16.mxu0 %v1630_v4  ;;  %1502 = vmatprep.mubr.bf16.mxu1 %v1632_v5 }
  0x7f   : > { %869 = vmatmul.mubr.bf16.gmra.mrb[44].mxu0 %v1633_v6  ;;  %1503 = vmatmul.mubr.bf16.gmra.mrb[44].mxu1 %v1634_v7 }
  0xfa   : > { %v1338_v8 = vpop.f32.mrb[0].mxu0  ;;  %v1410_v9 = vpop.f32.mrb[0].mxu1 }
  0xfb   : > { %v1339_v10 = vpop.f32.mrb[1].mxu0  ;;  %v1411_v11 = vpop.f32.mrb[1].mxu1 }
  0xfc   : > { %v1340_v12 = vadd.f32 %v1339_v10, %v1338_v8  ;;  %v1341_v13 = vpop.f32.mrb[2].mxu0  ;;  %v1825_v14 = vadd.f32 %v1411_v11, %v1410_v9  ;;  %v1413_v15 = vpop.f32.mrb[2].mxu1 }
  0xfd   : > { %v1342_v16 = vpop.f32.mrb[3].mxu0  ;;  %v1414_v17 = vpop.f32.mrb[3].mxu1 }
  0xfe   : > { %v1343_v18 = vadd.f32 %v1342_v16, %v1341_v13  ;;  %v1827_v19 = vadd.f32 %v1414_v17, %v1413_v15  ;;  %v783_v60 = vadd.f32 %v1340_v12, %v1844_v56 }
 0x100   : > { %v786_v5 = vadd.f32 %v1343_v18, %v1844_v56 }
 0x102   : > { %v1344_v20 = vpop.f32.mrb[4].mxu0  ;;  %v1416_v21 = vpop.f32.mrb[4].mxu1 }
 0x103   : > { %v1345_v22 = vpop.f32.mrb[5].mxu0  ;;  %v1417_v23 = vpop.f32.mrb[5].mxu1 }
 0x104   : > { %v1346_v24 = vadd.f32 %v1345_v22, %v1344_v20  ;;  %v1347_v25 = vpop.f32.mrb[6].mxu0  ;;  %v1829_v26 = vadd.f32 %v1417_v23, %v1416_v21  ;;  %v1419_v27 = vpop.f32.mrb[6].mxu1 }
 0x105   : > { %v1348_v28 = vpop.f32.mrb[7].mxu0  ;;  %v1420_v29 = vpop.f32.mrb[7].mxu1 }
 0x106   : > { %v1349_v30 = vadd.f32 %v1348_v28, %v1347_v25  ;;  %v1831_v31 = vadd.f32 %v1420_v29, %v1419_v27  ;;  %v791_v57 = vadd.f32 %v1346_v24, %v1844_v56 }
 0x108   : > { %v794_v0 = vadd.f32 %v1349_v30, %v1844_v56 }
 0x10a   : > { %v1350_v32 = vpop.f32.mrb[8].mxu0  ;;  %v1422_v33 = vpop.f32.mrb[8].mxu1 }
 0x10b   : > { %v1351_v34 = vpop.f32.mrb[9].mxu0  ;;  %v1423_v35 = vpop.f32.mrb[9].mxu1 }
 0x10c   : > { %v1352_v36 = vadd.f32 %v1351_v34, %v1350_v32  ;;  %v1353_v37 = vpop.f32.mrb[10].mxu0  ;;  %v1833_v38 = vadd.f32 %v1423_v35, %v1422_v33  ;;  %v1425_v39 = vpop.f32.mrb[10].mxu1 }
 0x10d   : > { %v1354_v40 = vpop.f32.mrb[11].mxu0  ;;  %v1426_v41 = vpop.f32.mrb[11].mxu1 }
 0x10e   : > { %v1355_v42 = vadd.f32 %v1354_v40, %v1353_v37  ;;  %v1835_v43 = vadd.f32 %v1426_v41, %v1425_v39  ;;  %v799_v21 = vadd.f32 %v1352_v36, %v1844_v56 }
 0x110   : > { %v802_v30 = vadd.f32 %v1355_v42, %v1844_v56 }
 0x112   : > { %v1356_v44 = vpop.f32.mrb[12].mxu0  ;;  %v1428_v45 = vpop.f32.mrb[12].mxu1 }
 0x113   : > { %v1357_v46 = vpop.f32.mrb[13].mxu0  ;;  %v1429_v47 = vpop.f32.mrb[13].mxu1 }
 0x114   : > { %v1358_v48 = vadd.f32 %v1357_v46, %v1356_v44  ;;  %v1359_v49 = vpop.f32.mrb[14].mxu0  ;;  %v1837_v50 = vadd.f32 %v1429_v47, %v1428_v45  ;;  %v1431_v51 = vpop.f32.mrb[14].mxu1 }
 0x115   : > { %v1360_v52 = vpop.f32.mrb[15].mxu0  ;;  %v1432_v53 = vpop.f32.mrb[15].mxu1 }
 0x116   : > { %v1361_v54 = vadd.f32 %v1360_v52, %v1359_v49  ;;  %v1839_v55 = vadd.f32 %v1432_v53, %v1431_v51  ;;  %v807_v16 = vadd.f32 %v1358_v48, %v1844_v56 }
 0x118   : > { %v810_v24 = vadd.f32 %v1361_v54, %v1844_v56 }
 0x11a   : > { %v1362_v58 = vpop.f32.mrb[16].mxu0  ;;  %v1476_v59 = vpop.f32.mrb[16].mxu1 }
 0x11b   : > { %v952_v61 = vadd.f32 %v1476_v59, %v791_v57  ;;  %v1363_v62 = vpop.f32.mrb[17].mxu0  ;;  %v943_v63 = vpop.f32.mrb[17].mxu1 }
 0x11c   : > { %v1364_v1 = vadd.f32 %v1363_v62, %v1362_v58  ;;  %v944_v2 = vadd.f32 %v943_v63, %v783_v60  ;;  %v1365_v3 = vpop.f32.mrb[18].mxu0  ;;  %v1477_v4 = vpop.f32.mrb[18].mxu1 }
 0x11d   : > { %v1072_v6 = vmax.f32 %v952_v61, 0.0  ;;  %v955_v7 = vadd.f32 %v1477_v4, %v794_v0  ;;  %v1366_v8 = vpop.f32.mrb[19].mxu0  ;;  %v946_v9 = vpop.f32.mrb[19].mxu1 }
 0x11e   : > { %v1070_v10 = vmax.f32 %v944_v2, 0.0  ;;  %v1367_v11 = vadd.f32 %v1366_v8, %v1365_v3  ;;  %v947_v12 = vadd.f32 %v946_v9, %v786_v5  ;;  %v815_v47 = vadd.f32 %v1364_v1, %v1844_v56 }
 0x11f   : > { %1104 = vst [vmem:[%s1853_s28 + $0x10] sm:$0xff] %v1072_v6  ;;  %v1073_v13 = vmax.f32 %v955_v7, 0.0 }
 0x120   : > { %1102 = vst [vmem:[%s1853_s28] sm:$0xff] %v1070_v10  ;;  %v1071_v15 = vmax.f32 %v947_v12, 0.0  ;;  %v818_v58 = vadd.f32 %v1367_v11, %v1844_v56 }
 0x121   : > { %1105 = vst [vmem:[%s1853_s28 + $0x18] sm:$0xff] %v1073_v13 }
 0x122   : > { %1103 = vst [vmem:[%s1853_s28 + $0x8] sm:$0xff] %v1071_v15  ;;  %v1368_v17 = vpop.f32.mrb[20].mxu0  ;;  %v1480_v20 = vpop.f32.mrb[20].mxu1 }
 0x123   : > { %v968_v18 = vadd.f32 %v1480_v20, %v807_v16  ;;  %v1369_v22 = vpop.f32.mrb[21].mxu0  ;;  %v959_v23 = vpop.f32.mrb[21].mxu1 }
 0x124   : > { %v1370_v25 = vadd.f32 %v1369_v22, %v1368_v17  ;;  %v960_v27 = vadd.f32 %v959_v23, %v799_v21  ;;  %v1371_v28 = vpop.f32.mrb[22].mxu0  ;;  %v1481_v29 = vpop.f32.mrb[22].mxu1 }
 0x125   : > { %v1076_v32 = vmax.f32 %v968_v18, 0.0  ;;  %v971_v33 = vadd.f32 %v1481_v29, %v810_v24  ;;  %v1372_v34 = vpop.f32.mrb[23].mxu0  ;;  %v962_v35 = vpop.f32.mrb[23].mxu1 }
 0x126   : > { %v1074_v36 = vmax.f32 %v960_v27, 0.0  ;;  %v1373_v37 = vadd.f32 %v1372_v34, %v1371_v28  ;;  %v963_v39 = vadd.f32 %v962_v35, %v802_v30  ;;  %v823_v44 = vadd.f32 %v1370_v25, %v1844_v56 }
 0x127   : > { %1108 = vst [vmem:[%s1853_s28 + $0x30] sm:$0xff] %v1076_v32  ;;  %v1077_v40 = vmax.f32 %v971_v33, 0.0 }
 0x128   : > { %1106 = vst [vmem:[%s1853_s28 + $0x20] sm:$0xff] %v1074_v36  ;;  %v1075_v41 = vmax.f32 %v963_v39, 0.0  ;;  %v826_v51 = vadd.f32 %v1373_v37, %v1844_v56 }
 0x129   : > { %1109 = vst [vmem:[%s1853_s28 + $0x38] sm:$0xff] %v1077_v40 }
 0x12a   : > { %1107 = vst [vmem:[%s1853_s28 + $0x28] sm:$0xff] %v1075_v41  ;;  %v1374_v45 = vpop.f32.mrb[24].mxu0  ;;  %v1484_v46 = vpop.f32.mrb[24].mxu1 }
 0x12b   : > { %v984_v42 = vadd.f32 %v1484_v46, %v823_v44  ;;  %v1375_v48 = vpop.f32.mrb[25].mxu0  ;;  %v975_v49 = vpop.f32.mrb[25].mxu1 }
 0x12c   : > { %v1376_v52 = vadd.f32 %v1375_v48, %v1374_v45  ;;  %v976_v53 = vadd.f32 %v975_v49, %v815_v47  ;;  %v1377_v54 = vpop.f32.mrb[26].mxu0  ;;  %v1485_v57 = vpop.f32.mrb[26].mxu1 }
 0x12d   : > { %v1080_v59 = vmax.f32 %v984_v42, 0.0  ;;  %v987_v60 = vadd.f32 %v1485_v57, %v826_v51  ;;  %v1378_v61 = vpop.f32.mrb[27].mxu0  ;;  %v978_v62 = vpop.f32.mrb[27].mxu1 }
 0x12e   : > { %v1078_v63 = vmax.f32 %v976_v53, 0.0  ;;  %v1379_v0 = vadd.f32 %v1378_v61, %v1377_v54  ;;  %v979_v1 = vadd.f32 %v978_v62, %v818_v58  ;;  %v831_v6 = vadd.f32 %v1376_v52, %v1844_v56 }
 0x12f   : > { %1112 = vst [vmem:[%s1853_s28 + $0x50] sm:$0xff] %v1080_v59  ;;  %v1081_v2 = vmax.f32 %v987_v60, 0.0 }
 0x130   : > { %1110 = vst [vmem:[%s1853_s28 + $0x40] sm:$0xff] %v1078_v63  ;;  %v1079_v3 = vmax.f32 %v979_v1, 0.0  ;;  %v834_v13 = vadd.f32 %v1379_v0, %v1844_v56  ;;  %v887_v0 = vadd.f32 %v1829_v26, %v1844_v56 }
 0x131   : > { %1113 = vst [vmem:[%s1853_s28 + $0x58] sm:$0xff] %v1081_v2 }
 0x132   : > { %1111 = vst [vmem:[%s1853_s28 + $0x48] sm:$0xff] %v1079_v3  ;;  %v1380_v4 = vpop.f32.mrb[28].mxu0  ;;  %v1488_v5 = vpop.f32.mrb[28].mxu1 }
 0x133   : > { %v1381_v7 = vpop.f32.mrb[29].mxu0  ;;  %v991_v8 = vpop.f32.mrb[29].mxu1 }
 0x134   : > { %v1382_v9 = vadd.f32 %v1381_v7, %v1380_v4  ;;  %v992_v10 = vadd.f32 %v991_v8, %v831_v6  ;;  %v1383_v11 = vpop.f32.mrb[30].mxu0  ;;  %v1489_v12 = vpop.f32.mrb[30].mxu1 }
 0x135   : > { %v1384_v15 = vpop.f32.mrb[31].mxu0  ;;  %v994_v16 = vpop.f32.mrb[31].mxu1 }
 0x136   : > { %v839_v17 = vadd.f32 %v1382_v9, %v1844_v56  ;;  %v1082_v20 = vmax.f32 %v992_v10, 0.0  ;;  %v1385_v21 = vadd.f32 %v1384_v15, %v1383_v11  ;;  %v995_v18 = vadd.f32 %v994_v16, %v834_v13 }
 0x137   : > { %v890_v9 = vadd.f32 %v1831_v31, %v1844_v56  ;;  %v882_v15 = vadd.f32 %v1827_v19, %v1844_v56 }
 0x138   : > { %v1000_v22 = vadd.f32 %v1488_v5, %v839_v17  ;;  %1114 = vst [vmem:[%s1853_s28 + $0x60] sm:$0xff] %v1082_v20  ;;  %v842_v23 = vadd.f32 %v1385_v21, %v1844_v56  ;;  %v1083_v24 = vmax.f32 %v995_v18, 0.0  ;;  %v879_v5 = vadd.f32 %v1825_v14, %v1844_v56 }
 0x13a   : > { %v1084_v25 = vmax.f32 %v1000_v22, 0.0  ;;  %v1003_v27 = vadd.f32 %v1489_v12, %v842_v23  ;;  %1115 = vst [vmem:[%s1853_s28 + $0x68] sm:$0xff] %v1083_v24  ;;  %v1386_v28 = vpop.f32.mrb[32].mxu0  ;;  %v1492_v29 = vpop.f32.mrb[32].mxu1 }
 0x13b   : > { %v1387_v30 = vpop.f32.mrb[33].mxu0  ;;  %v1007_v32 = vpop.f32.mrb[33].mxu1 }
 0x13c   : > { %1116 = vst [vmem:[%s1853_s28 + $0x70] sm:$0xff] %v1084_v25  ;;  %v1085_v33 = vmax.f32 %v1003_v27, 0.0  ;;  %v1388_v34 = vadd.f32 %v1387_v30, %v1386_v28  ;;  %v1389_v35 = vpop.f32.mrb[34].mxu0  ;;  %v1493_v36 = vpop.f32.mrb[34].mxu1  ;;  %v903_v27 = vadd.f32 %v1837_v50, %v1844_v56 }
 0x13d   : > { %v1390_v37 = vpop.f32.mrb[35].mxu0  ;;  %v1010_v39 = vpop.f32.mrb[35].mxu1 }
 0x13e   : > { %1117 = vst [vmem:[%s1853_s28 + $0x78] sm:$0xff] %v1085_v33  ;;  %v847_v40 = vadd.f32 %v1388_v34, %v1844_v56  ;;  %v1391_v41 = vadd.f32 %v1390_v37, %v1389_v35  ;;  %v895_v33 = vadd.f32 %v1833_v38, %v1844_v56  ;;  %v906_v37 = vadd.f32 %v1839_v55, %v1844_v56 }
 0x140   : > { %v1008_v44 = vadd.f32 %v1007_v32, %v847_v40  ;;  %v850_v45 = vadd.f32 %v1391_v41, %v1844_v56 }
 0x142   : > { %v1086_v46 = vmax.f32 %v1008_v44, 0.0  ;;  %v1011_v47 = vadd.f32 %v1010_v39, %v850_v45  ;;  %v1392_v42 = vpop.f32.mrb[36].mxu0  ;;  %v1886_v48 = vpop.f32.mrb[36].mxu1  ;;  %v898_v45 = vadd.f32 %v1835_v43, %v1844_v56 }
 0x143   : > { %v1393_v49 = vpop.f32.mrb[37].mxu0  ;;  %v1023_v51 = vpop.f32.mrb[37].mxu1 }
 0x144   : > { %1118 = vst [vmem:[%s1853_s28 + $0x80] sm:$0xff] %v1086_v46  ;;  %v1087_v52 = vmax.f32 %v1011_v47, 0.0  ;;  %v1394_v53 = vadd.f32 %v1393_v49, %v1392_v42  ;;  %v1395_v54 = vpop.f32.mrb[38].mxu0  ;;  %v1889_v57 = vpop.f32.mrb[38].mxu1 }
 0x145   : > { %v1396_v58 = vpop.f32.mrb[39].mxu0  ;;  %v1026_v59 = vpop.f32.mrb[39].mxu1 }
 0x146   : > { %1119 = vst [vmem:[%s1853_s28 + $0x88] sm:$0xff] %v1087_v52  ;;  %v855_v60 = vadd.f32 %v1394_v53, %v1844_v56  ;;  %v1397_v61 = vadd.f32 %v1396_v58, %v1395_v54 }
 0x148   : > { %v1016_v62 = vadd.f32 %v1492_v29, %v855_v60  ;;  %v858_v63 = vadd.f32 %v1397_v61, %v1844_v56 }
 0x14a   : > { %v1088_v1 = vmax.f32 %v1016_v62, 0.0  ;;  %v1019_v2 = vadd.f32 %v1493_v36, %v858_v63  ;;  %v1398_v3 = vpop.f32.mrb[40].mxu0  ;;  %v1500_v4 = vpop.f32.mrb[40].mxu1 }
 0x14b   : > { %v1048_v6 = vadd.f32 %v1500_v4, %v887_v0  ;;  %v1399_v7 = vpop.f32.mrb[41].mxu0  ;;  %v1039_v8 = vpop.f32.mrb[41].mxu1 }
 0x14c   : > { %1120 = vst [vmem:[%s1853_s28 + $0x90] sm:$0xff] %v1088_v1  ;;  %v1089_v10 = vmax.f32 %v1019_v2, 0.0  ;;  %v1400_v11 = vadd.f32 %v1399_v7, %v1398_v3  ;;  %v1040_v12 = vadd.f32 %v1039_v8, %v879_v5  ;;  %v1401_v26 = vpop.f32.mrb[42].mxu0  ;;  %v1501_v13 = vpop.f32.mrb[42].mxu1 }
 0x14d   : > { %v1096_v14 = vmax.f32 %v1048_v6, 0.0  ;;  %v1051_v16 = vadd.f32 %v1501_v13, %v890_v9  ;;  %v1402_v17 = vpop.f32.mrb[43].mxu0  ;;  %v1042_v20 = vpop.f32.mrb[43].mxu1 }
 0x14e   : > { %1121 = vst [vmem:[%s1853_s28 + $0x98] sm:$0xff] %v1089_v10  ;;  %v863_v31 = vadd.f32 %v1400_v11, %v1844_v56  ;;  %v1094_v21 = vmax.f32 %v1040_v12, 0.0  ;;  %v1403_v18 = vadd.f32 %v1402_v17, %v1401_v26  ;;  %v1043_v22 = vadd.f32 %v1042_v20, %v882_v15 }
 0x14f   : > { %1128 = vst [vmem:[%s1853_s28 + $0xd0] sm:$0xff] %v1096_v14  ;;  %v1097_v23 = vmax.f32 %v1051_v16, 0.0 }
 0x150   : > { %v1024_v24 = vadd.f32 %v1023_v51, %v863_v31  ;;  %1126 = vst [vmem:[%s1853_s28 + $0xc0] sm:$0xff] %v1094_v21  ;;  %v866_v25 = vadd.f32 %v1403_v18, %v1844_v56  ;;  %v1095_v19 = vmax.f32 %v1043_v22, 0.0 }
 0x151   : > { %1129 = vst [vmem:[%s1853_s28 + $0xd8] sm:$0xff] %v1097_v23 }
 0x152   : > { %v1090_v28 = vmax.f32 %v1024_v24, 0.0  ;;  %v1027_v29 = vadd.f32 %v1026_v59, %v866_v25  ;;  %1127 = vst [vmem:[%s1853_s28 + $0xc8] sm:$0xff] %v1095_v19  ;;  %v1404_v30 = vpop.f32.mrb[44].mxu0  ;;  %v1504_v32 = vpop.f32.mrb[44].mxu1 }
 0x153   : > { %v1064_v34 = vadd.f32 %v1504_v32, %v903_v27  ;;  %v1405_v35 = vpop.f32.mrb[45].mxu0  ;;  %v1055_v36 = vpop.f32.mrb[45].mxu1 }
 0x154   : > { %1122 = vst [vmem:[%s1853_s28 + $0xa0] sm:$0xff] %v1090_v28  ;;  %v1091_v39 = vmax.f32 %v1027_v29, 0.0  ;;  %v1406_v40 = vadd.f32 %v1405_v35, %v1404_v30  ;;  %v1056_v50 = vadd.f32 %v1055_v36, %v895_v33  ;;  %v1407_v41 = vpop.f32.mrb[46].mxu0  ;;  %v1505_v44 = vpop.f32.mrb[46].mxu1 }
 0x155   : > { %v1100_v38 = vmax.f32 %v1064_v34, 0.0  ;;  %v1067_v46 = vadd.f32 %v1505_v44, %v906_v37  ;;  %v1408_v47 = vpop.f32.mrb[47].mxu0  ;;  %v1058_v42 = vpop.f32.mrb[47].mxu1 }
 0x156   : > { %1123 = vst [vmem:[%s1853_s28 + $0xa8] sm:$0xff] %v1091_v39  ;;  %v871_v55 = vadd.f32 %v1406_v40, %v1844_v56  ;;  %v1098_v49 = vmax.f32 %v1056_v50, 0.0  ;;  %v1409_v51 = vadd.f32 %v1408_v47, %v1407_v41  ;;  %v1059_v52 = vadd.f32 %v1058_v42, %v898_v45 }
 0x157   : > { %1132 = vst [vmem:[%s1853_s28 + $0xf0] sm:$0xff] %v1100_v38  ;;  %v1101_v53 = vmax.f32 %v1067_v46, 0.0 }
 0x158   : > { %v1032_v54 = vadd.f32 %v1886_v48, %v871_v55  ;;  %1130 = vst [vmem:[%s1853_s28 + $0xe0] sm:$0xff] %v1098_v49  ;;  %v874_v43 = vadd.f32 %v1409_v51, %v1844_v56  ;;  %v1099_v58 = vmax.f32 %v1059_v52, 0.0 }
 0x159   : > { %1133 = vst [vmem:[%s1853_s28 + $0xf8] sm:$0xff] %v1101_v53 }
 0x15a   : > { %v1092_v59 = vmax.f32 %v1032_v54, 0.0  ;;  %v1035_v60 = vadd.f32 %v1889_v57, %v874_v43  ;;  %1131 = vst [vmem:[%s1853_s28 + $0xe8] sm:$0xff] %v1099_v58 }
 0x15c   : > { %1124 = vst [vmem:[%s1853_s28 + $0xb0] sm:$0xff] %v1092_v59  ;;  %v1093_v61 = vmax.f32 %v1035_v60, 0.0 }
 0x15e   : > { %1125 = vst [vmem:[%s1853_s28 + $0xb8] sm:$0xff] %v1093_v61 }
 0x15f PF: > { %s13_s14 = sadd.s32 1, %s1657_s14   ;;  %s1943_s12 = smov %s1653_s13 }
 0x160   : > { %p10_p5 = scmp.ge.s32.totalorder %s13_s14, 4   ;;  %s1944_s13 = smov %s1946_s15 }
 0x162   :  { %12 = sbr.rel (!%p10_p5) target bundleno = 2 (0x2), region = 68 }

// kernel: _forward.8
= control target key start
LH: loop header
LB: loop body
LE: loop exit
PB: predicated region body
PF: predicated region fallthrough
CT: control target
= control target key end

     0   :  { %s2384_s12 = smov 0   ;;  %s2386_s13 = smov 0   ;;  %s2805_s0 = inlined_call_operand.vmem [shape: bf16[512,640], index: 0, kind: input, shape index: {}]   ;;  %s2806_s1 = inlined_call_operand.vmem [shape: bf16[640,128], index: 1, kind: input, shape index: {}]   ;;  %s2807_s2 = inlined_call_operand.vmem [shape: f32[1,128], index: 2, kind: input, shape index: {}]   ;;  %s2808_s3 = inlined_call_operand.vmem [shape: f32[512,128], index: 3, kind: output, shape index: {}]  }
   0x1   :  { %s2388_s14 = smov 0  }
   0x2 LB: > { %s25_s15 = sadd.s32 1, %s2358_s13  ;;  %p1723_p0 = scmp.ge.s32.totalorder %s2362_s14, 1  ;;  %s2362_s14 = sphi %s2388_s14, %s13_s14   ;;  %s2358_s13 = sphi %s2386_s13, %s2810_s13   ;;  %s2354_s12 = sphi %s2384_s12, %s2809_s12  }
   0x3   : > { %p27_p1 = scmp.ge.s32.totalorder %s25_s15, 2  ;;  %p170_p2 = scmp.lt.s32.totalorder %s2362_s14, 3 }
   0x5   : > { %s2812_s15 = smov (%p27_p1, %s25_s15), 0  ;;  %p171_p3 = pnand %p1723_p0, %p170_p2 }
   0x6   : > { %v2188_v0 = vld [vmem:[%s2806_s1 + $0x40] sm:$0xff] (!%p171_p3)   ;;  %s1724_s18 = sshll.u32 (!%p171_p3), %s2354_s12, 5  ;;  %v2190_v2 = vld [vmem:[%s2806_s1 + $0x48] sm:$0xff] (!%p171_p3)   ;;  %v2192_v4 = vld [vmem:[%s2806_s1 + $0x50] sm:$0xff] (!%p171_p3)  }
   0x7   : > { %174 = sbr.rel (%p171_p3) target bundleno = 415 (0x19f), region = 32  ;;  %v2189_v1 = vld [vmem:[%s2806_s1] sm:$0xff] (!%p171_p3)   ;;  %1851 = vmatprep.subr.bf16.mxu0 (!%p171_p3), %v2188_v0  ;;  %2147 = vmatprep.subr.bf16.mxu1 (!%p171_p3), %v2188_v0  ;;  %p206_p4 = scmp.lt.s32.totalorder (!%p171_p3), %s1724_s18, 63  ;;  %v2191_v3 = vld [vmem:[%s2806_s1 + $0x8] sm:$0xff] (!%p171_p3)   ;;  %v2193_v5 = vld [vmem:[%s2806_s1 + $0x10] sm:$0xff] (!%p171_p3)  }
   0x8   : > { %1852 = vmatpush3.bf16.msra.mxu0 (!%p171_p3), %v2189_v1  ;;  %2155 = vmatpush3.bf16.msra.mxu1 (!%p171_p3), %v2189_v1  ;;  %v2194_v6 = vld [vmem:[%s2806_s1 + $0x58] sm:$0xff] (!%p171_p3)   ;;  %v2196_v8 = vld [vmem:[%s2806_s1 + $0x60] sm:$0xff] (!%p171_p3)   ;;  %v2198_v10 = vld [vmem:[%s2806_s1 + $0x68] sm:$0xff] (!%p171_p3)  }
   0x9   : > { %1853 = vmatprep.subr.bf16.mxu0 (!%p171_p3), %v2190_v2  ;;  %2148 = vmatprep.subr.bf16.mxu1 (!%p171_p3), %v2190_v2  ;;  %v2195_v7 = vld [vmem:[%s2806_s1 + $0x18] sm:$0xff] (!%p171_p3)   ;;  %v2197_v9 = vld [vmem:[%s2806_s1 + $0x20] sm:$0xff] (!%p171_p3)   ;;  %v2199_v13 = vld [vmem:[%s2806_s1 + $0x28] sm:$0xff] (!%p171_p3)  }
   0xa   : > { %v2200_v14 = vld [vmem:[%s2806_s1 + $0x70] sm:$0xff] (!%p171_p3)   ;;  %v2202_v16 = vld [vmem:[%s2806_s1 + $0x78] sm:$0xff] (!%p171_p3)   ;;  %v2210_v18 = vld [vmem:[%s2806_s1 + $0xc0] sm:$0xff] (!%p171_p3)  }
   0xb   : > { %v2201_v15 = vld [vmem:[%s2806_s1 + $0x30] sm:$0xff] (!%p171_p3)   ;;  %v2203_v17 = vld [vmem:[%s2806_s1 + $0x38] sm:$0xff] (!%p171_p3)   ;;  %v2213_v19 = vld [vmem:[%s2806_s1 + $0x100] sm:$0xff] (!%p171_p3)  }
   0xc   : > { %1854 = vmatpush3.bf16.msra.mxu0 (!%p171_p3), %v2191_v3  ;;  %2156 = vmatpush3.bf16.msra.mxu1 (!%p171_p3), %v2191_v3  ;;  %v2211_v22 = vld [vmem:[%s2806_s1 + $0x80] sm:$0xff] (!%p171_p3)   ;;  %v2212_v23 = vld [vmem:[%s2806_s1 + $0xc8] sm:$0xff] (!%p171_p3)   ;;  %v2221_v29 = vld [vmem:[%s2806_s1 + $0xd0] sm:$0xff] (!%p171_p3)  }
   0xd   : > { %1855 = vmatprep.subr.bf16.mxu0 (!%p171_p3), %v2192_v4  ;;  %2149 = vmatprep.subr.bf16.mxu1 (!%p171_p3), %v2192_v4  ;;  %v2232_v26 = vld [vmem:[%s2806_s1 + $0x108] sm:$0xff] (!%p171_p3)   ;;  %v2222_v31 = vld [vmem:[%s2806_s1 + $0x90] sm:$0xff] (!%p171_p3)   ;;  %v2223_v33 = vld [vmem:[%s2806_s1 + $0xd8] sm:$0xff] (!%p171_p3)  }
   0xe   : > { %s2814_s18 = smov (!%p206_p4, %s1724_s18), 63  ;;  %v2214_v27 = vld [vmem:[%s2806_s1 + $0x88] sm:$0xff]   ;;  %v2224_v35 = vld [vmem:[%s2806_s1 + $0x98] sm:$0xff]   ;;  %v2231_v36 = vld [vmem:[%s2806_s1 + $0xe0] sm:$0xff]  }
   0xf   : > { %s2163_s4 = smul.u32 20, %s2814_s18  ;;  %v2245_v38 = vld [vmem:[%s2806_s1 + $0x110] sm:$0xff]   ;;  %v2233_v40 = vld [vmem:[%s2806_s1 + $0xa0] sm:$0xff]   ;;  %v2234_v41 = vld [vmem:[%s2806_s1 + $0xe8] sm:$0xff]   ;;  %s1727_s8 = sshll.u32 %s2814_s18, 3 }
  0x10   : > { %1856 = vmatpush3.bf16.msra.mxu0 %v2193_v5  ;;  %2157 = vmatpush3.bf16.msra.mxu1 %v2193_v5  ;;  %v2235_v44 = vld [vmem:[%s2806_s1 + $0xa8] sm:$0xff]   ;;  %v2259_v45 = vld [vmem:[%s2806_s1 + $0x118] sm:$0xff]   ;;  %v2242_v48 = vld [vmem:[%s2806_s1 + $0xf0] sm:$0xff]   ;;  %s2702_s12 = scalar_lea.vmem %s2808_s3, %s1727_s8 }
  0x11   : > { %1857 = vmatprep.subr.bf16.mxu0 %v2194_v6  ;;  %2150 = vmatprep.subr.bf16.mxu1 %v2194_v6  ;;  %s2435_s11 = scalar_lea.vmem %s2805_s0, %s2163_s4  ;;  %v2243_v49 = vld [vmem:[%s2806_s1 + $0xb0] sm:$0xff]   ;;  %v2244_v50 = vld [vmem:[%s2806_s1 + $0xf8] sm:$0xff]   ;;  %v2266_v52 = vld [vmem:[%s2806_s1 + $0x120] sm:$0xff]  }
  0x12   : > { %v2206_v11 = vld [vmem:[%s2435_s11 + $0x4] ss:$20 sps:$4 sm:$0xff]   ;;  %v2204_v20 = vld [vmem:[%s2435_s11] ss:$20 sps:$4 sm:$0xff]   ;;  %v2219_v28 = vld [vmem:[%s2435_s11 + $0x28] ss:$20 sps:$4 sm:$0xff]  }
  0x13   : > { %v2209_v12 = vld [vmem:[%s2435_s11 + $0x1e4] ss:$20 sps:$4 sm:$0xff]   ;;  %1100 = vmatprep.mubr.bf16.mxu0 %v2206_v11  ;;  %v2207_v21 = vld [vmem:[%s2435_s11 + $0x1e0] ss:$20 sps:$4 sm:$0xff]   ;;  %v2220_v30 = vld [vmem:[%s2435_s11 + $0x208] ss:$20 sps:$4 sm:$0xff]  }
  0x14   : > { %1858 = vmatpush3.bf16.msra.mxu0 %v2195_v7  ;;  %2158 = vmatpush3.bf16.msra.mxu1 %v2195_v7  ;;  %v2215_v24 = vld [vmem:[%s2435_s11 + $0x2c] ss:$20 sps:$4 sm:$0xff]   ;;  %v2225_v32 = vld [vmem:[%s2435_s11 + $0x54] ss:$20 sps:$4 sm:$0xff]   ;;  %v2229_v37 = vld [vmem:[%s2435_s11 + $0x50] ss:$20 sps:$4 sm:$0xff]  }
  0x15   : > { %1859 = vmatprep.subr.bf16.mxu0 %v2196_v8  ;;  %2151 = vmatprep.subr.bf16.mxu1 %v2196_v8  ;;  %v2217_v25 = vld [vmem:[%s2435_s11 + $0x20c] ss:$20 sps:$4 sm:$0xff]   ;;  %v2227_v34 = vld [vmem:[%s2435_s11 + $0x234] ss:$20 sps:$4 sm:$0xff]   ;;  %v2230_v39 = vld [vmem:[%s2435_s11 + $0x230] ss:$20 sps:$4 sm:$0xff]  }
  0x16   : > { %1196 = vmatprep.mubr.bf16.mxu1 %v2209_v12  ;;  %v2236_v42 = vld [vmem:[%s2435_s11 + $0x7c] ss:$20 sps:$4 sm:$0xff]   ;;  %v2240_v46 = vld [vmem:[%s2435_s11 + $0x78] ss:$20 sps:$4 sm:$0xff]   ;;  %v2252_v56 = vld [vmem:[%s2435_s11 + $0xa0] ss:$20 sps:$4 sm:$0xff]  }
  0x17   : > { %v2238_v43 = vld [vmem:[%s2435_s11 + $0x25c] ss:$20 sps:$4 sm:$0xff]   ;;  %v2241_v47 = vld [vmem:[%s2435_s11 + $0x258] ss:$20 sps:$4 sm:$0xff]   ;;  %v2255_v59 = vld [vmem:[%s2435_s11 + $0x34] ss:$20 sps:$4 sm:$0xff]  }
  0x18   : > { %1860 = vmatpush3.bf16.msra.mxu0 %v2197_v9  ;;  %2159 = vmatpush3.bf16.msra.mxu1 %v2197_v9  ;;  %v2247_v51 = vld [vmem:[%s2435_s11 + $0xa4] ss:$20 sps:$4 sm:$0xff]   ;;  %v2251_v53 = vld [vmem:[%s2435_s11 + $0xc] ss:$20 sps:$4 sm:$0xff]   ;;  %v2249_v55 = vld [vmem:[%s2435_s11 + $0x8] ss:$20 sps:$4 sm:$0xff]  }
  0x19   : > { %1861 = vmatprep.subr.bf16.mxu0 %v2198_v10  ;;  %2152 = vmatprep.subr.bf16.mxu1 %v2198_v10  ;;  %v2246_v54 = vld [vmem:[%s2806_s1 + $0xb8] sm:$0xff]   ;;  %v2279_v57 = vld [vmem:[%s2806_s1 + $0x128] sm:$0xff]   ;;  %v2286_v60 = vld [vmem:[%s2806_s1 + $0x130] sm:$0xff]  }
  0x1a   : > { %v2253_v58 = vld [vmem:[%s2435_s11 + $0xcc] ss:$20 sps:$4 sm:$0xff]   ;;  %v2257_v61 = vld [vmem:[%s2435_s11 + $0xc8] ss:$20 sps:$4 sm:$0xff]   ;;  %v2258_v62 = vld [vmem:[%s2435_s11 + $0x30] ss:$20 sps:$4 sm:$0xff]  }
  0x1b   : > { %v2260_v63 = vld [vmem:[%s2435_s11 + $0xf4] ss:$20 sps:$4 sm:$0xff]   ;;  %v2262_v0 = vld [vmem:[%s2435_s11 + $0x5c] ss:$20 sps:$4 sm:$0xff]   ;;  %v2265_v3 = vld [vmem:[%s2435_s11 + $0x58] ss:$20 sps:$4 sm:$0xff]  }
  0x1c   : > { %1862 = vmatpush3.bf16.msra.mxu0 %v2199_v13  ;;  %2160 = vmatpush3.bf16.msra.mxu1 %v2199_v13  ;;  %v2299_v1 = vld [vmem:[%s2806_s1 + $0x138] sm:$0xff]   ;;  %v2264_v2 = vld [vmem:[%s2435_s11 + $0xf0] ss:$20 sps:$4 sm:$0xff]   ;;  %v2272_v7 = vld [vmem:[%s2435_s11 + $0x80] ss:$20 sps:$4 sm:$0xff]  }
  0x1d   : > { %1863 = vmatprep.subr.bf16.mxu0 %v2200_v14  ;;  %2153 = vmatprep.subr.bf16.mxu1 %v2200_v14  ;;  %v2267_v4 = vld [vmem:[%s2435_s11 + $0x11c] ss:$20 sps:$4 sm:$0xff]   ;;  %v2269_v5 = vld [vmem:[%s2435_s11 + $0x84] ss:$20 sps:$4 sm:$0xff]   ;;  %v2275_v9 = vld [vmem:[%s2435_s11 + $0xac] ss:$20 sps:$4 sm:$0xff]  }
  0x1e   : > { %v2271_v6 = vld [vmem:[%s2435_s11 + $0x118] ss:$20 sps:$4 sm:$0xff]   ;;  %v2277_v10 = vld [vmem:[%s2435_s11 + $0x140] ss:$20 sps:$4 sm:$0xff]   ;;  %v2278_v11 = vld [vmem:[%s2435_s11 + $0xa8] ss:$20 sps:$4 sm:$0xff]  }
  0x1f   : > { %v2273_v8 = vld [vmem:[%s2435_s11 + $0x144] ss:$20 sps:$4 sm:$0xff]   ;;  %v2280_v12 = vld [vmem:[%s2435_s11 + $0x16c] ss:$20 sps:$4 sm:$0xff]   ;;  %v2282_v13 = vld [vmem:[%s2435_s11 + $0xd4] ss:$20 sps:$4 sm:$0xff]  }
  0x20   : > { %1864 = vmatpush3.bf16.msra.mxu0 %v2201_v15  ;;  %2161 = vmatpush3.bf16.msra.mxu1 %v2201_v15  ;;  %v2284_v14 = vld [vmem:[%s2435_s11 + $0x168] ss:$20 sps:$4 sm:$0xff]   ;;  %v2285_v15 = vld [vmem:[%s2435_s11 + $0xd0] ss:$20 sps:$4 sm:$0xff]  }
  0x21   : > { %1865 = vmatprep.subr.bf16.mxu0 %v2202_v16  ;;  %2154 = vmatprep.subr.bf16.mxu1 %v2202_v16  ;;  %v2287_v16 = vld [vmem:[%s2435_s11 + $0x194] ss:$20 sps:$4 sm:$0xff]  }
  0x24   : > { %1866 = vmatpush3.bf16.msra.mxu0 %v2203_v17  ;;  %2162 = vmatpush3.bf16.msra.mxu1 %v2203_v17  ;;  %v2289_v17 = vld [vmem:[%s2435_s11 + $0xfc] ss:$20 sps:$4 sm:$0xff]  }
  0x25   : > { %1963 = vmatprep.subr.bf16.mxu1 %v2210_v18  ;;  %2099 = vmatprep.subr.bf16.mxu0 %v2213_v19  ;;  %v2291_v18 = vld [vmem:[%s2435_s11 + $0x190] ss:$20 sps:$4 sm:$0xff]  }
  0x27   : > { %1101 = vmatmul.mubr.bf16.vlgmr.msra.gmra.mrb[0].mxu0 %v2204_v20  ;;  %1197 = vmatmul.mubr.bf16.vlgmr.msra.gmra.mrb[0].mxu1 %v2207_v21  ;;  %v2293_v20 = vld [vmem:[%s2435_s11 + $0x1bc] ss:$20 sps:$4 sm:$0xff]   ;;  %v2295_v21 = vld [vmem:[%s2435_s11 + $0x124] ss:$20 sps:$4 sm:$0xff]  }
  0x28   : > { %1964 = vmatpush3.bf16.msra.mxu1 %v2211_v22  ;;  %2100 = vmatpush3.bf16.msra.mxu0 %v2213_v19  ;;  %v2292_v19 = vld [vmem:[%s2435_s11 + $0xf8] ss:$20 sps:$4 sm:$0xff]  }
  0x29   : > { %1965 = vmatprep.subr.bf16.mxu1 %v2212_v23  ;;  %1108 = vmatprep.mubr.bf16.mxu0 %v2215_v24  ;;  %v2297_v22 = vld [vmem:[%s2435_s11 + $0x1b8] ss:$20 sps:$4 sm:$0xff]   ;;  %v2298_v23 = vld [vmem:[%s2435_s11 + $0x120] ss:$20 sps:$4 sm:$0xff]  }
  0x2a   : > { %1204 = vmatprep.mubr.bf16.mxu1 %v2217_v25  ;;  %2101 = vmatprep.subr.bf16.mxu0 %v2232_v26  ;;  %v2300_v24 = vld [vmem:[%s2435_s11 + $0x14c] ss:$20 sps:$4 sm:$0xff]   ;;  %v2302_v25 = vld [vmem:[%s2435_s11 + $0x10] ss:$20 sps:$4 sm:$0xff]  }
  0x2c   : > { %1966 = vmatpush3.bf16.msra.mxu1 %v2214_v27  ;;  %2102 = vmatpush3.bf16.msra.mxu0 %v2232_v26  ;;  %v2303_v26 = vld [vmem:[%s2435_s11 + $0x148] ss:$20 sps:$4 sm:$0xff]   ;;  %v2304_v27 = vld [vmem:[%s2435_s11 + $0x38] ss:$20 sps:$4 sm:$0xff]  }
  0x2d   : > { %1967 = vmatprep.subr.bf16.mxu1 %v2221_v29  ;;  %2103 = vmatprep.subr.bf16.mxu0 %v2245_v38  ;;  %v2307_v29 = vld [vmem:[%s2435_s11 + $0x60] ss:$20 sps:$4 sm:$0xff]  }
  0x2f   : > { %1109 = vmatmul.mubr.bf16.gmra.mrb[4].mxu0 %v2219_v28  ;;  %1205 = vmatmul.mubr.bf16.gmra.mrb[4].mxu1 %v2220_v30  ;;  %v2305_v28 = vld [vmem:[%s2435_s11 + $0x174] ss:$20 sps:$4 sm:$0xff]   ;;  %v2308_v30 = vld [vmem:[%s2435_s11 + $0x170] ss:$20 sps:$4 sm:$0xff]  }
  0x30   : > { %1968 = vmatpush3.bf16.msra.mxu1 %v2222_v31  ;;  %1116 = vmatprep.mubr.bf16.mxu0 %v2225_v32  ;;  %v2309_v31 = vld [vmem:[%s2435_s11 + $0x88] ss:$20 sps:$4 sm:$0xff]  }
  0x31   : > { %1969 = vmatprep.subr.bf16.mxu1 %v2223_v33  ;;  %1212 = vmatprep.mubr.bf16.mxu1 %v2227_v34  ;;  %v2310_v32 = vld [vmem:[%s2435_s11 + $0x19c] ss:$20 sps:$4 sm:$0xff]   ;;  %v2313_v34 = vld [vmem:[%s2435_s11 + $0x198] ss:$20 sps:$4 sm:$0xff]  }
  0x32   : > { %2104 = vmatpush3.bf16.msra.mxu0 %v2245_v38  ;;  %v2312_v33 = vld [vmem:[%s2435_s11 + $0xb0] ss:$20 sps:$4 sm:$0xff]   ;;  %v2318_v38 = vld [vmem:[%s2435_s11 + $0x1c0] ss:$20 sps:$4 sm:$0xff]  }
  0x33   : > { %2105 = vmatprep.subr.bf16.mxu0 %v2259_v45 }
  0x34   : > { %1970 = vmatpush3.bf16.msra.mxu1 %v2224_v35  ;;  %v2314_v35 = vld [vmem:[%s2435_s11 + $0xd8] ss:$20 sps:$4 sm:$0xff]  }
  0x35   : > { %1971 = vmatprep.subr.bf16.mxu1 %v2231_v36  ;;  %v2315_v36 = vld [vmem:[%s2435_s11 + $0x1c4] ss:$20 sps:$4 sm:$0xff]  }
  0x36   : > { %2106 = vmatpush3.bf16.msra.mxu0 %v2259_v45  ;;  %v2327_v45 = vld [vmem:[%s2435_s11 + $0x1a0] ss:$20 sps:$4 sm:$0xff]  }
  0x37   : > { %1117 = vmatmul.mubr.bf16.gmra.mrb[8].mxu0 %v2229_v37  ;;  %1213 = vmatmul.mubr.bf16.gmra.mrb[8].mxu1 %v2230_v39  ;;  %v2317_v37 = vld [vmem:[%s2435_s11 + $0x100] ss:$20 sps:$4 sm:$0xff]   ;;  %v2319_v39 = vld [vmem:[%s2435_s11 + $0x128] ss:$20 sps:$4 sm:$0xff]  }
  0x38   : > { %1972 = vmatpush3.bf16.msra.mxu1 %v2233_v40  ;;  %1124 = vmatprep.mubr.bf16.mxu0 %v2236_v42  ;;  %v2320_v40 = vld [vmem:[%s2435_s11 + $0x1ec] ss:$20 sps:$4 sm:$0xff]   ;;  %v2323_v42 = vld [vmem:[%s2435_s11 + $0x1e8] ss:$20 sps:$4 sm:$0xff]  }
  0x39   : > { %1973 = vmatprep.subr.bf16.mxu1 %v2234_v41  ;;  %1220 = vmatprep.mubr.bf16.mxu1 %v2238_v43  ;;  %v2322_v41 = vld [vmem:[%s2435_s11 + $0x150] ss:$20 sps:$4 sm:$0xff]   ;;  %v2324_v43 = vld [vmem:[%s2435_s11 + $0x178] ss:$20 sps:$4 sm:$0xff]  }
  0x3a   : > { %2107 = vmatprep.subr.bf16.mxu0 %v2266_v52 }
  0x3b   : > { %2108 = vmatpush3.bf16.msra.mxu0 %v2266_v52  ;;  %v2335_v52 = vld [vmem:[%s2435_s11 + $0x264] ss:$20 sps:$4 sm:$0xff]  }
  0x3c   : > { %1974 = vmatpush3.bf16.msra.mxu1 %v2235_v44  ;;  %2109 = vmatprep.subr.bf16.mxu0 %v2279_v57  ;;  %v2325_v44 = vld [vmem:[%s2435_s11 + $0x214] ss:$20 sps:$4 sm:$0xff]  }
  0x3d   : > { %1975 = vmatprep.subr.bf16.mxu1 %v2242_v48  ;;  %v2330_v48 = vld [vmem:[%s2435_s11 + $0x23c] ss:$20 sps:$4 sm:$0xff]  }
  0x3f   : > { %1125 = vmatmul.mubr.bf16.gmra.mrb[12].mxu0 %v2240_v46  ;;  %1221 = vmatmul.mubr.bf16.gmra.mrb[12].mxu1 %v2241_v47  ;;  %v2328_v46 = vld [vmem:[%s2435_s11 + $0x210] ss:$20 sps:$4 sm:$0xff]   ;;  %v2329_v47 = vld [vmem:[%s2435_s11 + $0x1c8] ss:$20 sps:$4 sm:$0xff]  }
  0x40   : > { %1976 = vmatpush3.bf16.msra.mxu1 %v2243_v49  ;;  %1132 = vmatprep.mubr.bf16.mxu0 %v2247_v51  ;;  %v2332_v49 = vld [vmem:[%s2435_s11 + $0x1f0] ss:$20 sps:$4 sm:$0xff]   ;;  %v2334_v51 = vld [vmem:[%s2435_s11 + $0x218] ss:$20 sps:$4 sm:$0xff]  }
  0x41   : > { %1977 = vmatprep.subr.bf16.mxu1 %v2244_v50  ;;  %1261 = vmatprep.mubr.bf16.mxu1 %v2251_v53  ;;  %v2333_v50 = vld [vmem:[%s2435_s11 + $0x238] ss:$20 sps:$4 sm:$0xff]   ;;  %v2337_v53 = vld [vmem:[%s2435_s11 + $0x240] ss:$20 sps:$4 sm:$0xff]  }
  0x42   : > { %2110 = vmatpush3.bf16.msra.mxu0 %v2279_v57 }
  0x43   : > { %2111 = vmatprep.subr.bf16.mxu0 %v2286_v60 }
  0x44   : > { %1978 = vmatpush3.bf16.msra.mxu1 %v2246_v54  ;;  %v2338_v54 = vld [vmem:[%s2435_s11 + $0x260] ss:$20 sps:$4 sm:$0xff]  }
  0x46   : > { %2112 = vmatpush3.bf16.msra.mxu0 %v2286_v60 }
  0x47   : > { %1133 = vmatmul.mubr.bf16.gmra.mrb[16].mxu0 %v2252_v56  ;;  %1262 = vmatmul.mubr.bf16.vlgmr.msra.gmra.mrb[16].mxu1 %v2249_v55  ;;  %v2339_v55 = vld [vmem:[%s2435_s11 + $0x268] ss:$20 sps:$4 sm:$0xff]  }
  0x48   : > { %1140 = vmatprep.mubr.bf16.mxu0 %v2253_v58  ;;  %1269 = vmatprep.mubr.bf16.mxu1 %v2255_v59 }
  0x49   : > { %2113 = vmatprep.subr.bf16.mxu0 %v2299_v1 }
  0x4a   : > { %2114 = vmatpush3.bf16.msra.mxu0 %v2299_v1 }
  0x4f   : > { %1141 = vmatmul.mubr.bf16.gmra.mrb[20].mxu0 %v2257_v61  ;;  %1270 = vmatmul.mubr.bf16.gmra.mrb[20].mxu1 %v2258_v62 }
  0x50   : > { %1148 = vmatprep.mubr.bf16.mxu0 %v2260_v63  ;;  %1277 = vmatprep.mubr.bf16.mxu1 %v2262_v0 }
  0x57   : > { %1149 = vmatmul.mubr.bf16.gmra.mrb[24].mxu0 %v2264_v2  ;;  %1278 = vmatmul.mubr.bf16.gmra.mrb[24].mxu1 %v2265_v3 }
  0x58   : > { %1156 = vmatprep.mubr.bf16.mxu0 %v2267_v4  ;;  %1285 = vmatprep.mubr.bf16.mxu1 %v2269_v5 }
  0x5f   : > { %1157 = vmatmul.mubr.bf16.gmra.mrb[28].mxu0 %v2271_v6  ;;  %1286 = vmatmul.mubr.bf16.gmra.mrb[28].mxu1 %v2272_v7 }
  0x60   : > { %1164 = vmatprep.mubr.bf16.mxu0 %v2273_v8  ;;  %1293 = vmatprep.mubr.bf16.mxu1 %v2275_v9 }
  0x67   : > { %1165 = vmatmul.mubr.bf16.gmra.mrb[32].mxu0 %v2277_v10  ;;  %1294 = vmatmul.mubr.bf16.gmra.mrb[32].mxu1 %v2278_v11 }
  0x68   : > { %1172 = vmatprep.mubr.bf16.mxu0 %v2280_v12  ;;  %1301 = vmatprep.mubr.bf16.mxu1 %v2282_v13 }
  0x6f   : > { %1173 = vmatmul.mubr.bf16.gmra.mrb[36].mxu0 %v2284_v14  ;;  %1302 = vmatmul.mubr.bf16.gmra.mrb[36].mxu1 %v2285_v15 }
  0x70   : > { %1180 = vmatprep.mubr.bf16.mxu0 %v2287_v16  ;;  %1309 = vmatprep.mubr.bf16.mxu1 %v2289_v17 }
  0x77   : > { %1181 = vmatmul.mubr.bf16.gmra.mrb[40].mxu0 %v2291_v18  ;;  %1310 = vmatmul.mubr.bf16.gmra.mrb[40].mxu1 %v2292_v19 }
  0x78   : > { %1188 = vmatprep.mubr.bf16.mxu0 %v2293_v20  ;;  %1317 = vmatprep.mubr.bf16.mxu1 %v2295_v21 }
  0x7f   : > { %1189 = vmatmul.mubr.bf16.gmra.mrb[44].mxu0 %v2297_v22  ;;  %1318 = vmatmul.mubr.bf16.gmra.mrb[44].mxu1 %v2298_v23 }
  0x80   : > { %1325 = vmatprep.mubr.bf16.mxu1 %v2300_v24  ;;  %2115 = vmatprep.mubr.bf16.mxu0 %v2302_v25 }
  0x87   : > { %1326 = vmatmul.mubr.bf16.gmra.mrb[48].mxu1 %v2303_v26  ;;  %2116 = vmatmul.mubr.bf16.vlgmr.msra.gmra.mrb[48].mxu0 %v2304_v27 }
  0x88   : > { %1333 = vmatprep.mubr.bf16.mxu1 %v2305_v28  ;;  %2119 = vmatprep.mubr.bf16.mxu0 %v2307_v29 }
  0x8f   : > { %1334 = vmatmul.mubr.bf16.gmra.mrb[52].mxu1 %v2308_v30  ;;  %2120 = vmatmul.mubr.bf16.gmra.mrb[52].mxu0 %v2309_v31 }
  0x90   : > { %1341 = vmatprep.mubr.bf16.mxu1 %v2310_v32  ;;  %2123 = vmatprep.mubr.bf16.mxu0 %v2312_v33 }
  0x97   : > { %1342 = vmatmul.mubr.bf16.gmra.mrb[56].mxu1 %v2313_v34  ;;  %2124 = vmatmul.mubr.bf16.gmra.mrb[56].mxu0 %v2314_v35 }
  0x98   : > { %1349 = vmatprep.mubr.bf16.mxu1 %v2315_v36  ;;  %2127 = vmatprep.mubr.bf16.mxu0 %v2317_v37 }
  0x9f   : > { %1350 = vmatmul.mubr.bf16.gmra.mrb[60].mxu1 %v2318_v38  ;;  %2128 = vmatmul.mubr.bf16.gmra.mrb[60].mxu0 %v2319_v39 }
  0xa0   : > { %1357 = vmatprep.mubr.bf16.mxu1 %v2320_v40  ;;  %2131 = vmatprep.mubr.bf16.mxu0 %v2322_v41 }
  0xa7   : > { %1358 = vmatmul.mubr.bf16.gmra.mrb[64].mxu1 %v2323_v42  ;;  %2132 = vmatmul.mubr.bf16.gmra.mrb[64].mxu0 %v2324_v43  ;;  %v2629_v42 = vld [vmem:[%s2807_s2] ss:$0 sm:$0xff] }
  0xa8   : > { %1365 = vmatprep.mubr.bf16.mxu1 %v2325_v44  ;;  %2135 = vmatprep.mubr.bf16.mxu0 %v2327_v45 }
  0xaf   : > { %1366 = vmatmul.mubr.bf16.gmra.mrb[68].mxu1 %v2328_v46  ;;  %2136 = vmatmul.mubr.bf16.gmra.mrb[68].mxu0 %v2329_v47 }
  0xb0   : > { %1373 = vmatprep.mubr.bf16.mxu1 %v2330_v48  ;;  %2139 = vmatprep.mubr.bf16.mxu0 %v2332_v49 }
  0xb7   : > { %1374 = vmatmul.mubr.bf16.gmra.mrb[72].mxu1 %v2333_v50  ;;  %2140 = vmatmul.mubr.bf16.gmra.mrb[72].mxu0 %v2334_v51 }
  0xb8   : > { %1381 = vmatprep.mubr.bf16.mxu1 %v2335_v52  ;;  %2143 = vmatprep.mubr.bf16.mxu0 %v2337_v53 }
  0xbf   : > { %1382 = vmatmul.mubr.bf16.gmra.mrb[76].mxu1 %v2338_v54  ;;  %2144 = vmatmul.mubr.bf16.gmra.mrb[76].mxu0 %v2339_v55 }
  0xfa   : > { %v1939_v56 = vpop.f32.mrb[0].mxu1  ;;  %v1867_v57 = vpop.f32.mrb[0].mxu0 }
  0xfb   : > { %v1940_v58 = vpop.f32.mrb[1].mxu1  ;;  %v1868_v59 = vpop.f32.mrb[1].mxu0 }
  0xfc   : > { %v2610_v60 = vadd.f32 %v1940_v58, %v1939_v56  ;;  %v1942_v61 = vpop.f32.mrb[2].mxu1  ;;  %v1869_v62 = vadd.f32 %v1868_v59, %v1867_v57  ;;  %v1870_v63 = vpop.f32.mrb[2].mxu0 }
  0xfd   : > { %v1943_v0 = vpop.f32.mrb[3].mxu1  ;;  %v1871_v1 = vpop.f32.mrb[3].mxu0 }
  0xfe   : > { %v2612_v2 = vadd.f32 %v1943_v0, %v1942_v61  ;;  %v1872_v3 = vadd.f32 %v1871_v1, %v1870_v63  ;;  %v1103_v45 = vadd.f32 %v1869_v62, %v2629_v42 }
 0x100   : > { %v1106_v52 = vadd.f32 %v1872_v3, %v2629_v42 }
 0x102   : > { %v1945_v4 = vpop.f32.mrb[4].mxu1  ;;  %v1873_v5 = vpop.f32.mrb[4].mxu0 }
 0x103   : > { %v1946_v6 = vpop.f32.mrb[5].mxu1  ;;  %v1874_v7 = vpop.f32.mrb[5].mxu0 }
 0x104   : > { %v2614_v8 = vadd.f32 %v1946_v6, %v1945_v4  ;;  %v1948_v9 = vpop.f32.mrb[6].mxu1  ;;  %v1875_v10 = vadd.f32 %v1874_v7, %v1873_v5  ;;  %v1876_v11 = vpop.f32.mrb[6].mxu0 }
 0x105   : > { %v1949_v12 = vpop.f32.mrb[7].mxu1  ;;  %v1877_v13 = vpop.f32.mrb[7].mxu0 }
 0x106   : > { %v2616_v14 = vadd.f32 %v1949_v12, %v1948_v9  ;;  %v1878_v15 = vadd.f32 %v1877_v13, %v1876_v11  ;;  %v1111_v62 = vadd.f32 %v1875_v10, %v2629_v42 }
 0x108   : > { %v1114_v3 = vadd.f32 %v1878_v15, %v2629_v42 }
 0x10a   : > { %v1951_v16 = vpop.f32.mrb[8].mxu1  ;;  %v1879_v17 = vpop.f32.mrb[8].mxu0 }
 0x10b   : > { %v1952_v18 = vpop.f32.mrb[9].mxu1  ;;  %v1880_v19 = vpop.f32.mrb[9].mxu0 }
 0x10c   : > { %v2618_v20 = vadd.f32 %v1952_v18, %v1951_v16  ;;  %v1954_v21 = vpop.f32.mrb[10].mxu1  ;;  %v1881_v22 = vadd.f32 %v1880_v19, %v1879_v17  ;;  %v1882_v23 = vpop.f32.mrb[10].mxu0 }
 0x10d   : > { %v1955_v24 = vpop.f32.mrb[11].mxu1  ;;  %v1883_v25 = vpop.f32.mrb[11].mxu0 }
 0x10e   : > { %v2620_v26 = vadd.f32 %v1955_v24, %v1954_v21  ;;  %v1884_v27 = vadd.f32 %v1883_v25, %v1882_v23  ;;  %v1119_v10 = vadd.f32 %v1881_v22, %v2629_v42 }
 0x110   : > { %v1122_v15 = vadd.f32 %v1884_v27, %v2629_v42 }
 0x112   : > { %v1957_v28 = vpop.f32.mrb[12].mxu1  ;;  %v1885_v29 = vpop.f32.mrb[12].mxu0 }
 0x113   : > { %v1958_v30 = vpop.f32.mrb[13].mxu1  ;;  %v1886_v31 = vpop.f32.mrb[13].mxu0 }
 0x114   : > { %v2622_v32 = vadd.f32 %v1958_v30, %v1957_v28  ;;  %v1960_v33 = vpop.f32.mrb[14].mxu1  ;;  %v1887_v34 = vadd.f32 %v1886_v31, %v1885_v29  ;;  %v1888_v35 = vpop.f32.mrb[14].mxu0 }
 0x115   : > { %v1961_v36 = vpop.f32.mrb[15].mxu1  ;;  %v1889_v37 = vpop.f32.mrb[15].mxu0 }
 0x116   : > { %v2624_v38 = vadd.f32 %v1961_v36, %v1960_v33  ;;  %v1890_v39 = vadd.f32 %v1889_v37, %v1888_v35  ;;  %v1127_v22 = vadd.f32 %v1887_v34, %v2629_v42 }
 0x118   : > { %v1130_v27 = vadd.f32 %v1890_v39, %v2629_v42 }
 0x11a   : > { %v1979_v40 = vpop.f32.mrb[16].mxu1  ;;  %v1891_v41 = vpop.f32.mrb[16].mxu0 }
 0x11b   : > { %v1980_v43 = vpop.f32.mrb[17].mxu1  ;;  %v1892_v44 = vpop.f32.mrb[17].mxu0 }
 0x11c   : > { %v1981_v46 = vadd.f32 %v1980_v43, %v1979_v40  ;;  %v1982_v47 = vpop.f32.mrb[18].mxu1  ;;  %v1893_v48 = vadd.f32 %v1892_v44, %v1891_v41  ;;  %v1894_v49 = vpop.f32.mrb[18].mxu0 }
 0x11d   : > { %v1983_v50 = vpop.f32.mrb[19].mxu1  ;;  %v1895_v51 = vpop.f32.mrb[19].mxu0 }
 0x11e   : > { %v1984_v53 = vadd.f32 %v1983_v50, %v1982_v47  ;;  %v1896_v54 = vadd.f32 %v1895_v51, %v1894_v49  ;;  %v2633_v55 = vadd.f32 %v1981_v46, %v1103_v45  ;;  %v1135_v34 = vadd.f32 %v1893_v48, %v2629_v42 }
 0x120   : > { %v2635_v56 = vadd.f32 %v1984_v53, %v1106_v52  ;;  %v1138_v39 = vadd.f32 %v1896_v54, %v2629_v42 }
 0x122   : > { %v1985_v57 = vpop.f32.mrb[20].mxu1  ;;  %v1897_v58 = vpop.f32.mrb[20].mxu0 }
 0x123   : > { %v1986_v59 = vpop.f32.mrb[21].mxu1  ;;  %v1898_v61 = vpop.f32.mrb[21].mxu0 }
 0x124   : > { %v1987_v63 = vadd.f32 %v1986_v59, %v1985_v57  ;;  %v1988_v0 = vpop.f32.mrb[22].mxu1  ;;  %v1899_v1 = vadd.f32 %v1898_v61, %v1897_v58  ;;  %v1900_v4 = vpop.f32.mrb[22].mxu0 }
 0x125   : > { %v1989_v5 = vpop.f32.mrb[23].mxu1  ;;  %v1901_v6 = vpop.f32.mrb[23].mxu0 }
 0x126   : > { %v1990_v7 = vadd.f32 %v1989_v5, %v1988_v0  ;;  %v1902_v9 = vadd.f32 %v1901_v6, %v1900_v4  ;;  %v2639_v11 = vadd.f32 %v1987_v63, %v1111_v62 }
 0x128   : > { %v2641_v12 = vadd.f32 %v1990_v7, %v1114_v3 }
 0x12a   : > { %v1991_v13 = vpop.f32.mrb[24].mxu1  ;;  %v1903_v16 = vpop.f32.mrb[24].mxu0 }
 0x12b   : > { %v1992_v17 = vpop.f32.mrb[25].mxu1  ;;  %v1904_v18 = vpop.f32.mrb[25].mxu0 }
 0x12c   : > { %v1993_v19 = vadd.f32 %v1992_v17, %v1991_v13  ;;  %v1994_v21 = vpop.f32.mrb[26].mxu1  ;;  %v1905_v23 = vadd.f32 %v1904_v18, %v1903_v16  ;;  %v1906_v24 = vpop.f32.mrb[26].mxu0 }
 0x12d   : > { %v1995_v25 = vpop.f32.mrb[27].mxu1  ;;  %v1907_v28 = vpop.f32.mrb[27].mxu0 }
 0x12e   : > { %v1996_v29 = vadd.f32 %v1995_v25, %v1994_v21  ;;  %v1908_v30 = vadd.f32 %v1907_v28, %v1906_v24  ;;  %v2645_v31 = vadd.f32 %v1993_v19, %v1119_v10  ;;  %v1143_v10 = vadd.f32 %v1899_v1, %v2629_v42 }
 0x130   : > { %v2647_v33 = vadd.f32 %v1996_v29, %v1122_v15  ;;  %v1146_v15 = vadd.f32 %v1902_v9, %v2629_v42 }
 0x132   : > { %v1997_v35 = vpop.f32.mrb[28].mxu1  ;;  %v1909_v36 = vpop.f32.mrb[28].mxu0 }
 0x133   : > { %v1998_v37 = vpop.f32.mrb[29].mxu1  ;;  %v1910_v40 = vpop.f32.mrb[29].mxu0 }
 0x134   : > { %v1999_v41 = vadd.f32 %v1998_v37, %v1997_v35  ;;  %v2000_v43 = vpop.f32.mrb[30].mxu1  ;;  %v1911_v44 = vadd.f32 %v1910_v40, %v1909_v36  ;;  %v1912_v45 = vpop.f32.mrb[30].mxu0 }
 0x135   : > { %v2001_v46 = vpop.f32.mrb[31].mxu1  ;;  %v1913_v47 = vpop.f32.mrb[31].mxu0 }
 0x136   : > { %v2002_v49 = vadd.f32 %v2001_v46, %v2000_v43  ;;  %v1914_v50 = vadd.f32 %v1913_v47, %v1912_v45  ;;  %v2651_v51 = vadd.f32 %v1999_v41, %v1127_v22  ;;  %v1151_v43 = vadd.f32 %v1905_v23, %v2629_v42 }
 0x138   : > { %v2653_v52 = vadd.f32 %v2002_v49, %v1130_v27 }
 0x13a   : > { %v2003_v53 = vpop.f32.mrb[32].mxu1  ;;  %v1915_v57 = vpop.f32.mrb[32].mxu0 }
 0x13b   : > { %v2004_v58 = vpop.f32.mrb[33].mxu1  ;;  %v1916_v59 = vpop.f32.mrb[33].mxu0 }
 0x13c   : > { %v2005_v61 = vadd.f32 %v2004_v58, %v2003_v53  ;;  %v2006_v62 = vpop.f32.mrb[34].mxu1  ;;  %v2656_v63 = vadd.f32 %v1916_v59, %v1915_v57  ;;  %v1918_v0 = vpop.f32.mrb[34].mxu0  ;;  %v1154_v53 = vadd.f32 %v1908_v30, %v2629_v42 }
 0x13d   : > { %v2007_v4 = vpop.f32.mrb[35].mxu1  ;;  %v1919_v5 = vpop.f32.mrb[35].mxu0 }
 0x13e   : > { %v2008_v6 = vadd.f32 %v2007_v4, %v2006_v62  ;;  %v2659_v3 = vadd.f32 %v1919_v5, %v1918_v0  ;;  %v2661_v7 = vadd.f32 %v2005_v61, %v1135_v34  ;;  %v1159_v4 = vadd.f32 %v1911_v44, %v2629_v42 }
 0x140   : > { %v2663_v13 = vadd.f32 %v2008_v6, %v1138_v39 }
 0x142   : > { %v2009_v16 = vpop.f32.mrb[36].mxu1  ;;  %v1921_v17 = vpop.f32.mrb[36].mxu0 }
 0x143   : > { %v2010_v18 = vpop.f32.mrb[37].mxu1  ;;  %v1922_v48 = vpop.f32.mrb[37].mxu0 }
 0x144   : > { %v2011_v19 = vadd.f32 %v2010_v18, %v2009_v16  ;;  %v2012_v21 = vpop.f32.mrb[38].mxu1  ;;  %v2666_v24 = vadd.f32 %v1922_v48, %v1921_v17  ;;  %v1924_v25 = vpop.f32.mrb[38].mxu0  ;;  %v1162_v18 = vadd.f32 %v1914_v50, %v2629_v42 }
 0x145   : > { %v2013_v28 = vpop.f32.mrb[39].mxu1  ;;  %v1925_v54 = vpop.f32.mrb[39].mxu0 }
 0x146   : > { %v2014_v29 = vadd.f32 %v2013_v28, %v2012_v21  ;;  %v2669_v35 = vadd.f32 %v1925_v54, %v1924_v25  ;;  %v2671_v36 = vadd.f32 %v2011_v19, %v1143_v10 }
 0x148   : > { %v2673_v37 = vadd.f32 %v2014_v29, %v1146_v15  ;;  %v1167_v29 = vadd.f32 %v2656_v63, %v2629_v42 }
 0x14a   : > { %v2015_v40 = vpop.f32.mrb[40].mxu1  ;;  %v1927_v22 = vpop.f32.mrb[40].mxu0 }
 0x14b   : > { %v2016_v41 = vpop.f32.mrb[41].mxu1  ;;  %v1928_v1 = vpop.f32.mrb[41].mxu0 }
 0x14c   : > { %v2017_v45 = vadd.f32 %v2016_v41, %v2015_v40  ;;  %v2018_v46 = vpop.f32.mrb[42].mxu1  ;;  %v2676_v47 = vadd.f32 %v1928_v1, %v1927_v22  ;;  %v1930_v27 = vpop.f32.mrb[42].mxu0 }
 0x14d   : > { %v2019_v49 = vpop.f32.mrb[43].mxu1  ;;  %v1931_v9 = vpop.f32.mrb[43].mxu0 }
 0x14e   : > { %v2020_v57 = vadd.f32 %v2019_v49, %v2018_v46  ;;  %v2679_v58 = vadd.f32 %v1931_v9, %v1930_v27  ;;  %v2681_v59 = vadd.f32 %v2017_v45, %v1151_v43 }
 0x150   : > { %v2683_v34 = vadd.f32 %v2020_v57, %v1154_v53 }
 0x152   : > { %v2021_v61 = vpop.f32.mrb[44].mxu1  ;;  %v1933_v62 = vpop.f32.mrb[44].mxu0 }
 0x153   : > { %v2022_v23 = vpop.f32.mrb[45].mxu1  ;;  %v1934_v0 = vpop.f32.mrb[45].mxu0 }
 0x154   : > { %v2023_v5 = vadd.f32 %v2022_v23, %v2021_v61  ;;  %v2024_v39 = vpop.f32.mrb[46].mxu1  ;;  %v2686_v6 = vadd.f32 %v1934_v0, %v1933_v62  ;;  %v1936_v16 = vpop.f32.mrb[46].mxu0 }
 0x155   : > { %v2025_v30 = vpop.f32.mrb[47].mxu1  ;;  %v1937_v17 = vpop.f32.mrb[47].mxu0 }
 0x156   : > { %v2026_v48 = vadd.f32 %v2025_v30, %v2024_v39  ;;  %v2689_v10 = vadd.f32 %v1937_v17, %v1936_v16  ;;  %v2691_v19 = vadd.f32 %v2023_v5, %v1159_v4  ;;  %v1178_v16 = vadd.f32 %v2669_v35, %v2629_v42 }
 0x158   : > { %v2693_v21 = vadd.f32 %v2026_v48, %v1162_v18 }
 0x15a   : > { %v2027_v25 = vpop.f32.mrb[48].mxu1  ;;  %v2117_v28 = vpop.f32.mrb[48].mxu0 }
 0x15b   : > { %v1433_v44 = vadd.f32 %v2117_v28, %v2639_v11  ;;  %v2028_v54 = vpop.f32.mrb[49].mxu1  ;;  %v1424_v15 = vpop.f32.mrb[49].mxu0  ;;  %v1170_v11 = vadd.f32 %v2659_v3, %v2629_v42 }
 0x15c   : > { %v2029_v50 = vadd.f32 %v2028_v54, %v2027_v25  ;;  %v1425_v40 = vadd.f32 %v1424_v15, %v2633_v55  ;;  %v2030_v22 = vpop.f32.mrb[50].mxu1  ;;  %v2118_v41 = vpop.f32.mrb[50].mxu0 }
 0x15d   : > { %v1553_v1 = vmax.f32 %v1433_v44, 0.0  ;;  %v1436_v63 = vadd.f32 %v2118_v41, %v2641_v12  ;;  %v2031_v43 = vpop.f32.mrb[51].mxu1  ;;  %v1427_v45 = vpop.f32.mrb[51].mxu0 }
 0x15e   : > { %v1551_v46 = vmax.f32 %v1425_v40, 0.0  ;;  %v2032_v27 = vadd.f32 %v2031_v43, %v2030_v22  ;;  %v1428_v49 = vadd.f32 %v1427_v45, %v2635_v56  ;;  %v2709_v9 = vadd.f32 %v2029_v50, %v1167_v29 }
 0x15f   : > { %1585 = vst [vmem:[%s2702_s12 + $0x10] sm:$0xff] %v1553_v1  ;;  %v1554_v55 = vmax.f32 %v1436_v63, 0.0  ;;  %v1175_v56 = vadd.f32 %v2666_v24, %v2629_v42  ;;  %v1183_v40 = vadd.f32 %v2676_v47, %v2629_v42  ;;  %v1186_v1 = vadd.f32 %v2679_v58, %v2629_v42 }
 0x160   : > { %1583 = vst [vmem:[%s2702_s12] sm:$0xff] %v1551_v46  ;;  %v1552_v53 = vmax.f32 %v1428_v49, 0.0  ;;  %v2713_v57 = vadd.f32 %v2032_v27, %v1170_v11 }
 0x161   : > { %1586 = vst [vmem:[%s2702_s12 + $0x18] sm:$0xff] %v1554_v55 }
 0x162   : > { %1584 = vst [vmem:[%s2702_s12 + $0x8] sm:$0xff] %v1552_v53  ;;  %v2033_v3 = vpop.f32.mrb[52].mxu1  ;;  %v2121_v61 = vpop.f32.mrb[52].mxu0 }
 0x163   : > { %v1449_v12 = vadd.f32 %v2121_v61, %v2651_v51  ;;  %v2034_v62 = vpop.f32.mrb[53].mxu1  ;;  %v1440_v23 = vpop.f32.mrb[53].mxu0 }
 0x164   : > { %v2035_v0 = vadd.f32 %v2034_v62, %v2033_v3  ;;  %v1441_v4 = vadd.f32 %v1440_v23, %v2645_v31  ;;  %v2036_v5 = vpop.f32.mrb[54].mxu1  ;;  %v2122_v39 = vpop.f32.mrb[54].mxu0 }
 0x165   : > { %v1557_v30 = vmax.f32 %v1449_v12, 0.0  ;;  %v1452_v51 = vadd.f32 %v2122_v39, %v2653_v52  ;;  %v2037_v17 = vpop.f32.mrb[55].mxu1  ;;  %v1443_v18 = vpop.f32.mrb[55].mxu0 }
 0x166   : > { %v1555_v48 = vmax.f32 %v1441_v4, 0.0  ;;  %v2038_v25 = vadd.f32 %v2037_v17, %v2036_v5  ;;  %v1444_v24 = vadd.f32 %v1443_v18, %v2647_v33  ;;  %v1336_v28 = vadd.f32 %v2035_v0, %v1175_v56 }
 0x167   : > { %1589 = vst [vmem:[%s2702_s12 + $0x30] sm:$0xff] %v1557_v30  ;;  %v1558_v44 = vmax.f32 %v1452_v51, 0.0  ;;  %v1194_v4 = vadd.f32 %v2689_v10, %v2629_v42 }
 0x168   : > { %1587 = vst [vmem:[%s2702_s12 + $0x20] sm:$0xff] %v1555_v48  ;;  %v1556_v31 = vmax.f32 %v1444_v24, 0.0  ;;  %v2727_v54 = vadd.f32 %v2038_v25, %v1178_v16 }
 0x169   : > { %1590 = vst [vmem:[%s2702_s12 + $0x38] sm:$0xff] %v1558_v44 }
 0x16a   : > { %1588 = vst [vmem:[%s2702_s12 + $0x28] sm:$0xff] %v1556_v31  ;;  %v2039_v15 = vpop.f32.mrb[56].mxu1  ;;  %v2125_v35 = vpop.f32.mrb[56].mxu0  ;;  %v1199_v31 = vadd.f32 %v2610_v60, %v2629_v42 }
 0x16b   : > { %v1465_v29 = vadd.f32 %v2125_v35, %v2671_v36  ;;  %v2040_v52 = vpop.f32.mrb[57].mxu1  ;;  %v1456_v50 = vpop.f32.mrb[57].mxu0 }
 0x16c   : > { %v2041_v33 = vadd.f32 %v2040_v52, %v2039_v15  ;;  %v1457_v22 = vadd.f32 %v1456_v50, %v2661_v7  ;;  %v2042_v41 = vpop.f32.mrb[58].mxu1  ;;  %v2126_v11 = vpop.f32.mrb[58].mxu0  ;;  %v1202_v52 = vadd.f32 %v2612_v2, %v2629_v42 }
 0x16d   : > { %v1561_v63 = vmax.f32 %v1465_v29, 0.0  ;;  %v1468_v36 = vadd.f32 %v2126_v11, %v2673_v37  ;;  %v2043_v43 = vpop.f32.mrb[59].mxu1  ;;  %v1459_v45 = vpop.f32.mrb[59].mxu0 }
 0x16e   : > { %v1559_v46 = vmax.f32 %v1457_v22, 0.0  ;;  %v2044_v27 = vadd.f32 %v2043_v43, %v2042_v41  ;;  %v1460_v47 = vadd.f32 %v1459_v45, %v2663_v13  ;;  %v2739_v49 = vadd.f32 %v2041_v33, %v1183_v40 }
 0x16f   : > { %1593 = vst [vmem:[%s2702_s12 + $0x50] sm:$0xff] %v1561_v63  ;;  %v1562_v7 = vmax.f32 %v1468_v36, 0.0  ;;  %v1191_v13 = vadd.f32 %v2686_v6, %v2629_v42 }
 0x170   : > { %1591 = vst [vmem:[%s2702_s12 + $0x40] sm:$0xff] %v1559_v46  ;;  %v1560_v55 = vmax.f32 %v1460_v47, 0.0  ;;  %v2743_v53 = vadd.f32 %v2044_v27, %v1186_v1  ;;  %v1207_v46 = vadd.f32 %v2614_v8, %v2629_v42 }
 0x171   : > { %1594 = vst [vmem:[%s2702_s12 + $0x58] sm:$0xff] %v1562_v7 }
 0x172   : > { %1592 = vst [vmem:[%s2702_s12 + $0x48] sm:$0xff] %v1560_v55  ;;  %v2045_v58 = vpop.f32.mrb[60].mxu1  ;;  %v2129_v3 = vpop.f32.mrb[60].mxu0  ;;  %v1210_v55 = vadd.f32 %v2616_v14, %v2629_v42 }
 0x173   : > { %v1481_v37 = vadd.f32 %v2129_v3, %v2691_v19  ;;  %v2046_v61 = vpop.f32.mrb[61].mxu1  ;;  %v1472_v12 = vpop.f32.mrb[61].mxu0 }
 0x174   : > { %v2047_v62 = vadd.f32 %v2046_v61, %v2045_v58  ;;  %v1473_v23 = vadd.f32 %v1472_v12, %v2681_v59  ;;  %v2048_v56 = vpop.f32.mrb[62].mxu1  ;;  %v2130_v0 = vpop.f32.mrb[62].mxu0 }
 0x175   : > { %v1565_v5 = vmax.f32 %v1481_v37, 0.0  ;;  %v1484_v19 = vadd.f32 %v2130_v0, %v2693_v21  ;;  %v2049_v39 = vpop.f32.mrb[63].mxu1  ;;  %v1475_v16 = vpop.f32.mrb[63].mxu0 }
 0x176   : > { %v1563_v30 = vmax.f32 %v1473_v23, 0.0  ;;  %v2050_v51 = vadd.f32 %v2049_v39, %v2048_v56  ;;  %v1476_v6 = vadd.f32 %v1475_v16, %v2683_v34  ;;  %v1352_v17 = vadd.f32 %v2047_v62, %v1191_v13 }
 0x177   : > { %1597 = vst [vmem:[%s2702_s12 + $0x70] sm:$0xff] %v1565_v5  ;;  %v1566_v18 = vmax.f32 %v1484_v19, 0.0  ;;  %v1215_v39 = vadd.f32 %v2618_v20, %v2629_v42 }
 0x178   : > { %1595 = vst [vmem:[%s2702_s12 + $0x60] sm:$0xff] %v1563_v30  ;;  %v1564_v59 = vmax.f32 %v1476_v6, 0.0  ;;  %v1355_v48 = vadd.f32 %v2050_v51, %v1194_v4  ;;  %v1218_v6 = vadd.f32 %v2620_v26, %v2629_v42 }
 0x179   : > { %1598 = vst [vmem:[%s2702_s12 + $0x78] sm:$0xff] %v1566_v18 }
 0x17a   : > { %1596 = vst [vmem:[%s2702_s12 + $0x68] sm:$0xff] %v1564_v59  ;;  %v2051_v25 = vpop.f32.mrb[64].mxu1  ;;  %v2133_v24 = vpop.f32.mrb[64].mxu0 }
 0x17b   : > { %v1497_v10 = vadd.f32 %v2133_v24, %v1336_v28  ;;  %v2052_v44 = vpop.f32.mrb[65].mxu1  ;;  %v1488_v21 = vpop.f32.mrb[65].mxu0 }
 0x17c   : > { %v2053_v15 = vadd.f32 %v2052_v44, %v2051_v25  ;;  %v1489_v34 = vadd.f32 %v1488_v21, %v2709_v9  ;;  %v2054_v35 = vpop.f32.mrb[66].mxu1  ;;  %v2134_v29 = vpop.f32.mrb[66].mxu0 }
 0x17d   : > { %v1569_v50 = vmax.f32 %v1497_v10, 0.0  ;;  %v1500_v28 = vadd.f32 %v2134_v29, %v2727_v54  ;;  %v2055_v40 = vpop.f32.mrb[67].mxu1  ;;  %v1491_v33 = vpop.f32.mrb[67].mxu0  ;;  %v1223_v29 = vadd.f32 %v2622_v32, %v2629_v42 }
 0x17e   : > { %v1567_v22 = vmax.f32 %v1489_v34, 0.0  ;;  %v2056_v41 = vadd.f32 %v2055_v40, %v2054_v35  ;;  %v1492_v60 = vadd.f32 %v1491_v33, %v2713_v57  ;;  %v1360_v11 = vadd.f32 %v2053_v15, %v1199_v31 }
 0x17f   : > { %1601 = vst [vmem:[%s2702_s12 + $0x90] sm:$0xff] %v1569_v50  ;;  %v1570_v1 = vmax.f32 %v1500_v28, 0.0  ;;  %v1226_v33 = vadd.f32 %v2624_v38, %v2629_v42 }
 0x180   : > { %1599 = vst [vmem:[%s2702_s12 + $0x80] sm:$0xff] %v1567_v22  ;;  %v1568_v9 = vmax.f32 %v1492_v60, 0.0  ;;  %v1363_v63 = vadd.f32 %v2056_v41, %v1202_v52 }
 0x181   : > { %1602 = vst [vmem:[%s2702_s12 + $0x98] sm:$0xff] %v1570_v1 }
 0x182   : > { %1600 = vst [vmem:[%s2702_s12 + $0x88] sm:$0xff] %v1568_v9  ;;  %v2057_v36 = vpop.f32.mrb[68].mxu1  ;;  %v2137_v43 = vpop.f32.mrb[68].mxu0 }
 0x183   : > { %v1513_v2 = vadd.f32 %v2137_v43, %v1352_v17  ;;  %v2058_v45 = vpop.f32.mrb[69].mxu1  ;;  %v1504_v54 = vpop.f32.mrb[69].mxu0 }
 0x184   : > { %v2059_v27 = vadd.f32 %v2058_v45, %v2057_v36  ;;  %v1505_v57 = vadd.f32 %v1504_v54, %v2739_v49  ;;  %v2060_v47 = vpop.f32.mrb[70].mxu1  ;;  %v2138_v7 = vpop.f32.mrb[70].mxu0 }
 0x185   : > { %v1573_v58 = vmax.f32 %v1513_v2, 0.0  ;;  %v1516_v3 = vadd.f32 %v2138_v7, %v1355_v48  ;;  %v2061_v37 = vpop.f32.mrb[71].mxu1  ;;  %v1507_v61 = vpop.f32.mrb[71].mxu0 }
 0x186   : > { %v1571_v12 = vmax.f32 %v1505_v57, 0.0  ;;  %v2062_v13 = vadd.f32 %v2061_v37, %v2060_v47  ;;  %v1508_v62 = vadd.f32 %v1507_v61, %v2743_v53  ;;  %v1368_v8 = vadd.f32 %v2059_v27, %v1207_v46 }
 0x187   : > { %1605 = vst [vmem:[%s2702_s12 + $0xb0] sm:$0xff] %v1573_v58  ;;  %v1574_v23 = vmax.f32 %v1516_v3, 0.0 }
 0x188   : > { %1603 = vst [vmem:[%s2702_s12 + $0xa0] sm:$0xff] %v1571_v12  ;;  %v1572_v49 = vmax.f32 %v1508_v62, 0.0  ;;  %v1371_v56 = vadd.f32 %v2062_v13, %v1210_v55 }
 0x189   : > { %1606 = vst [vmem:[%s2702_s12 + $0xb8] sm:$0xff] %v1574_v23 }
 0x18a   : > { %1604 = vst [vmem:[%s2702_s12 + $0xa8] sm:$0xff] %v1572_v49  ;;  %v2063_v0 = vpop.f32.mrb[72].mxu1  ;;  %v2141_v4 = vpop.f32.mrb[72].mxu0 }
 0x18b   : > { %v1529_v5 = vadd.f32 %v2141_v4, %v1368_v8  ;;  %v2064_v14 = vpop.f32.mrb[73].mxu1  ;;  %v1520_v19 = vpop.f32.mrb[73].mxu0 }
 0x18c   : > { %v2065_v16 = vadd.f32 %v2064_v14, %v2063_v0  ;;  %v1521_v53 = vadd.f32 %v1520_v19, %v1360_v11  ;;  %v2066_v30 = vpop.f32.mrb[74].mxu1  ;;  %v2142_v51 = vpop.f32.mrb[74].mxu0 }
 0x18d   : > { %v1577_v17 = vmax.f32 %v1529_v5, 0.0  ;;  %v1532_v18 = vadd.f32 %v2142_v51, %v1371_v56  ;;  %v2067_v59 = vpop.f32.mrb[75].mxu1  ;;  %v1523_v48 = vpop.f32.mrb[75].mxu0 }
 0x18e   : > { %v1575_v25 = vmax.f32 %v1521_v53, 0.0  ;;  %v2068_v24 = vadd.f32 %v2067_v59, %v2066_v30  ;;  %v1524_v10 = vadd.f32 %v1523_v48, %v1363_v63  ;;  %v1376_v44 = vadd.f32 %v2065_v16, %v1215_v39 }
 0x18f   : > { %1609 = vst [vmem:[%s2702_s12 + $0xd0] sm:$0xff] %v1577_v17  ;;  %v1578_v20 = vmax.f32 %v1532_v18, 0.0 }
 0x190   : > { %1607 = vst [vmem:[%s2702_s12 + $0xc0] sm:$0xff] %v1575_v25  ;;  %v1576_v21 = vmax.f32 %v1524_v10, 0.0  ;;  %v1379_v31 = vadd.f32 %v2068_v24, %v1218_v6 }
 0x191   : > { %1610 = vst [vmem:[%s2702_s12 + $0xd8] sm:$0xff] %v1578_v20 }
 0x192   : > { %1608 = vst [vmem:[%s2702_s12 + $0xc8] sm:$0xff] %v1576_v21  ;;  %v2069_v15 = vpop.f32.mrb[76].mxu1  ;;  %v2145_v34 = vpop.f32.mrb[76].mxu0 }
 0x193   : > { %v2070_v35 = vpop.f32.mrb[77].mxu1  ;;  %v1536_v26 = vpop.f32.mrb[77].mxu0 }
 0x194   : > { %v2071_v52 = vadd.f32 %v2070_v35, %v2069_v15  ;;  %v1537_v50 = vadd.f32 %v1536_v26, %v1376_v44  ;;  %v2072_v28 = vpop.f32.mrb[78].mxu1  ;;  %v2146_v40 = vpop.f32.mrb[78].mxu0 }
 0x195   : > { %v2073_v22 = vpop.f32.mrb[79].mxu1  ;;  %v1539_v41 = vpop.f32.mrb[79].mxu0 }
 0x196   : > { %v1384_v60 = vadd.f32 %v2071_v52, %v1223_v29  ;;  %v1579_v11 = vmax.f32 %v1537_v50, 0.0  ;;  %v2074_v1 = vadd.f32 %v2073_v22, %v2072_v28  ;;  %v1540_v9 = vadd.f32 %v1539_v41, %v1379_v31 }
 0x198   : > { %v1545_v63 = vadd.f32 %v2145_v34, %v1384_v60  ;;  %1611 = vst [vmem:[%s2702_s12 + $0xe0] sm:$0xff] %v1579_v11  ;;  %v1387_v36 = vadd.f32 %v2074_v1, %v1226_v33  ;;  %v1580_v32 = vmax.f32 %v1540_v9, 0.0 }
 0x19a   : > { %v1581_v43 = vmax.f32 %v1545_v63, 0.0  ;;  %v1548_v2 = vadd.f32 %v2146_v40, %v1387_v36  ;;  %1612 = vst [vmem:[%s2702_s12 + $0xe8] sm:$0xff] %v1580_v32 }
 0x19c   : > { %1613 = vst [vmem:[%s2702_s12 + $0xf0] sm:$0xff] %v1581_v43  ;;  %v1582_v45 = vmax.f32 %v1548_v2, 0.0 }
 0x19e   : > { %1614 = vst [vmem:[%s2702_s12 + $0xf8] sm:$0xff] %v1582_v45 }
 0x19f PF: > { %s13_s14 = sadd.s32 1, %s2362_s14   ;;  %s2809_s12 = smov %s2358_s13 }
 0x1a0   : > { %p10_p5 = scmp.ge.s32.totalorder %s13_s14, 4   ;;  %s2810_s13 = smov %s2812_s15 }
 0x1a2   :  { %12 = sbr.rel (!%p10_p5) target bundleno = 2 (0x2), region = 68 }

// kernel: _forward.10
= control target key start
LH: loop header
LB: loop body
LE: loop exit
PB: predicated region body
PF: predicated region fallthrough
CT: control target
= control target key end

     0   :  { %s1679_s12 = smov 0   ;;  %s1681_s13 = smov 0   ;;  %s1939_s0 = inlined_call_operand.vmem [shape: bf16[2048,384], index: 0, kind: input, shape index: {}]   ;;  %s1940_s1 = inlined_call_operand.vmem [shape: bf16[384,128], index: 1, kind: input, shape index: {}]   ;;  %s1941_s2 = inlined_call_operand.vmem [shape: f32[1,128], index: 2, kind: input, shape index: {}]   ;;  %s1942_s3 = inlined_call_operand.vmem [shape: f32[2048,128], index: 3, kind: output, shape index: {}]  }
   0x1   :  { %s1683_s14 = smov 0  }
   0x2 LB: > { %s25_s15 = sadd.s32 1, %s1653_s13  ;;  %p1242_p0 = scmp.ge.s32.totalorder %s1657_s14, 1  ;;  %s1657_s14 = sphi %s1683_s14, %s13_s14   ;;  %s1653_s13 = sphi %s1681_s13, %s1944_s13   ;;  %s1649_s12 = sphi %s1679_s12, %s1943_s12  }
   0x3   : > { %p27_p1 = scmp.ge.s32.totalorder %s25_s15, 8  ;;  %p170_p2 = scmp.lt.s32.totalorder %s1657_s14, 9 }
   0x5   : > { %s1946_s15 = smov (%p27_p1, %s25_s15), 0  ;;  %p171_p3 = pnand %p1242_p0, %p170_p2 }
   0x6   : > { %v1547_v0 = vld [vmem:[%s1940_s1 + $0x40] sm:$0xff] (!%p171_p3)   ;;  %s1243_s18 = sshll.u32 (!%p171_p3), %s1649_s12, 5  ;;  %v1549_v2 = vld [vmem:[%s1940_s1 + $0x48] sm:$0xff] (!%p171_p3)   ;;  %v1551_v4 = vld [vmem:[%s1940_s1 + $0x50] sm:$0xff] (!%p171_p3)  }
   0x7   : > { %174 = sbr.rel (%p171_p3) target bundleno = 351 (0x15f), region = 32  ;;  %v1548_v1 = vld [vmem:[%s1940_s1] sm:$0xff] (!%p171_p3)   ;;  %1322 = vmatprep.subr.bf16.mxu0 (!%p171_p3), %v1547_v0  ;;  %1506 = vmatprep.subr.bf16.mxu1 (!%p171_p3), %v1547_v0  ;;  %p206_p4 = scmp.lt.s32.totalorder (!%p171_p3), %s1243_s18, 255  ;;  %v1550_v3 = vld [vmem:[%s1940_s1 + $0x8] sm:$0xff] (!%p171_p3)   ;;  %v1552_v5 = vld [vmem:[%s1940_s1 + $0x10] sm:$0xff] (!%p171_p3)  }
   0x8   : > { %1323 = vmatpush3.bf16.msra.mxu0 (!%p171_p3), %v1548_v1  ;;  %1514 = vmatpush3.bf16.msra.mxu1 (!%p171_p3), %v1548_v1  ;;  %v1553_v6 = vld [vmem:[%s1940_s1 + $0x58] sm:$0xff] (!%p171_p3)   ;;  %v1555_v8 = vld [vmem:[%s1940_s1 + $0x60] sm:$0xff] (!%p171_p3)   ;;  %v1557_v10 = vld [vmem:[%s1940_s1 + $0x68] sm:$0xff] (!%p171_p3)  }
   0x9   : > { %1324 = vmatprep.subr.bf16.mxu0 (!%p171_p3), %v1549_v2  ;;  %1507 = vmatprep.subr.bf16.mxu1 (!%p171_p3), %v1549_v2  ;;  %v1554_v7 = vld [vmem:[%s1940_s1 + $0x18] sm:$0xff] (!%p171_p3)   ;;  %v1556_v9 = vld [vmem:[%s1940_s1 + $0x20] sm:$0xff] (!%p171_p3)   ;;  %v1558_v13 = vld [vmem:[%s1940_s1 + $0x28] sm:$0xff] (!%p171_p3)  }
   0xa   : > { %v1559_v14 = vld [vmem:[%s1940_s1 + $0x70] sm:$0xff] (!%p171_p3)   ;;  %v1561_v16 = vld [vmem:[%s1940_s1 + $0x78] sm:$0xff] (!%p171_p3)   ;;  %v1569_v18 = vld [vmem:[%s1940_s1 + $0x80] sm:$0xff] (!%p171_p3)  }
   0xb   : > { %v1560_v15 = vld [vmem:[%s1940_s1 + $0x30] sm:$0xff] (!%p171_p3)   ;;  %v1562_v17 = vld [vmem:[%s1940_s1 + $0x38] sm:$0xff] (!%p171_p3)   ;;  %v1570_v22 = vld [vmem:[%s1940_s1 + $0x88] sm:$0xff] (!%p171_p3)  }
   0xc   : > { %1325 = vmatpush3.bf16.msra.mxu0 (!%p171_p3), %v1550_v3  ;;  %1515 = vmatpush3.bf16.msra.mxu1 (!%p171_p3), %v1550_v3  ;;  %v1577_v25 = vld [vmem:[%s1940_s1 + $0x90] sm:$0xff] (!%p171_p3)   ;;  %v1578_v27 = vld [vmem:[%s1940_s1 + $0x98] sm:$0xff] (!%p171_p3)   ;;  %v1585_v30 = vld [vmem:[%s1940_s1 + $0xa0] sm:$0xff] (!%p171_p3)  }
   0xd   : > { %1326 = vmatprep.subr.bf16.mxu0 (!%p171_p3), %v1551_v4  ;;  %1508 = vmatprep.subr.bf16.mxu1 (!%p171_p3), %v1551_v4  ;;  %v1586_v33 = vld [vmem:[%s1940_s1 + $0xa8] sm:$0xff] (!%p171_p3)   ;;  %v1593_v36 = vld [vmem:[%s1940_s1 + $0xb0] sm:$0xff] (!%p171_p3)   ;;  %v1594_v40 = vld [vmem:[%s1940_s1 + $0xb8] sm:$0xff] (!%p171_p3)  }
   0xe   : > { %s1948_s18 = smov (!%p206_p4, %s1243_s18), 255 }
   0xf   : > { %s1522_s4 = smul.u32 12, %s1948_s18  ;;  %s1246_s25 = sshll.u32 %s1948_s18, 3 }
  0x10   : > { %1327 = vmatpush3.bf16.msra.mxu0 %v1552_v5  ;;  %1516 = vmatpush3.bf16.msra.mxu1 %v1552_v5  ;;  %s1853_s28 = scalar_lea.vmem %s1942_s3, %s1246_s25 }
  0x11   : > { %1328 = vmatprep.subr.bf16.mxu0 %v1553_v6  ;;  %1509 = vmatprep.subr.bf16.mxu1 %v1553_v6  ;;  %s1730_s11 = scalar_lea.vmem %s1939_s0, %s1522_s4 }
  0x12   : > { %v1565_v11 = vld [vmem:[%s1730_s11 + $0x4] ss:$12 sps:$4 sm:$0xff]   ;;  %v1563_v19 = vld [vmem:[%s1730_s11] ss:$12 sps:$4 sm:$0xff]   ;;  %v1571_v21 = vld [vmem:[%s1730_s11 + $0x1c] ss:$12 sps:$4 sm:$0xff]  }
  0x13   : > { %v1568_v12 = vld [vmem:[%s1730_s11 + $0x124] ss:$12 sps:$4 sm:$0xff]   ;;  %780 = vmatprep.mubr.bf16.mxu0 %v1565_v11  ;;  %v1566_v20 = vld [vmem:[%s1730_s11 + $0x120] ss:$12 sps:$4 sm:$0xff]   ;;  %v1573_v23 = vld [vmem:[%s1730_s11 + $0x13c] ss:$12 sps:$4 sm:$0xff]  }
  0x14   : > { %1329 = vmatpush3.bf16.msra.mxu0 %v1554_v7  ;;  %1517 = vmatpush3.bf16.msra.mxu1 %v1554_v7  ;;  %v1575_v24 = vld [vmem:[%s1730_s11 + $0x18] ss:$12 sps:$4 sm:$0xff]   ;;  %v1579_v28 = vld [vmem:[%s1730_s11 + $0x34] ss:$12 sps:$4 sm:$0xff]   ;;  %v1583_v31 = vld [vmem:[%s1730_s11 + $0x30] ss:$12 sps:$4 sm:$0xff]  }
  0x15   : > { %1330 = vmatprep.subr.bf16.mxu0 %v1555_v8  ;;  %1510 = vmatprep.subr.bf16.mxu1 %v1555_v8  ;;  %v1576_v26 = vld [vmem:[%s1730_s11 + $0x138] ss:$12 sps:$4 sm:$0xff]   ;;  %v1581_v29 = vld [vmem:[%s1730_s11 + $0x154] ss:$12 sps:$4 sm:$0xff]   ;;  %v1584_v32 = vld [vmem:[%s1730_s11 + $0x150] ss:$12 sps:$4 sm:$0xff]  }
  0x16   : > { %876 = vmatprep.mubr.bf16.mxu1 %v1568_v12  ;;  %v1587_v34 = vld [vmem:[%s1730_s11 + $0x4c] ss:$12 sps:$4 sm:$0xff]   ;;  %v1591_v37 = vld [vmem:[%s1730_s11 + $0x48] ss:$12 sps:$4 sm:$0xff]   ;;  %v1595_v39 = vld [vmem:[%s1730_s11 + $0x64] ss:$12 sps:$4 sm:$0xff]  }
  0x17   : > { %v1589_v35 = vld [vmem:[%s1730_s11 + $0x16c] ss:$12 sps:$4 sm:$0xff]   ;;  %v1592_v38 = vld [vmem:[%s1730_s11 + $0x168] ss:$12 sps:$4 sm:$0xff]   ;;  %v1604_v47 = vld [vmem:[%s1730_s11 + $0x50] ss:$12 sps:$4 sm:$0xff]  }
  0x18   : > { %1331 = vmatpush3.bf16.msra.mxu0 %v1556_v9  ;;  %1518 = vmatpush3.bf16.msra.mxu1 %v1556_v9  ;;  %v1597_v41 = vld [vmem:[%s1730_s11 + $0x8] ss:$12 sps:$4 sm:$0xff]   ;;  %v1598_v42 = vld [vmem:[%s1730_s11 + $0x60] ss:$12 sps:$4 sm:$0xff]   ;;  %v1602_v45 = vld [vmem:[%s1730_s11 + $0x38] ss:$12 sps:$4 sm:$0xff]  }
  0x19   : > { %1332 = vmatprep.subr.bf16.mxu0 %v1557_v10  ;;  %1511 = vmatprep.subr.bf16.mxu1 %v1557_v10  ;;  %v1599_v43 = vld [vmem:[%s1730_s11 + $0x20] ss:$12 sps:$4 sm:$0xff]   ;;  %v1600_v44 = vld [vmem:[%s1730_s11 + $0x7c] ss:$12 sps:$4 sm:$0xff]   ;;  %v1603_v46 = vld [vmem:[%s1730_s11 + $0x78] ss:$12 sps:$4 sm:$0xff]  }
  0x1a   : > { %v1605_v48 = vld [vmem:[%s1730_s11 + $0x94] ss:$12 sps:$4 sm:$0xff]   ;;  %v1608_v50 = vld [vmem:[%s1730_s11 + $0x90] ss:$12 sps:$4 sm:$0xff]   ;;  %v1610_v52 = vld [vmem:[%s1730_s11 + $0xac] ss:$12 sps:$4 sm:$0xff]  }
  0x1b   : > { %v1607_v49 = vld [vmem:[%s1730_s11 + $0x68] ss:$12 sps:$4 sm:$0xff]   ;;  %v1609_v51 = vld [vmem:[%s1730_s11 + $0x80] ss:$12 sps:$4 sm:$0xff]   ;;  %v1612_v53 = vld [vmem:[%s1730_s11 + $0x98] ss:$12 sps:$4 sm:$0xff]  }
  0x1c   : > { %1333 = vmatpush3.bf16.msra.mxu0 %v1558_v13  ;;  %1519 = vmatpush3.bf16.msra.mxu1 %v1558_v13  ;;  %v1613_v54 = vld [vmem:[%s1730_s11 + $0xa8] ss:$12 sps:$4 sm:$0xff]   ;;  %v1614_v55 = vld [vmem:[%s1730_s11 + $0xb0] ss:$12 sps:$4 sm:$0xff]   ;;  %v1618_v58 = vld [vmem:[%s1730_s11 + $0xc0] ss:$12 sps:$4 sm:$0xff]  }
  0x1d   : > { %1334 = vmatprep.subr.bf16.mxu0 %v1559_v14  ;;  %1512 = vmatprep.subr.bf16.mxu1 %v1559_v14  ;;  %v1615_v56 = vld [vmem:[%s1730_s11 + $0xc4] ss:$12 sps:$4 sm:$0xff]   ;;  %v1617_v57 = vld [vmem:[%s1730_s11 + $0xc8] ss:$12 sps:$4 sm:$0xff]   ;;  %v1619_v59 = vld [vmem:[%s1730_s11 + $0xe0] ss:$12 sps:$4 sm:$0xff]  }
  0x1e   : > { %v1620_v60 = vld [vmem:[%s1730_s11 + $0xdc] ss:$12 sps:$4 sm:$0xff]   ;;  %v1622_v61 = vld [vmem:[%s1730_s11 + $0xf8] ss:$12 sps:$4 sm:$0xff]   ;;  %v1625_v0 = vld [vmem:[%s1730_s11 + $0xf4] ss:$12 sps:$4 sm:$0xff]  }
  0x1f   : > { %v1623_v62 = vld [vmem:[%s1730_s11 + $0xd8] ss:$12 sps:$4 sm:$0xff]   ;;  %v1624_v63 = vld [vmem:[%s1730_s11 + $0x110] ss:$12 sps:$4 sm:$0xff]   ;;  %v1627_v1 = vld [vmem:[%s1730_s11 + $0x128] ss:$12 sps:$4 sm:$0xff]  }
  0x20   : > { %1335 = vmatpush3.bf16.msra.mxu0 %v1560_v15  ;;  %1520 = vmatpush3.bf16.msra.mxu1 %v1560_v15  ;;  %v1628_v2 = vld [vmem:[%s1730_s11 + $0xf0] ss:$12 sps:$4 sm:$0xff]   ;;  %v1629_v3 = vld [vmem:[%s1730_s11 + $0x140] ss:$12 sps:$4 sm:$0xff]   ;;  %v1632_v5 = vld [vmem:[%s1730_s11 + $0x158] ss:$12 sps:$4 sm:$0xff]  }
  0x21   : > { %1336 = vmatprep.subr.bf16.mxu0 %v1561_v16  ;;  %1513 = vmatprep.subr.bf16.mxu1 %v1561_v16  ;;  %v1630_v4 = vld [vmem:[%s1730_s11 + $0x10c] ss:$12 sps:$4 sm:$0xff]   ;;  %v1633_v6 = vld [vmem:[%s1730_s11 + $0x108] ss:$12 sps:$4 sm:$0xff]   ;;  %v1634_v7 = vld [vmem:[%s1730_s11 + $0x170] ss:$12 sps:$4 sm:$0xff]  }
  0x24   : > { %1337 = vmatpush3.bf16.msra.mxu0 %v1562_v17  ;;  %1521 = vmatpush3.bf16.msra.mxu1 %v1562_v17 }
  0x25   : > { %1458 = vmatprep.subr.bf16.mxu1 %v1569_v18 }
  0x27   : > { %781 = vmatmul.mubr.bf16.vlgmr.msra.gmra.mrb[0].mxu0 %v1563_v19  ;;  %877 = vmatmul.mubr.bf16.vlgmr.msra.gmra.mrb[0].mxu1 %v1566_v20 }
  0x28   : > { %1459 = vmatpush3.bf16.msra.mxu1 %v1569_v18  ;;  %788 = vmatprep.mubr.bf16.mxu0 %v1571_v21 }
  0x29   : > { %1460 = vmatprep.subr.bf16.mxu1 %v1570_v22  ;;  %884 = vmatprep.mubr.bf16.mxu1 %v1573_v23 }
  0x2c   : > { %1461 = vmatpush3.bf16.msra.mxu1 %v1570_v22 }
  0x2d   : > { %1462 = vmatprep.subr.bf16.mxu1 %v1577_v25 }
  0x2f   : > { %789 = vmatmul.mubr.bf16.gmra.mrb[4].mxu0 %v1575_v24  ;;  %885 = vmatmul.mubr.bf16.gmra.mrb[4].mxu1 %v1576_v26 }
  0x30   : > { %1463 = vmatpush3.bf16.msra.mxu1 %v1577_v25  ;;  %796 = vmatprep.mubr.bf16.mxu0 %v1579_v28 }
  0x31   : > { %1464 = vmatprep.subr.bf16.mxu1 %v1578_v27  ;;  %892 = vmatprep.mubr.bf16.mxu1 %v1581_v29 }
  0x34   : > { %1465 = vmatpush3.bf16.msra.mxu1 %v1578_v27 }
  0x35   : > { %1466 = vmatprep.subr.bf16.mxu1 %v1585_v30 }
  0x37   : > { %797 = vmatmul.mubr.bf16.gmra.mrb[8].mxu0 %v1583_v31  ;;  %893 = vmatmul.mubr.bf16.gmra.mrb[8].mxu1 %v1584_v32 }
  0x38   : > { %1467 = vmatpush3.bf16.msra.mxu1 %v1585_v30  ;;  %804 = vmatprep.mubr.bf16.mxu0 %v1587_v34 }
  0x39   : > { %1468 = vmatprep.subr.bf16.mxu1 %v1586_v33  ;;  %900 = vmatprep.mubr.bf16.mxu1 %v1589_v35 }
  0x3c   : > { %1469 = vmatpush3.bf16.msra.mxu1 %v1586_v33 }
  0x3d   : > { %1470 = vmatprep.subr.bf16.mxu1 %v1593_v36 }
  0x3f   : > { %805 = vmatmul.mubr.bf16.gmra.mrb[12].mxu0 %v1591_v37  ;;  %901 = vmatmul.mubr.bf16.gmra.mrb[12].mxu1 %v1592_v38 }
  0x40   : > { %1471 = vmatpush3.bf16.msra.mxu1 %v1593_v36  ;;  %812 = vmatprep.mubr.bf16.mxu0 %v1595_v39 }
  0x41   : > { %1472 = vmatprep.subr.bf16.mxu1 %v1594_v40  ;;  %1474 = vmatprep.mubr.bf16.mxu1 %v1597_v41 }
  0x44   : > { %1473 = vmatpush3.bf16.msra.mxu1 %v1594_v40 }
  0x47   : > { %813 = vmatmul.mubr.bf16.gmra.mrb[16].mxu0 %v1598_v42  ;;  %1475 = vmatmul.mubr.bf16.vlgmr.msra.gmra.mrb[16].mxu1 %v1599_v43 }
  0x48   : > { %820 = vmatprep.mubr.bf16.mxu0 %v1600_v44  ;;  %1478 = vmatprep.mubr.bf16.mxu1 %v1602_v45 }
  0x4f   : > { %821 = vmatmul.mubr.bf16.gmra.mrb[20].mxu0 %v1603_v46  ;;  %1479 = vmatmul.mubr.bf16.gmra.mrb[20].mxu1 %v1604_v47 }
  0x50   : > { %828 = vmatprep.mubr.bf16.mxu0 %v1605_v48  ;;  %1482 = vmatprep.mubr.bf16.mxu1 %v1607_v49 }
  0x57   : > { %829 = vmatmul.mubr.bf16.gmra.mrb[24].mxu0 %v1608_v50  ;;  %1483 = vmatmul.mubr.bf16.gmra.mrb[24].mxu1 %v1609_v51 }
  0x58   : > { %836 = vmatprep.mubr.bf16.mxu0 %v1610_v52  ;;  %1486 = vmatprep.mubr.bf16.mxu1 %v1612_v53 }
  0x5f   : > { %837 = vmatmul.mubr.bf16.gmra.mrb[28].mxu0 %v1613_v54  ;;  %1487 = vmatmul.mubr.bf16.gmra.mrb[28].mxu1 %v1614_v55 }
  0x60   : > { %844 = vmatprep.mubr.bf16.mxu0 %v1615_v56  ;;  %1490 = vmatprep.mubr.bf16.mxu1 %v1617_v57  ;;  %v1844_v56 = vld [vmem:[%s1941_s2] ss:$0 sm:$0xff] }
  0x67   : > { %845 = vmatmul.mubr.bf16.gmra.mrb[32].mxu0 %v1618_v58  ;;  %1491 = vmatmul.mubr.bf16.gmra.mrb[32].mxu1 %v1619_v59 }
  0x68   : > { %852 = vmatprep.mubr.bf16.mxu0 %v1620_v60  ;;  %1494 = vmatprep.mubr.bf16.mxu1 %v1622_v61 }
  0x6f   : > { %853 = vmatmul.mubr.bf16.gmra.mrb[36].mxu0 %v1623_v62  ;;  %1495 = vmatmul.mubr.bf16.gmra.mrb[36].mxu1 %v1624_v63 }
  0x70   : > { %860 = vmatprep.mubr.bf16.mxu0 %v1625_v0  ;;  %1498 = vmatprep.mubr.bf16.mxu1 %v1627_v1 }
  0x77   : > { %861 = vmatmul.mubr.bf16.gmra.mrb[40].mxu0 %v1628_v2  ;;  %1499 = vmatmul.mubr.bf16.gmra.mrb[40].mxu1 %v1629_v3 }
  0x78   : > { %868 = vmatprep.mubr.bf16.mxu0 %v1630_v4  ;;  %1502 = vmatprep.mubr.bf16.mxu1 %v1632_v5 }
  0x7f   : > { %869 = vmatmul.mubr.bf16.gmra.mrb[44].mxu0 %v1633_v6  ;;  %1503 = vmatmul.mubr.bf16.gmra.mrb[44].mxu1 %v1634_v7 }
  0xfa   : > { %v1338_v8 = vpop.f32.mrb[0].mxu0  ;;  %v1410_v9 = vpop.f32.mrb[0].mxu1 }
  0xfb   : > { %v1339_v10 = vpop.f32.mrb[1].mxu0  ;;  %v1411_v11 = vpop.f32.mrb[1].mxu1 }
  0xfc   : > { %v1340_v12 = vadd.f32 %v1339_v10, %v1338_v8  ;;  %v1341_v13 = vpop.f32.mrb[2].mxu0  ;;  %v1825_v14 = vadd.f32 %v1411_v11, %v1410_v9  ;;  %v1413_v15 = vpop.f32.mrb[2].mxu1 }
  0xfd   : > { %v1342_v16 = vpop.f32.mrb[3].mxu0  ;;  %v1414_v17 = vpop.f32.mrb[3].mxu1 }
  0xfe   : > { %v1343_v18 = vadd.f32 %v1342_v16, %v1341_v13  ;;  %v1827_v19 = vadd.f32 %v1414_v17, %v1413_v15  ;;  %v783_v60 = vadd.f32 %v1340_v12, %v1844_v56 }
 0x100   : > { %v786_v5 = vadd.f32 %v1343_v18, %v1844_v56 }
 0x102   : > { %v1344_v20 = vpop.f32.mrb[4].mxu0  ;;  %v1416_v21 = vpop.f32.mrb[4].mxu1 }
 0x103   : > { %v1345_v22 = vpop.f32.mrb[5].mxu0  ;;  %v1417_v23 = vpop.f32.mrb[5].mxu1 }
 0x104   : > { %v1346_v24 = vadd.f32 %v1345_v22, %v1344_v20  ;;  %v1347_v25 = vpop.f32.mrb[6].mxu0  ;;  %v1829_v26 = vadd.f32 %v1417_v23, %v1416_v21  ;;  %v1419_v27 = vpop.f32.mrb[6].mxu1 }
 0x105   : > { %v1348_v28 = vpop.f32.mrb[7].mxu0  ;;  %v1420_v29 = vpop.f32.mrb[7].mxu1 }
 0x106   : > { %v1349_v30 = vadd.f32 %v1348_v28, %v1347_v25  ;;  %v1831_v31 = vadd.f32 %v1420_v29, %v1419_v27  ;;  %v791_v57 = vadd.f32 %v1346_v24, %v1844_v56 }
 0x108   : > { %v794_v0 = vadd.f32 %v1349_v30, %v1844_v56 }
 0x10a   : > { %v1350_v32 = vpop.f32.mrb[8].mxu0  ;;  %v1422_v33 = vpop.f32.mrb[8].mxu1 }
 0x10b   : > { %v1351_v34 = vpop.f32.mrb[9].mxu0  ;;  %v1423_v35 = vpop.f32.mrb[9].mxu1 }
 0x10c   : > { %v1352_v36 = vadd.f32 %v1351_v34, %v1350_v32  ;;  %v1353_v37 = vpop.f32.mrb[10].mxu0  ;;  %v1833_v38 = vadd.f32 %v1423_v35, %v1422_v33  ;;  %v1425_v39 = vpop.f32.mrb[10].mxu1 }
 0x10d   : > { %v1354_v40 = vpop.f32.mrb[11].mxu0  ;;  %v1426_v41 = vpop.f32.mrb[11].mxu1 }
 0x10e   : > { %v1355_v42 = vadd.f32 %v1354_v40, %v1353_v37  ;;  %v1835_v43 = vadd.f32 %v1426_v41, %v1425_v39  ;;  %v799_v21 = vadd.f32 %v1352_v36, %v1844_v56 }
 0x110   : > { %v802_v30 = vadd.f32 %v1355_v42, %v1844_v56 }
 0x112   : > { %v1356_v44 = vpop.f32.mrb[12].mxu0  ;;  %v1428_v45 = vpop.f32.mrb[12].mxu1 }
 0x113   : > { %v1357_v46 = vpop.f32.mrb[13].mxu0  ;;  %v1429_v47 = vpop.f32.mrb[13].mxu1 }
 0x114   : > { %v1358_v48 = vadd.f32 %v1357_v46, %v1356_v44  ;;  %v1359_v49 = vpop.f32.mrb[14].mxu0  ;;  %v1837_v50 = vadd.f32 %v1429_v47, %v1428_v45  ;;  %v1431_v51 = vpop.f32.mrb[14].mxu1 }
 0x115   : > { %v1360_v52 = vpop.f32.mrb[15].mxu0  ;;  %v1432_v53 = vpop.f32.mrb[15].mxu1 }
 0x116   : > { %v1361_v54 = vadd.f32 %v1360_v52, %v1359_v49  ;;  %v1839_v55 = vadd.f32 %v1432_v53, %v1431_v51  ;;  %v807_v16 = vadd.f32 %v1358_v48, %v1844_v56 }
 0x118   : > { %v810_v24 = vadd.f32 %v1361_v54, %v1844_v56 }
 0x11a   : > { %v1362_v58 = vpop.f32.mrb[16].mxu0  ;;  %v1476_v59 = vpop.f32.mrb[16].mxu1 }
 0x11b   : > { %v952_v61 = vadd.f32 %v1476_v59, %v791_v57  ;;  %v1363_v62 = vpop.f32.mrb[17].mxu0  ;;  %v943_v63 = vpop.f32.mrb[17].mxu1 }
 0x11c   : > { %v1364_v1 = vadd.f32 %v1363_v62, %v1362_v58  ;;  %v944_v2 = vadd.f32 %v943_v63, %v783_v60  ;;  %v1365_v3 = vpop.f32.mrb[18].mxu0  ;;  %v1477_v4 = vpop.f32.mrb[18].mxu1 }
 0x11d   : > { %v1072_v6 = vmax.f32 %v952_v61, 0.0  ;;  %v955_v7 = vadd.f32 %v1477_v4, %v794_v0  ;;  %v1366_v8 = vpop.f32.mrb[19].mxu0  ;;  %v946_v9 = vpop.f32.mrb[19].mxu1 }
 0x11e   : > { %v1070_v10 = vmax.f32 %v944_v2, 0.0  ;;  %v1367_v11 = vadd.f32 %v1366_v8, %v1365_v3  ;;  %v947_v12 = vadd.f32 %v946_v9, %v786_v5  ;;  %v815_v47 = vadd.f32 %v1364_v1, %v1844_v56 }
 0x11f   : > { %1104 = vst [vmem:[%s1853_s28 + $0x10] sm:$0xff] %v1072_v6  ;;  %v1073_v13 = vmax.f32 %v955_v7, 0.0 }
 0x120   : > { %1102 = vst [vmem:[%s1853_s28] sm:$0xff] %v1070_v10  ;;  %v1071_v15 = vmax.f32 %v947_v12, 0.0  ;;  %v818_v58 = vadd.f32 %v1367_v11, %v1844_v56 }
 0x121   : > { %1105 = vst [vmem:[%s1853_s28 + $0x18] sm:$0xff] %v1073_v13 }
 0x122   : > { %1103 = vst [vmem:[%s1853_s28 + $0x8] sm:$0xff] %v1071_v15  ;;  %v1368_v17 = vpop.f32.mrb[20].mxu0  ;;  %v1480_v20 = vpop.f32.mrb[20].mxu1 }
 0x123   : > { %v968_v18 = vadd.f32 %v1480_v20, %v807_v16  ;;  %v1369_v22 = vpop.f32.mrb[21].mxu0  ;;  %v959_v23 = vpop.f32.mrb[21].mxu1 }
 0x124   : > { %v1370_v25 = vadd.f32 %v1369_v22, %v1368_v17  ;;  %v960_v27 = vadd.f32 %v959_v23, %v799_v21  ;;  %v1371_v28 = vpop.f32.mrb[22].mxu0  ;;  %v1481_v29 = vpop.f32.mrb[22].mxu1 }
 0x125   : > { %v1076_v32 = vmax.f32 %v968_v18, 0.0  ;;  %v971_v33 = vadd.f32 %v1481_v29, %v810_v24  ;;  %v1372_v34 = vpop.f32.mrb[23].mxu0  ;;  %v962_v35 = vpop.f32.mrb[23].mxu1 }
 0x126   : > { %v1074_v36 = vmax.f32 %v960_v27, 0.0  ;;  %v1373_v37 = vadd.f32 %v1372_v34, %v1371_v28  ;;  %v963_v39 = vadd.f32 %v962_v35, %v802_v30  ;;  %v823_v44 = vadd.f32 %v1370_v25, %v1844_v56 }
 0x127   : > { %1108 = vst [vmem:[%s1853_s28 + $0x30] sm:$0xff] %v1076_v32  ;;  %v1077_v40 = vmax.f32 %v971_v33, 0.0 }
 0x128   : > { %1106 = vst [vmem:[%s1853_s28 + $0x20] sm:$0xff] %v1074_v36  ;;  %v1075_v41 = vmax.f32 %v963_v39, 0.0  ;;  %v826_v51 = vadd.f32 %v1373_v37, %v1844_v56 }
 0x129   : > { %1109 = vst [vmem:[%s1853_s28 + $0x38] sm:$0xff] %v1077_v40 }
 0x12a   : > { %1107 = vst [vmem:[%s1853_s28 + $0x28] sm:$0xff] %v1075_v41  ;;  %v1374_v45 = vpop.f32.mrb[24].mxu0  ;;  %v1484_v46 = vpop.f32.mrb[24].mxu1 }
 0x12b   : > { %v984_v42 = vadd.f32 %v1484_v46, %v823_v44  ;;  %v1375_v48 = vpop.f32.mrb[25].mxu0  ;;  %v975_v49 = vpop.f32.mrb[25].mxu1 }
 0x12c   : > { %v1376_v52 = vadd.f32 %v1375_v48, %v1374_v45  ;;  %v976_v53 = vadd.f32 %v975_v49, %v815_v47  ;;  %v1377_v54 = vpop.f32.mrb[26].mxu0  ;;  %v1485_v57 = vpop.f32.mrb[26].mxu1 }
 0x12d   : > { %v1080_v59 = vmax.f32 %v984_v42, 0.0  ;;  %v987_v60 = vadd.f32 %v1485_v57, %v826_v51  ;;  %v1378_v61 = vpop.f32.mrb[27].mxu0  ;;  %v978_v62 = vpop.f32.mrb[27].mxu1 }
 0x12e   : > { %v1078_v63 = vmax.f32 %v976_v53, 0.0  ;;  %v1379_v0 = vadd.f32 %v1378_v61, %v1377_v54  ;;  %v979_v1 = vadd.f32 %v978_v62, %v818_v58  ;;  %v831_v6 = vadd.f32 %v1376_v52, %v1844_v56 }
 0x12f   : > { %1112 = vst [vmem:[%s1853_s28 + $0x50] sm:$0xff] %v1080_v59  ;;  %v1081_v2 = vmax.f32 %v987_v60, 0.0 }
 0x130   : > { %1110 = vst [vmem:[%s1853_s28 + $0x40] sm:$0xff] %v1078_v63  ;;  %v1079_v3 = vmax.f32 %v979_v1, 0.0  ;;  %v834_v13 = vadd.f32 %v1379_v0, %v1844_v56  ;;  %v887_v0 = vadd.f32 %v1829_v26, %v1844_v56 }
 0x131   : > { %1113 = vst [vmem:[%s1853_s28 + $0x58] sm:$0xff] %v1081_v2 }
 0x132   : > { %1111 = vst [vmem:[%s1853_s28 + $0x48] sm:$0xff] %v1079_v3  ;;  %v1380_v4 = vpop.f32.mrb[28].mxu0  ;;  %v1488_v5 = vpop.f32.mrb[28].mxu1 }
 0x133   : > { %v1381_v7 = vpop.f32.mrb[29].mxu0  ;;  %v991_v8 = vpop.f32.mrb[29].mxu1 }
 0x134   : > { %v1382_v9 = vadd.f32 %v1381_v7, %v1380_v4  ;;  %v992_v10 = vadd.f32 %v991_v8, %v831_v6  ;;  %v1383_v11 = vpop.f32.mrb[30].mxu0  ;;  %v1489_v12 = vpop.f32.mrb[30].mxu1 }
 0x135   : > { %v1384_v15 = vpop.f32.mrb[31].mxu0  ;;  %v994_v16 = vpop.f32.mrb[31].mxu1 }
 0x136   : > { %v839_v17 = vadd.f32 %v1382_v9, %v1844_v56  ;;  %v1082_v20 = vmax.f32 %v992_v10, 0.0  ;;  %v1385_v21 = vadd.f32 %v1384_v15, %v1383_v11  ;;  %v995_v18 = vadd.f32 %v994_v16, %v834_v13 }
 0x137   : > { %v890_v9 = vadd.f32 %v1831_v31, %v1844_v56  ;;  %v882_v15 = vadd.f32 %v1827_v19, %v1844_v56 }
 0x138   : > { %v1000_v22 = vadd.f32 %v1488_v5, %v839_v17  ;;  %1114 = vst [vmem:[%s1853_s28 + $0x60] sm:$0xff] %v1082_v20  ;;  %v842_v23 = vadd.f32 %v1385_v21, %v1844_v56  ;;  %v1083_v24 = vmax.f32 %v995_v18, 0.0  ;;  %v879_v5 = vadd.f32 %v1825_v14, %v1844_v56 }
 0x13a   : > { %v1084_v25 = vmax.f32 %v1000_v22, 0.0  ;;  %v1003_v27 = vadd.f32 %v1489_v12, %v842_v23  ;;  %1115 = vst [vmem:[%s1853_s28 + $0x68] sm:$0xff] %v1083_v24  ;;  %v1386_v28 = vpop.f32.mrb[32].mxu0  ;;  %v1492_v29 = vpop.f32.mrb[32].mxu1 }
 0x13b   : > { %v1387_v30 = vpop.f32.mrb[33].mxu0  ;;  %v1007_v32 = vpop.f32.mrb[33].mxu1 }
 0x13c   : > { %1116 = vst [vmem:[%s1853_s28 + $0x70] sm:$0xff] %v1084_v25  ;;  %v1085_v33 = vmax.f32 %v1003_v27, 0.0  ;;  %v1388_v34 = vadd.f32 %v1387_v30, %v1386_v28  ;;  %v1389_v35 = vpop.f32.mrb[34].mxu0  ;;  %v1493_v36 = vpop.f32.mrb[34].mxu1  ;;  %v903_v27 = vadd.f32 %v1837_v50, %v1844_v56 }
 0x13d   : > { %v1390_v37 = vpop.f32.mrb[35].mxu0  ;;  %v1010_v39 = vpop.f32.mrb[35].mxu1 }
 0x13e   : > { %1117 = vst [vmem:[%s1853_s28 + $0x78] sm:$0xff] %v1085_v33  ;;  %v847_v40 = vadd.f32 %v1388_v34, %v1844_v56  ;;  %v1391_v41 = vadd.f32 %v1390_v37, %v1389_v35  ;;  %v895_v33 = vadd.f32 %v1833_v38, %v1844_v56  ;;  %v906_v37 = vadd.f32 %v1839_v55, %v1844_v56 }
 0x140   : > { %v1008_v44 = vadd.f32 %v1007_v32, %v847_v40  ;;  %v850_v45 = vadd.f32 %v1391_v41, %v1844_v56 }
 0x142   : > { %v1086_v46 = vmax.f32 %v1008_v44, 0.0  ;;  %v1011_v47 = vadd.f32 %v1010_v39, %v850_v45  ;;  %v1392_v42 = vpop.f32.mrb[36].mxu0  ;;  %v1886_v48 = vpop.f32.mrb[36].mxu1  ;;  %v898_v45 = vadd.f32 %v1835_v43, %v1844_v56 }
 0x143   : > { %v1393_v49 = vpop.f32.mrb[37].mxu0  ;;  %v1023_v51 = vpop.f32.mrb[37].mxu1 }
 0x144   : > { %1118 = vst [vmem:[%s1853_s28 + $0x80] sm:$0xff] %v1086_v46  ;;  %v1087_v52 = vmax.f32 %v1011_v47, 0.0  ;;  %v1394_v53 = vadd.f32 %v1393_v49, %v1392_v42  ;;  %v1395_v54 = vpop.f32.mrb[38].mxu0  ;;  %v1889_v57 = vpop.f32.mrb[38].mxu1 }
 0x145   : > { %v1396_v58 = vpop.f32.mrb[39].mxu0  ;;  %v1026_v59 = vpop.f32.mrb[39].mxu1 }
 0x146   : > { %1119 = vst [vmem:[%s1853_s28 + $0x88] sm:$0xff] %v1087_v52  ;;  %v855_v60 = vadd.f32 %v1394_v53, %v1844_v56  ;;  %v1397_v61 = vadd.f32 %v1396_v58, %v1395_v54 }
 0x148   : > { %v1016_v62 = vadd.f32 %v1492_v29, %v855_v60  ;;  %v858_v63 = vadd.f32 %v1397_v61, %v1844_v56 }
 0x14a   : > { %v1088_v1 = vmax.f32 %v1016_v62, 0.0  ;;  %v1019_v2 = vadd.f32 %v1493_v36, %v858_v63  ;;  %v1398_v3 = vpop.f32.mrb[40].mxu0  ;;  %v1500_v4 = vpop.f32.mrb[40].mxu1 }
 0x14b   : > { %v1048_v6 = vadd.f32 %v1500_v4, %v887_v0  ;;  %v1399_v7 = vpop.f32.mrb[41].mxu0  ;;  %v1039_v8 = vpop.f32.mrb[41].mxu1 }
 0x14c   : > { %1120 = vst [vmem:[%s1853_s28 + $0x90] sm:$0xff] %v1088_v1  ;;  %v1089_v10 = vmax.f32 %v1019_v2, 0.0  ;;  %v1400_v11 = vadd.f32 %v1399_v7, %v1398_v3  ;;  %v1040_v12 = vadd.f32 %v1039_v8, %v879_v5  ;;  %v1401_v26 = vpop.f32.mrb[42].mxu0  ;;  %v1501_v13 = vpop.f32.mrb[42].mxu1 }
 0x14d   : > { %v1096_v14 = vmax.f32 %v1048_v6, 0.0  ;;  %v1051_v16 = vadd.f32 %v1501_v13, %v890_v9  ;;  %v1402_v17 = vpop.f32.mrb[43].mxu0  ;;  %v1042_v20 = vpop.f32.mrb[43].mxu1 }
 0x14e   : > { %1121 = vst [vmem:[%s1853_s28 + $0x98] sm:$0xff] %v1089_v10  ;;  %v863_v31 = vadd.f32 %v1400_v11, %v1844_v56  ;;  %v1094_v21 = vmax.f32 %v1040_v12, 0.0  ;;  %v1403_v18 = vadd.f32 %v1402_v17, %v1401_v26  ;;  %v1043_v22 = vadd.f32 %v1042_v20, %v882_v15 }
 0x14f   : > { %1128 = vst [vmem:[%s1853_s28 + $0xd0] sm:$0xff] %v1096_v14  ;;  %v1097_v23 = vmax.f32 %v1051_v16, 0.0 }
 0x150   : > { %v1024_v24 = vadd.f32 %v1023_v51, %v863_v31  ;;  %1126 = vst [vmem:[%s1853_s28 + $0xc0] sm:$0xff] %v1094_v21  ;;  %v866_v25 = vadd.f32 %v1403_v18, %v1844_v56  ;;  %v1095_v19 = vmax.f32 %v1043_v22, 0.0 }
 0x151   : > { %1129 = vst [vmem:[%s1853_s28 + $0xd8] sm:$0xff] %v1097_v23 }
 0x152   : > { %v1090_v28 = vmax.f32 %v1024_v24, 0.0  ;;  %v1027_v29 = vadd.f32 %v1026_v59, %v866_v25  ;;  %1127 = vst [vmem:[%s1853_s28 + $0xc8] sm:$0xff] %v1095_v19  ;;  %v1404_v30 = vpop.f32.mrb[44].mxu0  ;;  %v1504_v32 = vpop.f32.mrb[44].mxu1 }
 0x153   : > { %v1064_v34 = vadd.f32 %v1504_v32, %v903_v27  ;;  %v1405_v35 = vpop.f32.mrb[45].mxu0  ;;  %v1055_v36 = vpop.f32.mrb[45].mxu1 }
 0x154   : > { %1122 = vst [vmem:[%s1853_s28 + $0xa0] sm:$0xff] %v1090_v28  ;;  %v1091_v39 = vmax.f32 %v1027_v29, 0.0  ;;  %v1406_v40 = vadd.f32 %v1405_v35, %v1404_v30  ;;  %v1056_v50 = vadd.f32 %v1055_v36, %v895_v33  ;;  %v1407_v41 = vpop.f32.mrb[46].mxu0  ;;  %v1505_v44 = vpop.f32.mrb[46].mxu1 }
 0x155   : > { %v1100_v38 = vmax.f32 %v1064_v34, 0.0  ;;  %v1067_v46 = vadd.f32 %v1505_v44, %v906_v37  ;;  %v1408_v47 = vpop.f32.mrb[47].mxu0  ;;  %v1058_v42 = vpop.f32.mrb[47].mxu1 }
 0x156   : > { %1123 = vst [vmem:[%s1853_s28 + $0xa8] sm:$0xff] %v1091_v39  ;;  %v871_v55 = vadd.f32 %v1406_v40, %v1844_v56  ;;  %v1098_v49 = vmax.f32 %v1056_v50, 0.0  ;;  %v1409_v51 = vadd.f32 %v1408_v47, %v1407_v41  ;;  %v1059_v52 = vadd.f32 %v1058_v42, %v898_v45 }
 0x157   : > { %1132 = vst [vmem:[%s1853_s28 + $0xf0] sm:$0xff] %v1100_v38  ;;  %v1101_v53 = vmax.f32 %v1067_v46, 0.0 }
 0x158   : > { %v1032_v54 = vadd.f32 %v1886_v48, %v871_v55  ;;  %1130 = vst [vmem:[%s1853_s28 + $0xe0] sm:$0xff] %v1098_v49  ;;  %v874_v43 = vadd.f32 %v1409_v51, %v1844_v56  ;;  %v1099_v58 = vmax.f32 %v1059_v52, 0.0 }
 0x159   : > { %1133 = vst [vmem:[%s1853_s28 + $0xf8] sm:$0xff] %v1101_v53 }
 0x15a   : > { %v1092_v59 = vmax.f32 %v1032_v54, 0.0  ;;  %v1035_v60 = vadd.f32 %v1889_v57, %v874_v43  ;;  %1131 = vst [vmem:[%s1853_s28 + $0xe8] sm:$0xff] %v1099_v58 }
 0x15c   : > { %1124 = vst [vmem:[%s1853_s28 + $0xb0] sm:$0xff] %v1092_v59  ;;  %v1093_v61 = vmax.f32 %v1035_v60, 0.0 }
 0x15e   : > { %1125 = vst [vmem:[%s1853_s28 + $0xb8] sm:$0xff] %v1093_v61 }
 0x15f PF: > { %s13_s14 = sadd.s32 1, %s1657_s14   ;;  %s1943_s12 = smov %s1653_s13 }
 0x160   : > { %p10_p5 = scmp.ge.s32.totalorder %s13_s14, 10   ;;  %s1944_s13 = smov %s1946_s15 }
 0x162   :  { %12 = sbr.rel (!%p10_p5) target bundleno = 2 (0x2), region = 68 }

// kernel: _forward.11
= control target key start
LH: loop header
LB: loop body
LE: loop exit
PB: predicated region body
PF: predicated region fallthrough
CT: control target
= control target key end

     0   :  { %s2384_s12 = smov 0   ;;  %s2386_s13 = smov 0   ;;  %s2805_s0 = inlined_call_operand.vmem [shape: bf16[2048,640], index: 0, kind: input, shape index: {}]   ;;  %s2806_s1 = inlined_call_operand.vmem [shape: bf16[640,128], index: 1, kind: input, shape index: {}]   ;;  %s2807_s2 = inlined_call_operand.vmem [shape: f32[1,128], index: 2, kind: input, shape index: {}]   ;;  %s2808_s3 = inlined_call_operand.vmem [shape: f32[2048,128], index: 3, kind: output, shape index: {}]  }
   0x1   :  { %s2388_s14 = smov 0  }
   0x2 LB: > { %s25_s15 = sadd.s32 1, %s2358_s13  ;;  %p1723_p0 = scmp.ge.s32.totalorder %s2362_s14, 1  ;;  %s2362_s14 = sphi %s2388_s14, %s13_s14   ;;  %s2358_s13 = sphi %s2386_s13, %s2810_s13   ;;  %s2354_s12 = sphi %s2384_s12, %s2809_s12  }
   0x3   : > { %p27_p1 = scmp.ge.s32.totalorder %s25_s15, 8  ;;  %p170_p2 = scmp.lt.s32.totalorder %s2362_s14, 9 }
   0x5   : > { %s2812_s15 = smov (%p27_p1, %s25_s15), 0  ;;  %p171_p3 = pnand %p1723_p0, %p170_p2 }
   0x6   : > { %v2188_v0 = vld [vmem:[%s2806_s1 + $0x40] sm:$0xff] (!%p171_p3)   ;;  %s1724_s18 = sshll.u32 (!%p171_p3), %s2354_s12, 5  ;;  %v2190_v2 = vld [vmem:[%s2806_s1 + $0x48] sm:$0xff] (!%p171_p3)   ;;  %v2192_v4 = vld [vmem:[%s2806_s1 + $0x50] sm:$0xff] (!%p171_p3)  }
   0x7   : > { %174 = sbr.rel (%p171_p3) target bundleno = 415 (0x19f), region = 32  ;;  %v2189_v1 = vld [vmem:[%s2806_s1] sm:$0xff] (!%p171_p3)   ;;  %1851 = vmatprep.subr.bf16.mxu0 (!%p171_p3), %v2188_v0  ;;  %2147 = vmatprep.subr.bf16.mxu1 (!%p171_p3), %v2188_v0  ;;  %p206_p4 = scmp.lt.s32.totalorder (!%p171_p3), %s1724_s18, 255  ;;  %v2191_v3 = vld [vmem:[%s2806_s1 + $0x8] sm:$0xff] (!%p171_p3)   ;;  %v2193_v5 = vld [vmem:[%s2806_s1 + $0x10] sm:$0xff] (!%p171_p3)  }
   0x8   : > { %1852 = vmatpush3.bf16.msra.mxu0 (!%p171_p3), %v2189_v1  ;;  %2155 = vmatpush3.bf16.msra.mxu1 (!%p171_p3), %v2189_v1  ;;  %v2194_v6 = vld [vmem:[%s2806_s1 + $0x58] sm:$0xff] (!%p171_p3)   ;;  %v2196_v8 = vld [vmem:[%s2806_s1 + $0x60] sm:$0xff] (!%p171_p3)   ;;  %v2198_v10 = vld [vmem:[%s2806_s1 + $0x68] sm:$0xff] (!%p171_p3)  }
   0x9   : > { %1853 = vmatprep.subr.bf16.mxu0 (!%p171_p3), %v2190_v2  ;;  %2148 = vmatprep.subr.bf16.mxu1 (!%p171_p3), %v2190_v2  ;;  %v2195_v7 = vld [vmem:[%s2806_s1 + $0x18] sm:$0xff] (!%p171_p3)   ;;  %v2197_v9 = vld [vmem:[%s2806_s1 + $0x20] sm:$0xff] (!%p171_p3)   ;;  %v2199_v13 = vld [vmem:[%s2806_s1 + $0x28] sm:$0xff] (!%p171_p3)  }
   0xa   : > { %v2200_v14 = vld [vmem:[%s2806_s1 + $0x70] sm:$0xff] (!%p171_p3)   ;;  %v2202_v16 = vld [vmem:[%s2806_s1 + $0x78] sm:$0xff] (!%p171_p3)   ;;  %v2210_v18 = vld [vmem:[%s2806_s1 + $0xc0] sm:$0xff] (!%p171_p3)  }
   0xb   : > { %v2201_v15 = vld [vmem:[%s2806_s1 + $0x30] sm:$0xff] (!%p171_p3)   ;;  %v2203_v17 = vld [vmem:[%s2806_s1 + $0x38] sm:$0xff] (!%p171_p3)   ;;  %v2213_v19 = vld [vmem:[%s2806_s1 + $0x100] sm:$0xff] (!%p171_p3)  }
   0xc   : > { %1854 = vmatpush3.bf16.msra.mxu0 (!%p171_p3), %v2191_v3  ;;  %2156 = vmatpush3.bf16.msra.mxu1 (!%p171_p3), %v2191_v3  ;;  %v2211_v22 = vld [vmem:[%s2806_s1 + $0x80] sm:$0xff] (!%p171_p3)   ;;  %v2212_v23 = vld [vmem:[%s2806_s1 + $0xc8] sm:$0xff] (!%p171_p3)   ;;  %v2221_v29 = vld [vmem:[%s2806_s1 + $0xd0] sm:$0xff] (!%p171_p3)  }
   0xd   : > { %1855 = vmatprep.subr.bf16.mxu0 (!%p171_p3), %v2192_v4  ;;  %2149 = vmatprep.subr.bf16.mxu1 (!%p171_p3), %v2192_v4  ;;  %v2232_v26 = vld [vmem:[%s2806_s1 + $0x108] sm:$0xff] (!%p171_p3)   ;;  %v2222_v31 = vld [vmem:[%s2806_s1 + $0x90] sm:$0xff] (!%p171_p3)   ;;  %v2223_v33 = vld [vmem:[%s2806_s1 + $0xd8] sm:$0xff] (!%p171_p3)  }
   0xe   : > { %s2814_s18 = smov (!%p206_p4, %s1724_s18), 255  ;;  %v2214_v27 = vld [vmem:[%s2806_s1 + $0x88] sm:$0xff]   ;;  %v2224_v35 = vld [vmem:[%s2806_s1 + $0x98] sm:$0xff]   ;;  %v2231_v36 = vld [vmem:[%s2806_s1 + $0xe0] sm:$0xff]  }
   0xf   : > { %s2163_s4 = smul.u32 20, %s2814_s18  ;;  %v2245_v38 = vld [vmem:[%s2806_s1 + $0x110] sm:$0xff]   ;;  %v2233_v40 = vld [vmem:[%s2806_s1 + $0xa0] sm:$0xff]   ;;  %v2234_v41 = vld [vmem:[%s2806_s1 + $0xe8] sm:$0xff]   ;;  %s1727_s8 = sshll.u32 %s2814_s18, 3 }
  0x10   : > { %1856 = vmatpush3.bf16.msra.mxu0 %v2193_v5  ;;  %2157 = vmatpush3.bf16.msra.mxu1 %v2193_v5  ;;  %v2235_v44 = vld [vmem:[%s2806_s1 + $0xa8] sm:$0xff]   ;;  %v2259_v45 = vld [vmem:[%s2806_s1 + $0x118] sm:$0xff]   ;;  %v2242_v48 = vld [vmem:[%s2806_s1 + $0xf0] sm:$0xff]   ;;  %s2702_s12 = scalar_lea.vmem %s2808_s3, %s1727_s8 }
  0x11   : > { %1857 = vmatprep.subr.bf16.mxu0 %v2194_v6  ;;  %2150 = vmatprep.subr.bf16.mxu1 %v2194_v6  ;;  %s2435_s11 = scalar_lea.vmem %s2805_s0, %s2163_s4  ;;  %v2243_v49 = vld [vmem:[%s2806_s1 + $0xb0] sm:$0xff]   ;;  %v2244_v50 = vld [vmem:[%s2806_s1 + $0xf8] sm:$0xff]   ;;  %v2266_v52 = vld [vmem:[%s2806_s1 + $0x120] sm:$0xff]  }
  0x12   : > { %v2206_v11 = vld [vmem:[%s2435_s11 + $0x4] ss:$20 sps:$4 sm:$0xff]   ;;  %v2204_v20 = vld [vmem:[%s2435_s11] ss:$20 sps:$4 sm:$0xff]   ;;  %v2219_v28 = vld [vmem:[%s2435_s11 + $0x28] ss:$20 sps:$4 sm:$0xff]  }
  0x13   : > { %v2209_v12 = vld [vmem:[%s2435_s11 + $0x1e4] ss:$20 sps:$4 sm:$0xff]   ;;  %1100 = vmatprep.mubr.bf16.mxu0 %v2206_v11  ;;  %v2207_v21 = vld [vmem:[%s2435_s11 + $0x1e0] ss:$20 sps:$4 sm:$0xff]   ;;  %v2220_v30 = vld [vmem:[%s2435_s11 + $0x208] ss:$20 sps:$4 sm:$0xff]  }
  0x14   : > { %1858 = vmatpush3.bf16.msra.mxu0 %v2195_v7  ;;  %2158 = vmatpush3.bf16.msra.mxu1 %v2195_v7  ;;  %v2215_v24 = vld [vmem:[%s2435_s11 + $0x2c] ss:$20 sps:$4 sm:$0xff]   ;;  %v2225_v32 = vld [vmem:[%s2435_s11 + $0x54] ss:$20 sps:$4 sm:$0xff]   ;;  %v2229_v37 = vld [vmem:[%s2435_s11 + $0x50] ss:$20 sps:$4 sm:$0xff]  }
  0x15   : > { %1859 = vmatprep.subr.bf16.mxu0 %v2196_v8  ;;  %2151 = vmatprep.subr.bf16.mxu1 %v2196_v8  ;;  %v2217_v25 = vld [vmem:[%s2435_s11 + $0x20c] ss:$20 sps:$4 sm:$0xff]   ;;  %v2227_v34 = vld [vmem:[%s2435_s11 + $0x234] ss:$20 sps:$4 sm:$0xff]   ;;  %v2230_v39 = vld [vmem:[%s2435_s11 + $0x230] ss:$20 sps:$4 sm:$0xff]  }
  0x16   : > { %1196 = vmatprep.mubr.bf16.mxu1 %v2209_v12  ;;  %v2236_v42 = vld [vmem:[%s2435_s11 + $0x7c] ss:$20 sps:$4 sm:$0xff]   ;;  %v2240_v46 = vld [vmem:[%s2435_s11 + $0x78] ss:$20 sps:$4 sm:$0xff]   ;;  %v2252_v56 = vld [vmem:[%s2435_s11 + $0xa0] ss:$20 sps:$4 sm:$0xff]  }
  0x17   : > { %v2238_v43 = vld [vmem:[%s2435_s11 + $0x25c] ss:$20 sps:$4 sm:$0xff]   ;;  %v2241_v47 = vld [vmem:[%s2435_s11 + $0x258] ss:$20 sps:$4 sm:$0xff]   ;;  %v2255_v59 = vld [vmem:[%s2435_s11 + $0x34] ss:$20 sps:$4 sm:$0xff]  }
  0x18   : > { %1860 = vmatpush3.bf16.msra.mxu0 %v2197_v9  ;;  %2159 = vmatpush3.bf16.msra.mxu1 %v2197_v9  ;;  %v2247_v51 = vld [vmem:[%s2435_s11 + $0xa4] ss:$20 sps:$4 sm:$0xff]   ;;  %v2251_v53 = vld [vmem:[%s2435_s11 + $0xc] ss:$20 sps:$4 sm:$0xff]   ;;  %v2249_v55 = vld [vmem:[%s2435_s11 + $0x8] ss:$20 sps:$4 sm:$0xff]  }
  0x19   : > { %1861 = vmatprep.subr.bf16.mxu0 %v2198_v10  ;;  %2152 = vmatprep.subr.bf16.mxu1 %v2198_v10  ;;  %v2246_v54 = vld [vmem:[%s2806_s1 + $0xb8] sm:$0xff]   ;;  %v2279_v57 = vld [vmem:[%s2806_s1 + $0x128] sm:$0xff]   ;;  %v2286_v60 = vld [vmem:[%s2806_s1 + $0x130] sm:$0xff]  }
  0x1a   : > { %v2253_v58 = vld [vmem:[%s2435_s11 + $0xcc] ss:$20 sps:$4 sm:$0xff]   ;;  %v2257_v61 = vld [vmem:[%s2435_s11 + $0xc8] ss:$20 sps:$4 sm:$0xff]   ;;  %v2258_v62 = vld [vmem:[%s2435_s11 + $0x30] ss:$20 sps:$4 sm:$0xff]  }
  0x1b   : > { %v2260_v63 = vld [vmem:[%s2435_s11 + $0xf4] ss:$20 sps:$4 sm:$0xff]   ;;  %v2262_v0 = vld [vmem:[%s2435_s11 + $0x5c] ss:$20 sps:$4 sm:$0xff]   ;;  %v2265_v3 = vld [vmem:[%s2435_s11 + $0x58] ss:$20 sps:$4 sm:$0xff]  }
  0x1c   : > { %1862 = vmatpush3.bf16.msra.mxu0 %v2199_v13  ;;  %2160 = vmatpush3.bf16.msra.mxu1 %v2199_v13  ;;  %v2299_v1 = vld [vmem:[%s2806_s1 + $0x138] sm:$0xff]   ;;  %v2264_v2 = vld [vmem:[%s2435_s11 + $0xf0] ss:$20 sps:$4 sm:$0xff]   ;;  %v2272_v7 = vld [vmem:[%s2435_s11 + $0x80] ss:$20 sps:$4 sm:$0xff]  }
  0x1d   : > { %1863 = vmatprep.subr.bf16.mxu0 %v2200_v14  ;;  %2153 = vmatprep.subr.bf16.mxu1 %v2200_v14  ;;  %v2267_v4 = vld [vmem:[%s2435_s11 + $0x11c] ss:$20 sps:$4 sm:$0xff]   ;;  %v2269_v5 = vld [vmem:[%s2435_s11 + $0x84] ss:$20 sps:$4 sm:$0xff]   ;;  %v2275_v9 = vld [vmem:[%s2435_s11 + $0xac] ss:$20 sps:$4 sm:$0xff]  }
  0x1e   : > { %v2271_v6 = vld [vmem:[%s2435_s11 + $0x118] ss:$20 sps:$4 sm:$0xff]   ;;  %v2277_v10 = vld [vmem:[%s2435_s11 + $0x140] ss:$20 sps:$4 sm:$0xff]   ;;  %v2278_v11 = vld [vmem:[%s2435_s11 + $0xa8] ss:$20 sps:$4 sm:$0xff]  }
  0x1f   : > { %v2273_v8 = vld [vmem:[%s2435_s11 + $0x144] ss:$20 sps:$4 sm:$0xff]   ;;  %v2280_v12 = vld [vmem:[%s2435_s11 + $0x16c] ss:$20 sps:$4 sm:$0xff]   ;;  %v2282_v13 = vld [vmem:[%s2435_s11 + $0xd4] ss:$20 sps:$4 sm:$0xff]  }
  0x20   : > { %1864 = vmatpush3.bf16.msra.mxu0 %v2201_v15  ;;  %2161 = vmatpush3.bf16.msra.mxu1 %v2201_v15  ;;  %v2284_v14 = vld [vmem:[%s2435_s11 + $0x168] ss:$20 sps:$4 sm:$0xff]   ;;  %v2285_v15 = vld [vmem:[%s2435_s11 + $0xd0] ss:$20 sps:$4 sm:$0xff]  }
  0x21   : > { %1865 = vmatprep.subr.bf16.mxu0 %v2202_v16  ;;  %2154 = vmatprep.subr.bf16.mxu1 %v2202_v16  ;;  %v2287_v16 = vld [vmem:[%s2435_s11 + $0x194] ss:$20 sps:$4 sm:$0xff]  }
  0x24   : > { %1866 = vmatpush3.bf16.msra.mxu0 %v2203_v17  ;;  %2162 = vmatpush3.bf16.msra.mxu1 %v2203_v17  ;;  %v2289_v17 = vld [vmem:[%s2435_s11 + $0xfc] ss:$20 sps:$4 sm:$0xff]  }
  0x25   : > { %1963 = vmatprep.subr.bf16.mxu1 %v2210_v18  ;;  %2099 = vmatprep.subr.bf16.mxu0 %v2213_v19  ;;  %v2291_v18 = vld [vmem:[%s2435_s11 + $0x190] ss:$20 sps:$4 sm:$0xff]  }
  0x27   : > { %1101 = vmatmul.mubr.bf16.vlgmr.msra.gmra.mrb[0].mxu0 %v2204_v20  ;;  %1197 = vmatmul.mubr.bf16.vlgmr.msra.gmra.mrb[0].mxu1 %v2207_v21  ;;  %v2293_v20 = vld [vmem:[%s2435_s11 + $0x1bc] ss:$20 sps:$4 sm:$0xff]   ;;  %v2295_v21 = vld [vmem:[%s2435_s11 + $0x124] ss:$20 sps:$4 sm:$0xff]  }
  0x28   : > { %1964 = vmatpush3.bf16.msra.mxu1 %v2211_v22  ;;  %2100 = vmatpush3.bf16.msra.mxu0 %v2213_v19  ;;  %v2292_v19 = vld [vmem:[%s2435_s11 + $0xf8] ss:$20 sps:$4 sm:$0xff]  }
  0x29   : > { %1965 = vmatprep.subr.bf16.mxu1 %v2212_v23  ;;  %1108 = vmatprep.mubr.bf16.mxu0 %v2215_v24  ;;  %v2297_v22 = vld [vmem:[%s2435_s11 + $0x1b8] ss:$20 sps:$4 sm:$0xff]   ;;  %v2298_v23 = vld [vmem:[%s2435_s11 + $0x120] ss:$20 sps:$4 sm:$0xff]  }
  0x2a   : > { %1204 = vmatprep.mubr.bf16.mxu1 %v2217_v25  ;;  %2101 = vmatprep.subr.bf16.mxu0 %v2232_v26  ;;  %v2300_v24 = vld [vmem:[%s2435_s11 + $0x14c] ss:$20 sps:$4 sm:$0xff]   ;;  %v2302_v25 = vld [vmem:[%s2435_s11 + $0x10] ss:$20 sps:$4 sm:$0xff]  }
  0x2c   : > { %1966 = vmatpush3.bf16.msra.mxu1 %v2214_v27  ;;  %2102 = vmatpush3.bf16.msra.mxu0 %v2232_v26  ;;  %v2303_v26 = vld [vmem:[%s2435_s11 + $0x148] ss:$20 sps:$4 sm:$0xff]   ;;  %v2304_v27 = vld [vmem:[%s2435_s11 + $0x38] ss:$20 sps:$4 sm:$0xff]  }
  0x2d   : > { %1967 = vmatprep.subr.bf16.mxu1 %v2221_v29  ;;  %2103 = vmatprep.subr.bf16.mxu0 %v2245_v38  ;;  %v2307_v29 = vld [vmem:[%s2435_s11 + $0x60] ss:$20 sps:$4 sm:$0xff]  }
  0x2f   : > { %1109 = vmatmul.mubr.bf16.gmra.mrb[4].mxu0 %v2219_v28  ;;  %1205 = vmatmul.mubr.bf16.gmra.mrb[4].mxu1 %v2220_v30  ;;  %v2305_v28 = vld [vmem:[%s2435_s11 + $0x174] ss:$20 sps:$4 sm:$0xff]   ;;  %v2308_v30 = vld [vmem:[%s2435_s11 + $0x170] ss:$20 sps:$4 sm:$0xff]  }
  0x30   : > { %1968 = vmatpush3.bf16.msra.mxu1 %v2222_v31  ;;  %1116 = vmatprep.mubr.bf16.mxu0 %v2225_v32  ;;  %v2309_v31 = vld [vmem:[%s2435_s11 + $0x88] ss:$20 sps:$4 sm:$0xff]  }
  0x31   : > { %1969 = vmatprep.subr.bf16.mxu1 %v2223_v33  ;;  %1212 = vmatprep.mubr.bf16.mxu1 %v2227_v34  ;;  %v2310_v32 = vld [vmem:[%s2435_s11 + $0x19c] ss:$20 sps:$4 sm:$0xff]   ;;  %v2313_v34 = vld [vmem:[%s2435_s11 + $0x198] ss:$20 sps:$4 sm:$0xff]  }
  0x32   : > { %2104 = vmatpush3.bf16.msra.mxu0 %v2245_v38  ;;  %v2312_v33 = vld [vmem:[%s2435_s11 + $0xb0] ss:$20 sps:$4 sm:$0xff]   ;;  %v2318_v38 = vld [vmem:[%s2435_s11 + $0x1c0] ss:$20 sps:$4 sm:$0xff]  }
  0x33   : > { %2105 = vmatprep.subr.bf16.mxu0 %v2259_v45 }
  0x34   : > { %1970 = vmatpush3.bf16.msra.mxu1 %v2224_v35  ;;  %v2314_v35 = vld [vmem:[%s2435_s11 + $0xd8] ss:$20 sps:$4 sm:$0xff]  }
  0x35   : > { %1971 = vmatprep.subr.bf16.mxu1 %v2231_v36  ;;  %v2315_v36 = vld [vmem:[%s2435_s11 + $0x1c4] ss:$20 sps:$4 sm:$0xff]  }
  0x36   : > { %2106 = vmatpush3.bf16.msra.mxu0 %v2259_v45  ;;  %v2327_v45 = vld [vmem:[%s2435_s11 + $0x1a0] ss:$20 sps:$4 sm:$0xff]  }
  0x37   : > { %1117 = vmatmul.mubr.bf16.gmra.mrb[8].mxu0 %v2229_v37  ;;  %1213 = vmatmul.mubr.bf16.gmra.mrb[8].mxu1 %v2230_v39  ;;  %v2317_v37 = vld [vmem:[%s2435_s11 + $0x100] ss:$20 sps:$4 sm:$0xff]   ;;  %v2319_v39 = vld [vmem:[%s2435_s11 + $0x128] ss:$20 sps:$4 sm:$0xff]  }
  0x38   : > { %1972 = vmatpush3.bf16.msra.mxu1 %v2233_v40  ;;  %1124 = vmatprep.mubr.bf16.mxu0 %v2236_v42  ;;  %v2320_v40 = vld [vmem:[%s2435_s11 + $0x1ec] ss:$20 sps:$4 sm:$0xff]   ;;  %v2323_v42 = vld [vmem:[%s2435_s11 + $0x1e8] ss:$20 sps:$4 sm:$0xff]  }
  0x39   : > { %1973 = vmatprep.subr.bf16.mxu1 %v2234_v41  ;;  %1220 = vmatprep.mubr.bf16.mxu1 %v2238_v43  ;;  %v2322_v41 = vld [vmem:[%s2435_s11 + $0x150] ss:$20 sps:$4 sm:$0xff]   ;;  %v2324_v43 = vld [vmem:[%s2435_s11 + $0x178] ss:$20 sps:$4 sm:$0xff]  }
  0x3a   : > { %2107 = vmatprep.subr.bf16.mxu0 %v2266_v52 }
  0x3b   : > { %2108 = vmatpush3.bf16.msra.mxu0 %v2266_v52  ;;  %v2335_v52 = vld [vmem:[%s2435_s11 + $0x264] ss:$20 sps:$4 sm:$0xff]  }
  0x3c   : > { %1974 = vmatpush3.bf16.msra.mxu1 %v2235_v44  ;;  %2109 = vmatprep.subr.bf16.mxu0 %v2279_v57  ;;  %v2325_v44 = vld [vmem:[%s2435_s11 + $0x214] ss:$20 sps:$4 sm:$0xff]  }
  0x3d   : > { %1975 = vmatprep.subr.bf16.mxu1 %v2242_v48  ;;  %v2330_v48 = vld [vmem:[%s2435_s11 + $0x23c] ss:$20 sps:$4 sm:$0xff]  }
  0x3f   : > { %1125 = vmatmul.mubr.bf16.gmra.mrb[12].mxu0 %v2240_v46  ;;  %1221 = vmatmul.mubr.bf16.gmra.mrb[12].mxu1 %v2241_v47  ;;  %v2328_v46 = vld [vmem:[%s2435_s11 + $0x210] ss:$20 sps:$4 sm:$0xff]   ;;  %v2329_v47 = vld [vmem:[%s2435_s11 + $0x1c8] ss:$20 sps:$4 sm:$0xff]  }
  0x40   : > { %1976 = vmatpush3.bf16.msra.mxu1 %v2243_v49  ;;  %1132 = vmatprep.mubr.bf16.mxu0 %v2247_v51  ;;  %v2332_v49 = vld [vmem:[%s2435_s11 + $0x1f0] ss:$20 sps:$4 sm:$0xff]   ;;  %v2334_v51 = vld [vmem:[%s2435_s11 + $0x218] ss:$20 sps:$4 sm:$0xff]  }
  0x41   : > { %1977 = vmatprep.subr.bf16.mxu1 %v2244_v50  ;;  %1261 = vmatprep.mubr.bf16.mxu1 %v2251_v53  ;;  %v2333_v50 = vld [vmem:[%s2435_s11 + $0x238] ss:$20 sps:$4 sm:$0xff]   ;;  %v2337_v53 = vld [vmem:[%s2435_s11 + $0x240] ss:$20 sps:$4 sm:$0xff]  }
  0x42   : > { %2110 = vmatpush3.bf16.msra.mxu0 %v2279_v57 }
  0x43   : > { %2111 = vmatprep.subr.bf16.mxu0 %v2286_v60 }
  0x44   : > { %1978 = vmatpush3.bf16.msra.mxu1 %v2246_v54  ;;  %v2338_v54 = vld [vmem:[%s2435_s11 + $0x260] ss:$20 sps:$4 sm:$0xff]  }
  0x46   : > { %2112 = vmatpush3.bf16.msra.mxu0 %v2286_v60 }
  0x47   : > { %1133 = vmatmul.mubr.bf16.gmra.mrb[16].mxu0 %v2252_v56  ;;  %1262 = vmatmul.mubr.bf16.vlgmr.msra.gmra.mrb[16].mxu1 %v2249_v55  ;;  %v2339_v55 = vld [vmem:[%s2435_s11 + $0x268] ss:$20 sps:$4 sm:$0xff]  }
  0x48   : > { %1140 = vmatprep.mubr.bf16.mxu0 %v2253_v58  ;;  %1269 = vmatprep.mubr.bf16.mxu1 %v2255_v59 }
  0x49   : > { %2113 = vmatprep.subr.bf16.mxu0 %v2299_v1 }
  0x4a   : > { %2114 = vmatpush3.bf16.msra.mxu0 %v2299_v1 }
  0x4f   : > { %1141 = vmatmul.mubr.bf16.gmra.mrb[20].mxu0 %v2257_v61  ;;  %1270 = vmatmul.mubr.bf16.gmra.mrb[20].mxu1 %v2258_v62 }
  0x50   : > { %1148 = vmatprep.mubr.bf16.mxu0 %v2260_v63  ;;  %1277 = vmatprep.mubr.bf16.mxu1 %v2262_v0 }
  0x57   : > { %1149 = vmatmul.mubr.bf16.gmra.mrb[24].mxu0 %v2264_v2  ;;  %1278 = vmatmul.mubr.bf16.gmra.mrb[24].mxu1 %v2265_v3 }
  0x58   : > { %1156 = vmatprep.mubr.bf16.mxu0 %v2267_v4  ;;  %1285 = vmatprep.mubr.bf16.mxu1 %v2269_v5 }
  0x5f   : > { %1157 = vmatmul.mubr.bf16.gmra.mrb[28].mxu0 %v2271_v6  ;;  %1286 = vmatmul.mubr.bf16.gmra.mrb[28].mxu1 %v2272_v7 }
  0x60   : > { %1164 = vmatprep.mubr.bf16.mxu0 %v2273_v8  ;;  %1293 = vmatprep.mubr.bf16.mxu1 %v2275_v9 }
  0x67   : > { %1165 = vmatmul.mubr.bf16.gmra.mrb[32].mxu0 %v2277_v10  ;;  %1294 = vmatmul.mubr.bf16.gmra.mrb[32].mxu1 %v2278_v11 }
  0x68   : > { %1172 = vmatprep.mubr.bf16.mxu0 %v2280_v12  ;;  %1301 = vmatprep.mubr.bf16.mxu1 %v2282_v13 }
  0x6f   : > { %1173 = vmatmul.mubr.bf16.gmra.mrb[36].mxu0 %v2284_v14  ;;  %1302 = vmatmul.mubr.bf16.gmra.mrb[36].mxu1 %v2285_v15 }
  0x70   : > { %1180 = vmatprep.mubr.bf16.mxu0 %v2287_v16  ;;  %1309 = vmatprep.mubr.bf16.mxu1 %v2289_v17 }
  0x77   : > { %1181 = vmatmul.mubr.bf16.gmra.mrb[40].mxu0 %v2291_v18  ;;  %1310 = vmatmul.mubr.bf16.gmra.mrb[40].mxu1 %v2292_v19 }
  0x78   : > { %1188 = vmatprep.mubr.bf16.mxu0 %v2293_v20  ;;  %1317 = vmatprep.mubr.bf16.mxu1 %v2295_v21 }
  0x7f   : > { %1189 = vmatmul.mubr.bf16.gmra.mrb[44].mxu0 %v2297_v22  ;;  %1318 = vmatmul.mubr.bf16.gmra.mrb[44].mxu1 %v2298_v23 }
  0x80   : > { %1325 = vmatprep.mubr.bf16.mxu1 %v2300_v24  ;;  %2115 = vmatprep.mubr.bf16.mxu0 %v2302_v25 }
  0x87   : > { %1326 = vmatmul.mubr.bf16.gmra.mrb[48].mxu1 %v2303_v26  ;;  %2116 = vmatmul.mubr.bf16.vlgmr.msra.gmra.mrb[48].mxu0 %v2304_v27 }
  0x88   : > { %1333 = vmatprep.mubr.bf16.mxu1 %v2305_v28  ;;  %2119 = vmatprep.mubr.bf16.mxu0 %v2307_v29 }
  0x8f   : > { %1334 = vmatmul.mubr.bf16.gmra.mrb[52].mxu1 %v2308_v30  ;;  %2120 = vmatmul.mubr.bf16.gmra.mrb[52].mxu0 %v2309_v31 }
  0x90   : > { %1341 = vmatprep.mubr.bf16.mxu1 %v2310_v32  ;;  %2123 = vmatprep.mubr.bf16.mxu0 %v2312_v33 }
  0x97   : > { %1342 = vmatmul.mubr.bf16.gmra.mrb[56].mxu1 %v2313_v34  ;;  %2124 = vmatmul.mubr.bf16.gmra.mrb[56].mxu0 %v2314_v35 }
  0x98   : > { %1349 = vmatprep.mubr.bf16.mxu1 %v2315_v36  ;;  %2127 = vmatprep.mubr.bf16.mxu0 %v2317_v37 }
  0x9f   : > { %1350 = vmatmul.mubr.bf16.gmra.mrb[60].mxu1 %v2318_v38  ;;  %2128 = vmatmul.mubr.bf16.gmra.mrb[60].mxu0 %v2319_v39 }
  0xa0   : > { %1357 = vmatprep.mubr.bf16.mxu1 %v2320_v40  ;;  %2131 = vmatprep.mubr.bf16.mxu0 %v2322_v41 }
  0xa7   : > { %1358 = vmatmul.mubr.bf16.gmra.mrb[64].mxu1 %v2323_v42  ;;  %2132 = vmatmul.mubr.bf16.gmra.mrb[64].mxu0 %v2324_v43  ;;  %v2629_v42 = vld [vmem:[%s2807_s2] ss:$0 sm:$0xff] }
  0xa8   : > { %1365 = vmatprep.mubr.bf16.mxu1 %v2325_v44  ;;  %2135 = vmatprep.mubr.bf16.mxu0 %v2327_v45 }
  0xaf   : > { %1366 = vmatmul.mubr.bf16.gmra.mrb[68].mxu1 %v2328_v46  ;;  %2136 = vmatmul.mubr.bf16.gmra.mrb[68].mxu0 %v2329_v47 }
  0xb0   : > { %1373 = vmatprep.mubr.bf16.mxu1 %v2330_v48  ;;  %2139 = vmatprep.mubr.bf16.mxu0 %v2332_v49 }
  0xb7   : > { %1374 = vmatmul.mubr.bf16.gmra.mrb[72].mxu1 %v2333_v50  ;;  %2140 = vmatmul.mubr.bf16.gmra.mrb[72].mxu0 %v2334_v51 }
  0xb8   : > { %1381 = vmatprep.mubr.bf16.mxu1 %v2335_v52  ;;  %2143 = vmatprep.mubr.bf16.mxu0 %v2337_v53 }
  0xbf   : > { %1382 = vmatmul.mubr.bf16.gmra.mrb[76].mxu1 %v2338_v54  ;;  %2144 = vmatmul.mubr.bf16.gmra.mrb[76].mxu0 %v2339_v55 }
  0xfa   : > { %v1939_v56 = vpop.f32.mrb[0].mxu1  ;;  %v1867_v57 = vpop.f32.mrb[0].mxu0 }
  0xfb   : > { %v1940_v58 = vpop.f32.mrb[1].mxu1  ;;  %v1868_v59 = vpop.f32.mrb[1].mxu0 }
  0xfc   : > { %v2610_v60 = vadd.f32 %v1940_v58, %v1939_v56  ;;  %v1942_v61 = vpop.f32.mrb[2].mxu1  ;;  %v1869_v62 = vadd.f32 %v1868_v59, %v1867_v57  ;;  %v1870_v63 = vpop.f32.mrb[2].mxu0 }
  0xfd   : > { %v1943_v0 = vpop.f32.mrb[3].mxu1  ;;  %v1871_v1 = vpop.f32.mrb[3].mxu0 }
  0xfe   : > { %v2612_v2 = vadd.f32 %v1943_v0, %v1942_v61  ;;  %v1872_v3 = vadd.f32 %v1871_v1, %v1870_v63  ;;  %v1103_v45 = vadd.f32 %v1869_v62, %v2629_v42 }
 0x100   : > { %v1106_v52 = vadd.f32 %v1872_v3, %v2629_v42 }
 0x102   : > { %v1945_v4 = vpop.f32.mrb[4].mxu1  ;;  %v1873_v5 = vpop.f32.mrb[4].mxu0 }
 0x103   : > { %v1946_v6 = vpop.f32.mrb[5].mxu1  ;;  %v1874_v7 = vpop.f32.mrb[5].mxu0 }
 0x104   : > { %v2614_v8 = vadd.f32 %v1946_v6, %v1945_v4  ;;  %v1948_v9 = vpop.f32.mrb[6].mxu1  ;;  %v1875_v10 = vadd.f32 %v1874_v7, %v1873_v5  ;;  %v1876_v11 = vpop.f32.mrb[6].mxu0 }
 0x105   : > { %v1949_v12 = vpop.f32.mrb[7].mxu1  ;;  %v1877_v13 = vpop.f32.mrb[7].mxu0 }
 0x106   : > { %v2616_v14 = vadd.f32 %v1949_v12, %v1948_v9  ;;  %v1878_v15 = vadd.f32 %v1877_v13, %v1876_v11  ;;  %v1111_v62 = vadd.f32 %v1875_v10, %v2629_v42 }
 0x108   : > { %v1114_v3 = vadd.f32 %v1878_v15, %v2629_v42 }
 0x10a   : > { %v1951_v16 = vpop.f32.mrb[8].mxu1  ;;  %v1879_v17 = vpop.f32.mrb[8].mxu0 }
 0x10b   : > { %v1952_v18 = vpop.f32.mrb[9].mxu1  ;;  %v1880_v19 = vpop.f32.mrb[9].mxu0 }
 0x10c   : > { %v2618_v20 = vadd.f32 %v1952_v18, %v1951_v16  ;;  %v1954_v21 = vpop.f32.mrb[10].mxu1  ;;  %v1881_v22 = vadd.f32 %v1880_v19, %v1879_v17  ;;  %v1882_v23 = vpop.f32.mrb[10].mxu0 }
 0x10d   : > { %v1955_v24 = vpop.f32.mrb[11].mxu1  ;;  %v1883_v25 = vpop.f32.mrb[11].mxu0 }
 0x10e   : > { %v2620_v26 = vadd.f32 %v1955_v24, %v1954_v21  ;;  %v1884_v27 = vadd.f32 %v1883_v25, %v1882_v23  ;;  %v1119_v10 = vadd.f32 %v1881_v22, %v2629_v42 }
 0x110   : > { %v1122_v15 = vadd.f32 %v1884_v27, %v2629_v42 }
 0x112   : > { %v1957_v28 = vpop.f32.mrb[12].mxu1  ;;  %v1885_v29 = vpop.f32.mrb[12].mxu0 }
 0x113   : > { %v1958_v30 = vpop.f32.mrb[13].mxu1  ;;  %v1886_v31 = vpop.f32.mrb[13].mxu0 }
 0x114   : > { %v2622_v32 = vadd.f32 %v1958_v30, %v1957_v28  ;;  %v1960_v33 = vpop.f32.mrb[14].mxu1  ;;  %v1887_v34 = vadd.f32 %v1886_v31, %v1885_v29  ;;  %v1888_v35 = vpop.f32.mrb[14].mxu0 }
 0x115   : > { %v1961_v36 = vpop.f32.mrb[15].mxu1  ;;  %v1889_v37 = vpop.f32.mrb[15].mxu0 }
 0x116   : > { %v2624_v38 = vadd.f32 %v1961_v36, %v1960_v33  ;;  %v1890_v39 = vadd.f32 %v1889_v37, %v1888_v35  ;;  %v1127_v22 = vadd.f32 %v1887_v34, %v2629_v42 }
 0x118   : > { %v1130_v27 = vadd.f32 %v1890_v39, %v2629_v42 }
 0x11a   : > { %v1979_v40 = vpop.f32.mrb[16].mxu1  ;;  %v1891_v41 = vpop.f32.mrb[16].mxu0 }
 0x11b   : > { %v1980_v43 = vpop.f32.mrb[17].mxu1  ;;  %v1892_v44 = vpop.f32.mrb[17].mxu0 }
 0x11c   : > { %v1981_v46 = vadd.f32 %v1980_v43, %v1979_v40  ;;  %v1982_v47 = vpop.f32.mrb[18].mxu1  ;;  %v1893_v48 = vadd.f32 %v1892_v44, %v1891_v41  ;;  %v1894_v49 = vpop.f32.mrb[18].mxu0 }
 0x11d   : > { %v1983_v50 = vpop.f32.mrb[19].mxu1  ;;  %v1895_v51 = vpop.f32.mrb[19].mxu0 }
 0x11e   : > { %v1984_v53 = vadd.f32 %v1983_v50, %v1982_v47  ;;  %v1896_v54 = vadd.f32 %v1895_v51, %v1894_v49  ;;  %v2633_v55 = vadd.f32 %v1981_v46, %v1103_v45  ;;  %v1135_v34 = vadd.f32 %v1893_v48, %v2629_v42 }
 0x120   : > { %v2635_v56 = vadd.f32 %v1984_v53, %v1106_v52  ;;  %v1138_v39 = vadd.f32 %v1896_v54, %v2629_v42 }
 0x122   : > { %v1985_v57 = vpop.f32.mrb[20].mxu1  ;;  %v1897_v58 = vpop.f32.mrb[20].mxu0 }
 0x123   : > { %v1986_v59 = vpop.f32.mrb[21].mxu1  ;;  %v1898_v61 = vpop.f32.mrb[21].mxu0 }
 0x124   : > { %v1987_v63 = vadd.f32 %v1986_v59, %v1985_v57  ;;  %v1988_v0 = vpop.f32.mrb[22].mxu1  ;;  %v1899_v1 = vadd.f32 %v1898_v61, %v1897_v58  ;;  %v1900_v4 = vpop.f32.mrb[22].mxu0 }
 0x125   : > { %v1989_v5 = vpop.f32.mrb[23].mxu1  ;;  %v1901_v6 = vpop.f32.mrb[23].mxu0 }
 0x126   : > { %v1990_v7 = vadd.f32 %v1989_v5, %v1988_v0  ;;  %v1902_v9 = vadd.f32 %v1901_v6, %v1900_v4  ;;  %v2639_v11 = vadd.f32 %v1987_v63, %v1111_v62 }
 0x128   : > { %v2641_v12 = vadd.f32 %v1990_v7, %v1114_v3 }
 0x12a   : > { %v1991_v13 = vpop.f32.mrb[24].mxu1  ;;  %v1903_v16 = vpop.f32.mrb[24].mxu0 }
 0x12b   : > { %v1992_v17 = vpop.f32.mrb[25].mxu1  ;;  %v1904_v18 = vpop.f32.mrb[25].mxu0 }
 0x12c   : > { %v1993_v19 = vadd.f32 %v1992_v17, %v1991_v13  ;;  %v1994_v21 = vpop.f32.mrb[26].mxu1  ;;  %v1905_v23 = vadd.f32 %v1904_v18, %v1903_v16  ;;  %v1906_v24 = vpop.f32.mrb[26].mxu0 }
 0x12d   : > { %v1995_v25 = vpop.f32.mrb[27].mxu1  ;;  %v1907_v28 = vpop.f32.mrb[27].mxu0 }
 0x12e   : > { %v1996_v29 = vadd.f32 %v1995_v25, %v1994_v21  ;;  %v1908_v30 = vadd.f32 %v1907_v28, %v1906_v24  ;;  %v2645_v31 = vadd.f32 %v1993_v19, %v1119_v10  ;;  %v1143_v10 = vadd.f32 %v1899_v1, %v2629_v42 }
 0x130   : > { %v2647_v33 = vadd.f32 %v1996_v29, %v1122_v15  ;;  %v1146_v15 = vadd.f32 %v1902_v9, %v2629_v42 }
 0x132   : > { %v1997_v35 = vpop.f32.mrb[28].mxu1  ;;  %v1909_v36 = vpop.f32.mrb[28].mxu0 }
 0x133   : > { %v1998_v37 = vpop.f32.mrb[29].mxu1  ;;  %v1910_v40 = vpop.f32.mrb[29].mxu0 }
 0x134   : > { %v1999_v41 = vadd.f32 %v1998_v37, %v1997_v35  ;;  %v2000_v43 = vpop.f32.mrb[30].mxu1  ;;  %v1911_v44 = vadd.f32 %v1910_v40, %v1909_v36  ;;  %v1912_v45 = vpop.f32.mrb[30].mxu0 }
 0x135   : > { %v2001_v46 = vpop.f32.mrb[31].mxu1  ;;  %v1913_v47 = vpop.f32.mrb[31].mxu0 }
 0x136   : > { %v2002_v49 = vadd.f32 %v2001_v46, %v2000_v43  ;;  %v1914_v50 = vadd.f32 %v1913_v47, %v1912_v45  ;;  %v2651_v51 = vadd.f32 %v1999_v41, %v1127_v22  ;;  %v1151_v43 = vadd.f32 %v1905_v23, %v2629_v42 }
 0x138   : > { %v2653_v52 = vadd.f32 %v2002_v49, %v1130_v27 }
 0x13a   : > { %v2003_v53 = vpop.f32.mrb[32].mxu1  ;;  %v1915_v57 = vpop.f32.mrb[32].mxu0 }
 0x13b   : > { %v2004_v58 = vpop.f32.mrb[33].mxu1  ;;  %v1916_v59 = vpop.f32.mrb[33].mxu0 }
 0x13c   : > { %v2005_v61 = vadd.f32 %v2004_v58, %v2003_v53  ;;  %v2006_v62 = vpop.f32.mrb[34].mxu1  ;;  %v2656_v63 = vadd.f32 %v1916_v59, %v1915_v57  ;;  %v1918_v0 = vpop.f32.mrb[34].mxu0  ;;  %v1154_v53 = vadd.f32 %v1908_v30, %v2629_v42 }
 0x13d   : > { %v2007_v4 = vpop.f32.mrb[35].mxu1  ;;  %v1919_v5 = vpop.f32.mrb[35].mxu0 }
 0x13e   : > { %v2008_v6 = vadd.f32 %v2007_v4, %v2006_v62  ;;  %v2659_v3 = vadd.f32 %v1919_v5, %v1918_v0  ;;  %v2661_v7 = vadd.f32 %v2005_v61, %v1135_v34  ;;  %v1159_v4 = vadd.f32 %v1911_v44, %v2629_v42 }
 0x140   : > { %v2663_v13 = vadd.f32 %v2008_v6, %v1138_v39 }
 0x142   : > { %v2009_v16 = vpop.f32.mrb[36].mxu1  ;;  %v1921_v17 = vpop.f32.mrb[36].mxu0 }
 0x143   : > { %v2010_v18 = vpop.f32.mrb[37].mxu1  ;;  %v1922_v48 = vpop.f32.mrb[37].mxu0 }
 0x144   : > { %v2011_v19 = vadd.f32 %v2010_v18, %v2009_v16  ;;  %v2012_v21 = vpop.f32.mrb[38].mxu1  ;;  %v2666_v24 = vadd.f32 %v1922_v48, %v1921_v17  ;;  %v1924_v25 = vpop.f32.mrb[38].mxu0  ;;  %v1162_v18 = vadd.f32 %v1914_v50, %v2629_v42 }
 0x145   : > { %v2013_v28 = vpop.f32.mrb[39].mxu1  ;;  %v1925_v54 = vpop.f32.mrb[39].mxu0 }
 0x146   : > { %v2014_v29 = vadd.f32 %v2013_v28, %v2012_v21  ;;  %v2669_v35 = vadd.f32 %v1925_v54, %v1924_v25  ;;  %v2671_v36 = vadd.f32 %v2011_v19, %v1143_v10 }
 0x148   : > { %v2673_v37 = vadd.f32 %v2014_v29, %v1146_v15  ;;  %v1167_v29 = vadd.f32 %v2656_v63, %v2629_v42 }
 0x14a   : > { %v2015_v40 = vpop.f32.mrb[40].mxu1  ;;  %v1927_v22 = vpop.f32.mrb[40].mxu0 }
 0x14b   : > { %v2016_v41 = vpop.f32.mrb[41].mxu1  ;;  %v1928_v1 = vpop.f32.mrb[41].mxu0 }
 0x14c   : > { %v2017_v45 = vadd.f32 %v2016_v41, %v2015_v40  ;;  %v2018_v46 = vpop.f32.mrb[42].mxu1  ;;  %v2676_v47 = vadd.f32 %v1928_v1, %v1927_v22  ;;  %v1930_v27 = vpop.f32.mrb[42].mxu0 }
 0x14d   : > { %v2019_v49 = vpop.f32.mrb[43].mxu1  ;;  %v1931_v9 = vpop.f32.mrb[43].mxu0 }
 0x14e   : > { %v2020_v57 = vadd.f32 %v2019_v49, %v2018_v46  ;;  %v2679_v58 = vadd.f32 %v1931_v9, %v1930_v27  ;;  %v2681_v59 = vadd.f32 %v2017_v45, %v1151_v43 }
 0x150   : > { %v2683_v34 = vadd.f32 %v2020_v57, %v1154_v53 }
 0x152   : > { %v2021_v61 = vpop.f32.mrb[44].mxu1  ;;  %v1933_v62 = vpop.f32.mrb[44].mxu0 }
 0x153   : > { %v2022_v23 = vpop.f32.mrb[45].mxu1  ;;  %v1934_v0 = vpop.f32.mrb[45].mxu0 }
 0x154   : > { %v2023_v5 = vadd.f32 %v2022_v23, %v2021_v61  ;;  %v2024_v39 = vpop.f32.mrb[46].mxu1  ;;  %v2686_v6 = vadd.f32 %v1934_v0, %v1933_v62  ;;  %v1936_v16 = vpop.f32.mrb[46].mxu0 }
 0x155   : > { %v2025_v30 = vpop.f32.mrb[47].mxu1  ;;  %v1937_v17 = vpop.f32.mrb[47].mxu0 }
 0x156   : > { %v2026_v48 = vadd.f32 %v2025_v30, %v2024_v39  ;;  %v2689_v10 = vadd.f32 %v1937_v17, %v1936_v16  ;;  %v2691_v19 = vadd.f32 %v2023_v5, %v1159_v4  ;;  %v1178_v16 = vadd.f32 %v2669_v35, %v2629_v42 }
 0x158   : > { %v2693_v21 = vadd.f32 %v2026_v48, %v1162_v18 }
 0x15a   : > { %v2027_v25 = vpop.f32.mrb[48].mxu1  ;;  %v2117_v28 = vpop.f32.mrb[48].mxu0 }
 0x15b   : > { %v1433_v44 = vadd.f32 %v2117_v28, %v2639_v11  ;;  %v2028_v54 = vpop.f32.mrb[49].mxu1  ;;  %v1424_v15 = vpop.f32.mrb[49].mxu0  ;;  %v1170_v11 = vadd.f32 %v2659_v3, %v2629_v42 }
 0x15c   : > { %v2029_v50 = vadd.f32 %v2028_v54, %v2027_v25  ;;  %v1425_v40 = vadd.f32 %v1424_v15, %v2633_v55  ;;  %v2030_v22 = vpop.f32.mrb[50].mxu1  ;;  %v2118_v41 = vpop.f32.mrb[50].mxu0 }
 0x15d   : > { %v1553_v1 = vmax.f32 %v1433_v44, 0.0  ;;  %v1436_v63 = vadd.f32 %v2118_v41, %v2641_v12  ;;  %v2031_v43 = vpop.f32.mrb[51].mxu1  ;;  %v1427_v45 = vpop.f32.mrb[51].mxu0 }
 0x15e   : > { %v1551_v46 = vmax.f32 %v1425_v40, 0.0  ;;  %v2032_v27 = vadd.f32 %v2031_v43, %v2030_v22  ;;  %v1428_v49 = vadd.f32 %v1427_v45, %v2635_v56  ;;  %v2709_v9 = vadd.f32 %v2029_v50, %v1167_v29 }
 0x15f   : > { %1585 = vst [vmem:[%s2702_s12 + $0x10] sm:$0xff] %v1553_v1  ;;  %v1554_v55 = vmax.f32 %v1436_v63, 0.0  ;;  %v1175_v56 = vadd.f32 %v2666_v24, %v2629_v42  ;;  %v1183_v40 = vadd.f32 %v2676_v47, %v2629_v42  ;;  %v1186_v1 = vadd.f32 %v2679_v58, %v2629_v42 }
 0x160   : > { %1583 = vst [vmem:[%s2702_s12] sm:$0xff] %v1551_v46  ;;  %v1552_v53 = vmax.f32 %v1428_v49, 0.0  ;;  %v2713_v57 = vadd.f32 %v2032_v27, %v1170_v11 }
 0x161   : > { %1586 = vst [vmem:[%s2702_s12 + $0x18] sm:$0xff] %v1554_v55 }
 0x162   : > { %1584 = vst [vmem:[%s2702_s12 + $0x8] sm:$0xff] %v1552_v53  ;;  %v2033_v3 = vpop.f32.mrb[52].mxu1  ;;  %v2121_v61 = vpop.f32.mrb[52].mxu0 }
 0x163   : > { %v1449_v12 = vadd.f32 %v2121_v61, %v2651_v51  ;;  %v2034_v62 = vpop.f32.mrb[53].mxu1  ;;  %v1440_v23 = vpop.f32.mrb[53].mxu0 }
 0x164   : > { %v2035_v0 = vadd.f32 %v2034_v62, %v2033_v3  ;;  %v1441_v4 = vadd.f32 %v1440_v23, %v2645_v31  ;;  %v2036_v5 = vpop.f32.mrb[54].mxu1  ;;  %v2122_v39 = vpop.f32.mrb[54].mxu0 }
 0x165   : > { %v1557_v30 = vmax.f32 %v1449_v12, 0.0  ;;  %v1452_v51 = vadd.f32 %v2122_v39, %v2653_v52  ;;  %v2037_v17 = vpop.f32.mrb[55].mxu1  ;;  %v1443_v18 = vpop.f32.mrb[55].mxu0 }
 0x166   : > { %v1555_v48 = vmax.f32 %v1441_v4, 0.0  ;;  %v2038_v25 = vadd.f32 %v2037_v17, %v2036_v5  ;;  %v1444_v24 = vadd.f32 %v1443_v18, %v2647_v33  ;;  %v1336_v28 = vadd.f32 %v2035_v0, %v1175_v56 }
 0x167   : > { %1589 = vst [vmem:[%s2702_s12 + $0x30] sm:$0xff] %v1557_v30  ;;  %v1558_v44 = vmax.f32 %v1452_v51, 0.0  ;;  %v1194_v4 = vadd.f32 %v2689_v10, %v2629_v42 }
 0x168   : > { %1587 = vst [vmem:[%s2702_s12 + $0x20] sm:$0xff] %v1555_v48  ;;  %v1556_v31 = vmax.f32 %v1444_v24, 0.0  ;;  %v2727_v54 = vadd.f32 %v2038_v25, %v1178_v16 }
 0x169   : > { %1590 = vst [vmem:[%s2702_s12 + $0x38] sm:$0xff] %v1558_v44 }
 0x16a   : > { %1588 = vst [vmem:[%s2702_s12 + $0x28] sm:$0xff] %v1556_v31  ;;  %v2039_v15 = vpop.f32.mrb[56].mxu1  ;;  %v2125_v35 = vpop.f32.mrb[56].mxu0  ;;  %v1199_v31 = vadd.f32 %v2610_v60, %v2629_v42 }
 0x16b   : > { %v1465_v29 = vadd.f32 %v2125_v35, %v2671_v36  ;;  %v2040_v52 = vpop.f32.mrb[57].mxu1  ;;  %v1456_v50 = vpop.f32.mrb[57].mxu0 }
 0x16c   : > { %v2041_v33 = vadd.f32 %v2040_v52, %v2039_v15  ;;  %v1457_v22 = vadd.f32 %v1456_v50, %v2661_v7  ;;  %v2042_v41 = vpop.f32.mrb[58].mxu1  ;;  %v2126_v11 = vpop.f32.mrb[58].mxu0  ;;  %v1202_v52 = vadd.f32 %v2612_v2, %v2629_v42 }
 0x16d   : > { %v1561_v63 = vmax.f32 %v1465_v29, 0.0  ;;  %v1468_v36 = vadd.f32 %v2126_v11, %v2673_v37  ;;  %v2043_v43 = vpop.f32.mrb[59].mxu1  ;;  %v1459_v45 = vpop.f32.mrb[59].mxu0 }
 0x16e   : > { %v1559_v46 = vmax.f32 %v1457_v22, 0.0  ;;  %v2044_v27 = vadd.f32 %v2043_v43, %v2042_v41  ;;  %v1460_v47 = vadd.f32 %v1459_v45, %v2663_v13  ;;  %v2739_v49 = vadd.f32 %v2041_v33, %v1183_v40 }
 0x16f   : > { %1593 = vst [vmem:[%s2702_s12 + $0x50] sm:$0xff] %v1561_v63  ;;  %v1562_v7 = vmax.f32 %v1468_v36, 0.0  ;;  %v1191_v13 = vadd.f32 %v2686_v6, %v2629_v42 }
 0x170   : > { %1591 = vst [vmem:[%s2702_s12 + $0x40] sm:$0xff] %v1559_v46  ;;  %v1560_v55 = vmax.f32 %v1460_v47, 0.0  ;;  %v2743_v53 = vadd.f32 %v2044_v27, %v1186_v1  ;;  %v1207_v46 = vadd.f32 %v2614_v8, %v2629_v42 }
 0x171   : > { %1594 = vst [vmem:[%s2702_s12 + $0x58] sm:$0xff] %v1562_v7 }
 0x172   : > { %1592 = vst [vmem:[%s2702_s12 + $0x48] sm:$0xff] %v1560_v55  ;;  %v2045_v58 = vpop.f32.mrb[60].mxu1  ;;  %v2129_v3 = vpop.f32.mrb[60].mxu0  ;;  %v1210_v55 = vadd.f32 %v2616_v14, %v2629_v42 }
 0x173   : > { %v1481_v37 = vadd.f32 %v2129_v3, %v2691_v19  ;;  %v2046_v61 = vpop.f32.mrb[61].mxu1  ;;  %v1472_v12 = vpop.f32.mrb[61].mxu0 }
 0x174   : > { %v2047_v62 = vadd.f32 %v2046_v61, %v2045_v58  ;;  %v1473_v23 = vadd.f32 %v1472_v12, %v2681_v59  ;;  %v2048_v56 = vpop.f32.mrb[62].mxu1  ;;  %v2130_v0 = vpop.f32.mrb[62].mxu0 }
 0x175   : > { %v1565_v5 = vmax.f32 %v1481_v37, 0.0  ;;  %v1484_v19 = vadd.f32 %v2130_v0, %v2693_v21  ;;  %v2049_v39 = vpop.f32.mrb[63].mxu1  ;;  %v1475_v16 = vpop.f32.mrb[63].mxu0 }
 0x176   : > { %v1563_v30 = vmax.f32 %v1473_v23, 0.0  ;;  %v2050_v51 = vadd.f32 %v2049_v39, %v2048_v56  ;;  %v1476_v6 = vadd.f32 %v1475_v16, %v2683_v34  ;;  %v1352_v17 = vadd.f32 %v2047_v62, %v1191_v13 }
 0x177   : > { %1597 = vst [vmem:[%s2702_s12 + $0x70] sm:$0xff] %v1565_v5  ;;  %v1566_v18 = vmax.f32 %v1484_v19, 0.0  ;;  %v1215_v39 = vadd.f32 %v2618_v20, %v2629_v42 }
 0x178   : > { %1595 = vst [vmem:[%s2702_s12 + $0x60] sm:$0xff] %v1563_v30  ;;  %v1564_v59 = vmax.f32 %v1476_v6, 0.0  ;;  %v1355_v48 = vadd.f32 %v2050_v51, %v1194_v4  ;;  %v1218_v6 = vadd.f32 %v2620_v26, %v2629_v42 }
 0x179   : > { %1598 = vst [vmem:[%s2702_s12 + $0x78] sm:$0xff] %v1566_v18 }
 0x17a   : > { %1596 = vst [vmem:[%s2702_s12 + $0x68] sm:$0xff] %v1564_v59  ;;  %v2051_v25 = vpop.f32.mrb[64].mxu1  ;;  %v2133_v24 = vpop.f32.mrb[64].mxu0 }
 0x17b   : > { %v1497_v10 = vadd.f32 %v2133_v24, %v1336_v28  ;;  %v2052_v44 = vpop.f32.mrb[65].mxu1  ;;  %v1488_v21 = vpop.f32.mrb[65].mxu0 }
 0x17c   : > { %v2053_v15 = vadd.f32 %v2052_v44, %v2051_v25  ;;  %v1489_v34 = vadd.f32 %v1488_v21, %v2709_v9  ;;  %v2054_v35 = vpop.f32.mrb[66].mxu1  ;;  %v2134_v29 = vpop.f32.mrb[66].mxu0 }
 0x17d   : > { %v1569_v50 = vmax.f32 %v1497_v10, 0.0  ;;  %v1500_v28 = vadd.f32 %v2134_v29, %v2727_v54  ;;  %v2055_v40 = vpop.f32.mrb[67].mxu1  ;;  %v1491_v33 = vpop.f32.mrb[67].mxu0  ;;  %v1223_v29 = vadd.f32 %v2622_v32, %v2629_v42 }
 0x17e   : > { %v1567_v22 = vmax.f32 %v1489_v34, 0.0  ;;  %v2056_v41 = vadd.f32 %v2055_v40, %v2054_v35  ;;  %v1492_v60 = vadd.f32 %v1491_v33, %v2713_v57  ;;  %v1360_v11 = vadd.f32 %v2053_v15, %v1199_v31 }
 0x17f   : > { %1601 = vst [vmem:[%s2702_s12 + $0x90] sm:$0xff] %v1569_v50  ;;  %v1570_v1 = vmax.f32 %v1500_v28, 0.0  ;;  %v1226_v33 = vadd.f32 %v2624_v38, %v2629_v42 }
 0x180   : > { %1599 = vst [vmem:[%s2702_s12 + $0x80] sm:$0xff] %v1567_v22  ;;  %v1568_v9 = vmax.f32 %v1492_v60, 0.0  ;;  %v1363_v63 = vadd.f32 %v2056_v41, %v1202_v52 }
 0x181   : > { %1602 = vst [vmem:[%s2702_s12 + $0x98] sm:$0xff] %v1570_v1 }
 0x182   : > { %1600 = vst [vmem:[%s2702_s12 + $0x88] sm:$0xff] %v1568_v9  ;;  %v2057_v36 = vpop.f32.mrb[68].mxu1  ;;  %v2137_v43 = vpop.f32.mrb[68].mxu0 }
 0x183   : > { %v1513_v2 = vadd.f32 %v2137_v43, %v1352_v17  ;;  %v2058_v45 = vpop.f32.mrb[69].mxu1  ;;  %v1504_v54 = vpop.f32.mrb[69].mxu0 }
 0x184   : > { %v2059_v27 = vadd.f32 %v2058_v45, %v2057_v36  ;;  %v1505_v57 = vadd.f32 %v1504_v54, %v2739_v49  ;;  %v2060_v47 = vpop.f32.mrb[70].mxu1  ;;  %v2138_v7 = vpop.f32.mrb[70].mxu0 }
 0x185   : > { %v1573_v58 = vmax.f32 %v1513_v2, 0.0  ;;  %v1516_v3 = vadd.f32 %v2138_v7, %v1355_v48  ;;  %v2061_v37 = vpop.f32.mrb[71].mxu1  ;;  %v1507_v61 = vpop.f32.mrb[71].mxu0 }
 0x186   : > { %v1571_v12 = vmax.f32 %v1505_v57, 0.0  ;;  %v2062_v13 = vadd.f32 %v2061_v37, %v2060_v47  ;;  %v1508_v62 = vadd.f32 %v1507_v61, %v2743_v53  ;;  %v1368_v8 = vadd.f32 %v2059_v27, %v1207_v46 }
 0x187   : > { %1605 = vst [vmem:[%s2702_s12 + $0xb0] sm:$0xff] %v1573_v58  ;;  %v1574_v23 = vmax.f32 %v1516_v3, 0.0 }
 0x188   : > { %1603 = vst [vmem:[%s2702_s12 + $0xa0] sm:$0xff] %v1571_v12  ;;  %v1572_v49 = vmax.f32 %v1508_v62, 0.0  ;;  %v1371_v56 = vadd.f32 %v2062_v13, %v1210_v55 }
 0x189   : > { %1606 = vst [vmem:[%s2702_s12 + $0xb8] sm:$0xff] %v1574_v23 }
 0x18a   : > { %1604 = vst [vmem:[%s2702_s12 + $0xa8] sm:$0xff] %v1572_v49  ;;  %v2063_v0 = vpop.f32.mrb[72].mxu1  ;;  %v2141_v4 = vpop.f32.mrb[72].mxu0 }
 0x18b   : > { %v1529_v5 = vadd.f32 %v2141_v4, %v1368_v8  ;;  %v2064_v14 = vpop.f32.mrb[73].mxu1  ;;  %v1520_v19 = vpop.f32.mrb[73].mxu0 }
 0x18c   : > { %v2065_v16 = vadd.f32 %v2064_v14, %v2063_v0  ;;  %v1521_v53 = vadd.f32 %v1520_v19, %v1360_v11  ;;  %v2066_v30 = vpop.f32.mrb[74].mxu1  ;;  %v2142_v51 = vpop.f32.mrb[74].mxu0 }
 0x18d   : > { %v1577_v17 = vmax.f32 %v1529_v5, 0.0  ;;  %v1532_v18 = vadd.f32 %v2142_v51, %v1371_v56  ;;  %v2067_v59 = vpop.f32.mrb[75].mxu1  ;;  %v1523_v48 = vpop.f32.mrb[75].mxu0 }
 0x18e   : > { %v1575_v25 = vmax.f32 %v1521_v53, 0.0  ;;  %v2068_v24 = vadd.f32 %v2067_v59, %v2066_v30  ;;  %v1524_v10 = vadd.f32 %v1523_v48, %v1363_v63  ;;  %v1376_v44 = vadd.f32 %v2065_v16, %v1215_v39 }
 0x18f   : > { %1609 = vst [vmem:[%s2702_s12 + $0xd0] sm:$0xff] %v1577_v17  ;;  %v1578_v20 = vmax.f32 %v1532_v18, 0.0 }
 0x190   : > { %1607 = vst [vmem:[%s2702_s12 + $0xc0] sm:$0xff] %v1575_v25  ;;  %v1576_v21 = vmax.f32 %v1524_v10, 0.0  ;;  %v1379_v31 = vadd.f32 %v2068_v24, %v1218_v6 }
 0x191   : > { %1610 = vst [vmem:[%s2702_s12 + $0xd8] sm:$0xff] %v1578_v20 }
 0x192   : > { %1608 = vst [vmem:[%s2702_s12 + $0xc8] sm:$0xff] %v1576_v21  ;;  %v2069_v15 = vpop.f32.mrb[76].mxu1  ;;  %v2145_v34 = vpop.f32.mrb[76].mxu0 }
 0x193   : > { %v2070_v35 = vpop.f32.mrb[77].mxu1  ;;  %v1536_v26 = vpop.f32.mrb[77].mxu0 }
 0x194   : > { %v2071_v52 = vadd.f32 %v2070_v35, %v2069_v15  ;;  %v1537_v50 = vadd.f32 %v1536_v26, %v1376_v44  ;;  %v2072_v28 = vpop.f32.mrb[78].mxu1  ;;  %v2146_v40 = vpop.f32.mrb[78].mxu0 }
 0x195   : > { %v2073_v22 = vpop.f32.mrb[79].mxu1  ;;  %v1539_v41 = vpop.f32.mrb[79].mxu0 }
 0x196   : > { %v1384_v60 = vadd.f32 %v2071_v52, %v1223_v29  ;;  %v1579_v11 = vmax.f32 %v1537_v50, 0.0  ;;  %v2074_v1 = vadd.f32 %v2073_v22, %v2072_v28  ;;  %v1540_v9 = vadd.f32 %v1539_v41, %v1379_v31 }
 0x198   : > { %v1545_v63 = vadd.f32 %v2145_v34, %v1384_v60  ;;  %1611 = vst [vmem:[%s2702_s12 + $0xe0] sm:$0xff] %v1579_v11  ;;  %v1387_v36 = vadd.f32 %v2074_v1, %v1226_v33  ;;  %v1580_v32 = vmax.f32 %v1540_v9, 0.0 }
 0x19a   : > { %v1581_v43 = vmax.f32 %v1545_v63, 0.0  ;;  %v1548_v2 = vadd.f32 %v2146_v40, %v1387_v36  ;;  %1612 = vst [vmem:[%s2702_s12 + $0xe8] sm:$0xff] %v1580_v32 }
 0x19c   : > { %1613 = vst [vmem:[%s2702_s12 + $0xf0] sm:$0xff] %v1581_v43  ;;  %v1582_v45 = vmax.f32 %v1548_v2, 0.0 }
 0x19e   : > { %1614 = vst [vmem:[%s2702_s12 + $0xf8] sm:$0xff] %v1582_v45 }
 0x19f PF: > { %s13_s14 = sadd.s32 1, %s2362_s14   ;;  %s2809_s12 = smov %s2358_s13 }
 0x1a0   : > { %p10_p5 = scmp.ge.s32.totalorder %s13_s14, 10   ;;  %s2810_s13 = smov %s2812_s15 }
 0x1a2   :  { %12 = sbr.rel (!%p10_p5) target bundleno = 2 (0x2), region = 68 }

</bundles_post_ra>
